<compile_context>
chip_gen: v6e
topology: v6e:2x2x1
jax: 0.10.0
libtpu: 0.0.40
codegen_flags: <defaults>
</compile_context>

<pallas_src>
import math
from functools import partial

import jax
import jax.numpy as jnp
from jax.experimental import pallas as pl
from jax.experimental.pallas import tpu as pltpu


# ----------------------------------------------------------------------------
# tiling helpers
# ----------------------------------------------------------------------------
def _round_up(x, m):
    return (x + m - 1) // m * m


def _choose_tile(size, unit, max_tile):
    """Return (padded_size, tile).  tile is a multiple of `unit`, <= max_tile,
    and padded_size is a multiple of tile (pad-to-tile instead of odd divisors
    so stores stay lane/sublane dense and DMAs aligned)."""
    padded = _round_up(size, unit)
    if padded <= max_tile:
        return padded, padded
    tile = max_tile - (max_tile % unit)
    padded = _round_up(size, tile)
    return padded, tile


def _pad2(x, rows, cols):
    pr, pc = rows - x.shape[0], cols - x.shape[1]
    if pr or pc:            # static check: no pad op emitted for aligned dims
        x = jnp.pad(x, ((0, pr), (0, pc)))
    return x


# Tile caps: bf16 blocks double-buffered stay ~10-14 MiB -> fits the default
# 32 MiB scoped VMEM limit on every generation (v7x has only 64 MiB total).
_TM, _TN, _TK = 512, 1024, 1024


# ----------------------------------------------------------------------------
# Pallas kernels
# ----------------------------------------------------------------------------
def _gelu(x):
    # tanh-approx GELU -> EUP slot.  (PyTorch nn.GELU defaults to erf; the
    # erf variant burns VALU slots — flip approximate=False if bit-parity
    # with an erf-GELU checkpoint is required.)
    return jax.nn.gelu(x, approximate=True)


def _matmul_kernel(*refs, act, has_bias):
    """Tiled matmul, grid (Mt, Nt, Kt).  bias (+ GELU) fused at last k step."""
    if has_bias:
        x_ref, w_ref, b_ref, o_ref, acc_ref = refs
    else:
        x_ref, w_ref, o_ref, acc_ref = refs
        b_ref = None

    @pl.when(pl.program_id(2) == 0)
    def _():
        acc_ref[...] = jnp.zeros_like(acc_ref)

    acc_ref[...] += jnp.dot(
        x_ref[...].astype(jnp.bfloat16), w_ref[...].astype(jnp.bfloat16),
        preferred_element_type=jnp.float32)

    @pl.when(pl.program_id(2) == pl.num_programs(2) - 1)
    def _():
        r = acc_ref[...]
        if has_bias:
            r = r + b_ref[...].astype(jnp.float32)
        if act == "gelu":
            r = _gelu(r)
        o_ref[...] = r.astype(o_ref.dtype)


def _ln_matmul_kernel(*refs, act, has_bias):
    """Fused LayerNorm (full feature dim) + matmul + bias (+ GELU).
    LN computed once per row-tile (j == 0) and cached in a bf16 VMEM scratch
    that is reused for every N tile."""
    if has_bias:
        x_ref, g_ref, bln_ref, w_ref, b_ref, o_ref, y_ref = refs
    else:
        x_ref, g_ref, bln_ref, w_ref, o_ref, y_ref = refs
        b_ref = None

    @pl.when(pl.program_id(1) == 0)
    def _():
        x = x_ref[...].astype(jnp.float32)
        mu = jnp.mean(x, axis=-1, keepdims=True)
        xc = x - mu
        var = jnp.mean(xc * xc, axis=-1, keepdims=True)
        y = xc * jax.lax.rsqrt(var + 1e-5)
        y = y * g_ref[...] + bln_ref[...]
        y_ref[...] = y.astype(y_ref.dtype)

    r = jnp.dot(y_ref[...], w_ref[...].astype(jnp.bfloat16),
                preferred_element_type=jnp.float32)
    if has_bias:
        r = r + b_ref[...].astype(jnp.float32)
    if act == "gelu":
        r = _gelu(r)
    o_ref[...] = r.astype(o_ref.dtype)


def _layernorm_kernel(x_ref, g_ref, b_ref, o_ref):
    x = x_ref[...].astype(jnp.float32)
    mu = jnp.mean(x, axis=-1, keepdims=True)
    xc = x - mu
    var = jnp.mean(xc * xc, axis=-1, keepdims=True)
    y = xc * jax.lax.rsqrt(var + 1e-5)
    o_ref[...] = (y * g_ref[...] + b_ref[...]).astype(o_ref.dtype)


def _mha_kernel(*refs, scale, has_mask):
    """Fused multi-head self-attention core + output projection.
    grid = (B, H): per-head Q/K/V blocks come straight from BlockSpecs, the
    out-projection is accumulated per head into an f32 VMEM scratch (no head
    concat), softmax in f32 with an EUP reciprocal, MXU runs in bf16."""
    if has_mask:
        q_ref, k_ref, v_ref, wo_ref, bo_ref, m_ref, o_ref, acc_ref = refs
    else:
        q_ref, k_ref, v_ref, wo_ref, bo_ref, o_ref, acc_ref = refs
        m_ref = None

    h = pl.program_id(1)

    @pl.when(h == 0)
    def _():
        acc_ref[...] = jnp.zeros_like(acc_ref)

    q = q_ref[0, 0].astype(jnp.bfloat16)          # (L, Dh)
    k = k_ref[0, 0].astype(jnp.bfloat16)          # (L, Dh)
    v = v_ref[0, 0].astype(jnp.bfloat16)          # (L, Dh)

    s = jax.lax.dot_general(q, k, (((1,), (1,)), ((), ())),
                            preferred_element_type=jnp.float32) * scale
    if has_mask:
        s = s + m_ref[...].astype(jnp.float32)
    s = s - jnp.max(s, axis=-1, keepdims=True)
    p = jnp.exp(s)
    p = p * pl.reciprocal(jnp.sum(p, axis=-1, keepdims=True), approx=True)

    ctx = jnp.dot(p.astype(jnp.bfloat16), v,
                  preferred_element_type=jnp.float32)           # (L, Dh)
    acc_ref[...] += jnp.dot(ctx.astype(jnp.bfloat16), wo_ref[0],
                            preferred_element_type=jnp.float32)  # (L, E)

    @pl.when(h == pl.num_programs(1) - 1)
    def _():
        out = acc_ref[...] + bo_ref[...].astype(jnp.float32)
        o_ref[...] = out[None].astype(o_ref.dtype)


def _l2norm_kernel(x_ref, o_ref):
    x = x_ref[...].astype(jnp.float32)
    ss = jnp.sum(x * x, axis=-1, keepdims=True)
    o_ref[...] = (x * jax.lax.rsqrt(jnp.maximum(ss, 1e-24))).astype(o_ref.dtype)


# ----------------------------------------------------------------------------
# Pallas-backed ops
# ----------------------------------------------------------------------------
def linear(x, w, b=None, act=None, out_dtype=jnp.bfloat16):
    """x:(...,K) @ w:(K,N) + b, optional fused GELU.  grid=(Mt,Nt,Kt)."""
    lead, K = x.shape[:-1], x.shape[-1]
    N = w.shape[-1]
    x2 = x.reshape(-1, K)
    M = x2.shape[0]
    Mp, tm = _choose_tile(M, 16, _TM)
    Np, tn = _choose_tile(N, 128, _TN)
    Kp, tk = _choose_tile(K, 128, _TK)
    xp = _pad2(x2, Mp, Kp)
    wp = _pad2(w, Kp, Np)
    has_bias = b is not None

    in_specs = [
        pl.BlockSpec((tm, tk), lambda i, j, k: (i, k)),
        pl.BlockSpec((tk, tn), lambda i, j, k: (k, j)),
    ]
    args = [xp, wp]
    if has_bias:
        in_specs.append(pl.BlockSpec((1, tn), lambda i, j, k: (0, j)))
        args.append(_pad2(b, 1, Np))

    out = pl.pallas_call(
        partial(_matmul_kernel, act=act, has_bias=has_bias),
        out_shape=jax.ShapeDtypeStruct((Mp, Np), out_dtype),
        grid=(Mp // tm, Np // tn, Kp // tk),
        in_specs=in_specs,
        out_specs=pl.BlockSpec((tm, tn), lambda i, j, k: (i, j)),
        scratch_shapes=[pltpu.VMEM((tm, tn), jnp.float32)],
        compiler_params=pltpu.CompilerParams(
            dimension_semantics=("parallel", "parallel", "arbitrary")),
    )(*args)
    return out[:M, :N].reshape(*lead, N)


def ln_linear(x, g, bln, w, b=None, act=None, out_dtype=jnp.bfloat16):
    """Fused LayerNorm(x) @ w + b (+ GELU).  K kept whole (LN needs full row).
    LN result cached in VMEM scratch across the N tiles."""
    lead, K = x.shape[:-1], x.shape[-1]
    N = w.shape[-1]
    x2 = x.reshape(-1, K)
    M = x2.shape[0]
    Mp, tm = _choose_tile(M, 16, _TM)
    Np, tn = _choose_tile(N, 128, _TN)
    xp = _pad2(x2, Mp, K)
    wp = _pad2(w, K, Np)
    has_bias = b is not None

    in_specs = [
        pl.BlockSpec((tm, K), lambda i, j: (i, 0)),
        pl.BlockSpec((1, K), lambda i, j: (0, 0)),
        pl.BlockSpec((1, K), lambda i, j: (0, 0)),
        pl.BlockSpec((K, tn), lambda i, j: (0, j)),
    ]
    args = [xp, g, bln, wp]
    if has_bias:
        in_specs.append(pl.BlockSpec((1, tn), lambda i, j: (0, j)))
        args.append(_pad2(b, 1, Np))

    out = pl.pallas_call(
        partial(_ln_matmul_kernel, act=act, has_bias=has_bias),
        out_shape=jax.ShapeDtypeStruct((Mp, Np), out_dtype),
        grid=(Mp // tm, Np // tn),
        in_specs=in_specs,
        out_specs=pl.BlockSpec((tm, tn), lambda i, j: (i, j)),
        scratch_shapes=[pltpu.VMEM((tm, K), jnp.bfloat16)],
        compiler_params=pltpu.CompilerParams(
            dimension_semantics=("parallel", "arbitrary")),
    )(*args)
    return out[:M, :N].reshape(*lead, N)


def layernorm(x, g, b):
    """Standalone LN (ln_pre); output kept f32 — it seeds the residual stream."""
    lead, D = x.shape[:-1], x.shape[-1]
    x2 = x.reshape(-1, D)
    M = x2.shape[0]
    Mp, tm = _choose_tile(M, 16, 1024)
    xp = _pad2(x2, Mp, D)
    out = pl.pallas_call(
        _layernorm_kernel,
        out_shape=jax.ShapeDtypeStruct((Mp, D), jnp.float32),
        grid=(Mp // tm,),
        in_specs=[
            pl.BlockSpec((tm, D), lambda i: (i, 0)),
            pl.BlockSpec((1, D), lambda i: (0, 0)),
            pl.BlockSpec((1, D), lambda i: (0, 0)),
        ],
        out_specs=pl.BlockSpec((tm, D), lambda i: (i, 0)),
        compiler_params=pltpu.CompilerParams(dimension_semantics=("parallel",)),
    )(xp, g, b)
    return out[:M].reshape(*lead, D)


def l2_normalize(x):
    # tiny (B, embed_dim) tensor; single-block kernel, f32 output for accuracy.
    return pl.pallas_call(
        _l2norm_kernel,
        out_shape=jax.ShapeDtypeStruct(x.shape, jnp.float32),
        grid=(1,),
        in_specs=[pl.BlockSpec(x.shape, lambda i: (0, 0))],
        out_specs=pl.BlockSpec(x.shape, lambda i: (0, 0)),
    )(x)


def mha_fused(qkv, w_out, b_out, mask, num_heads):
    """qkv: (B, L, 3E) packed (bf16).  Fused attention core + out-proj,
    grid=(B, H) with per-head accumulation of the output projection."""
    B, L, E3 = qkv.shape
    E = E3 // 3
    H = num_heads
    Dh = E // H
    assert E % H == 0

    # Head-major packed view (B, 3H, L, Dh) so per-head blocks are full in the
    # last two dims (legal at any L / Dh).
    # TODO(synk): fold this relayout (and ultimately the whole QKV projection)
    # into the attention kernel's in/out specs so the (B, L, 3E) intermediate
    # never round-trips HBM in token-major order.
    qkv_h = qkv.reshape(B, L, 3 * H, Dh).transpose(0, 2, 1, 3)
    wo_h = w_out.reshape(H, Dh, E)          # free reshape (row-major identical)

    has_mask = mask is not None
    in_specs = [
        pl.BlockSpec((1, 1, L, Dh), lambda b, h: (b, h, 0, 0)),           # Q
        pl.BlockSpec((1, 1, L, Dh), lambda b, h: (b, H + h, 0, 0)),       # K
        pl.BlockSpec((1, 1, L, Dh), lambda b, h: (b, 2 * H + h, 0, 0)),   # V
        pl.BlockSpec((1, Dh, E), lambda b, h: (h, 0, 0)),                 # Wo_h
        pl.BlockSpec((1, E), lambda b, h: (0, 0)),                        # bo
    ]
    args = [qkv_h, qkv_h, qkv_h, wo_h, b_out]
    if has_mask:
        in_specs.append(pl.BlockSpec((L, L), lambda b, h: (0, 0)))
        args.append(mask)

    kernel = partial(_mha_kernel, scale=1.0 / math.sqrt(Dh), has_mask=has_mask)
    return pl.pallas_call(
        kernel,
        out_shape=jax.ShapeDtypeStruct((B, L, E), jnp.bfloat16),
        grid=(B, H),
        in_specs=in_specs,
        out_specs=pl.BlockSpec((1, L, E), lambda b, h: (b, 0, 0)),
        scratch_shapes=[pltpu.VMEM((L, E), jnp.float32)],
        compiler_params=pltpu.CompilerParams(
            dimension_semantics=("parallel", "arbitrary")),
    )(*args)


# ----------------------------------------------------------------------------
# Module forwards (mirroring the PyTorch classes)
# ----------------------------------------------------------------------------
def multihead_attention(x, p, num_heads, mask=None):
    qkv = linear(x, p["in"]["w"], p["in"]["b"])
    return mha_fused(qkv, p["out"]["w"], p["out"]["b"], mask, num_heads)


def ln_multihead_attention(x, ln, p, num_heads, mask=None):
    # fused LN1 + QKV projection
    qkv = ln_linear(x, ln["g"], ln["b"], p["in"]["w"], p["in"]["b"])
    return mha_fused(qkv, p["out"]["w"], p["out"]["b"], mask, num_heads)


def bishare_adapter_fwd(x, p, heads):
    xinit = x
    x = linear(x, p["l1"]["w"], p["l1"]["b"])
    x2 = x
    attn_output = multihead_attention(x, p["mha"], heads)
    # NOTE: reference computes x = F.gelu(x) here and immediately overwrites x,
    # so the gelu has no effect on the output and is elided.
    alpha = jax.nn.sigmoid(p["gate1"])
    attn = alpha * attn_output + (1.0 - alpha) * x2
    x = linear(attn, p["l2"]["w"], p["l2"]["b"])     # zero-initialized
    return x + xinit


def mmadapter_fwd(x, p, heads, share_p=None, share_heads=None):
    x_init = x                                        # main residual stream (f32)
    x = linear(x, p["down"]["w"], p["down"]["b"], act="gelu")   # fused proj_down + GELU
    xmid = x
    x = multihead_attention(x, p["mha"], heads)
    if share_p is not None:
        x = bishare_adapter_fwd(x, share_p, share_heads)
    x = multihead_attention(x, p["mha"], heads)       # second pass, same weights (matches torch)
    alpha = jax.nn.sigmoid(p["gate1"])
    x = alpha * xmid + (1.0 - alpha) * x
    x = linear(x, p["up"]["w"], p["up"]["b"])         # zero-initialized
    return x_init + x                                 # residual add in f32


def resblock_fwd(x, p, heads, mask, adapter_p, adapter_heads,
                 share_p=None, share_heads=None):
    # fused (LN1 + QKV) -> fused (attention core + out-proj); residual add f32
    x = x + ln_multihead_attention(x, p["ln1"], p["attn"], heads, mask)
    # fused (LN2 + FC + GELU) -> tiled proj matmul; residual add f32
    h = ln_linear(x, p["ln2"]["g"], p["ln2"]["b"], p["fc"]["w"], p["fc"]["b"], act="gelu")
    x = x + linear(h, p["proj"]["w"], p["proj"]["b"])
    # TODO(synk): exact MMadapter insertion point inside the modified
    # ResidualAttentionBlock is not given in the reference; applied post-block.
    x = mmadapter_fwd(x, adapter_p, adapter_heads, share_p, share_heads)
    return x


def vision_forward(image, p, cfg):
    B, C, H, W = image.shape  # NCHW
    P = cfg["patch"]
    gh, gw = H // P, W // P
    # TODO(synk): patchify done via JAX reshape/transpose glue; could be folded
    # into the conv matmul's index_map with a strided DMA to avoid this pass.
    patches = image.reshape(B, C, gh, P, gw, P).transpose(0, 2, 4, 1, 3, 5)
    patches = patches.reshape(B, gh * gw, C * P * P)
    x = linear(patches, p["conv_w"])                               # (B, N, width), no bias
    cls = jnp.broadcast_to(p["class_emb"].reshape(1, 1, -1), (B, 1, x.shape[-1]))
    x = jnp.concatenate([cls.astype(jnp.float32), x.astype(jnp.float32)], axis=1)
    x = x + p["pos_emb"][None]
    x = layernorm(x, p["ln_pre"]["g"], p["ln_pre"]["b"])           # f32 residual stream
    for i in range(cfg["layers"]):
        x = resblock_fwd(x, p["blocks"][i], cfg["heads"], None,
                         p["adapters"][i], cfg["adapter_heads"])
    pooled = x[:, 0]                                               # class token
    # LN is per-token: pool first, then fused (ln_post + output proj, no bias).
    return ln_linear(pooled, p["ln_post"]["g"], p["ln_post"]["b"], p["proj"])


def text_forward(text, p, cfg):
    B, L = text.shape
    x = p["token_emb"][text] + p["pos_emb"][:L][None]              # embedding gather (glue)
    mask = jnp.triu(jnp.full((L, L), -1e9, jnp.float32), k=1)      # causal mask (f32)
    for i in range(cfg["layers"]):
        x = resblock_fwd(x, p["blocks"][i], cfg["heads"], mask,
                         p["adapters"][i], cfg["adapter_heads"],
                         p["share_adapters"][i], cfg["share_heads"])
    eot = jnp.argmax(text, axis=-1)                                # EOT = highest token id
    pooled = x[jnp.arange(B), eot]
    # fused (ln_final + text projection, no bias) on the pooled tokens.
    return ln_linear(pooled, p["ln_final"]["g"], p["ln_final"]["b"], p["text_proj"])


def custom_text_clip_forward(params, image, text, vcfg, tcfg):
    img_feat = l2_normalize(vision_forward(image, params["visual"], vcfg))
    txt_feat = l2_normalize(text_forward(text, params["text"], tcfg))
    return img_feat, txt_feat, jnp.exp(params["logit_scale"])


# ----------------------------------------------------------------------------
# Deterministic parameter initialization (synthetic; shapes follow __init__)
# Matmul weights stored bf16; biases stored (1, N) f32; LN params (1, D) f32 —
# pre-shaped / pre-cast so no per-forward pad/cast glue at aligned dims.
# ----------------------------------------------------------------------------
def _nrm(key, shape, scale=0.02):
    return jax.random.normal(key, shape, jnp.float32) * scale


def init_linear(key, din, dout, zero=False):
    if zero:
        return {"w": jnp.zeros((din, dout), jnp.bfloat16),
                "b": jnp.zeros((1, dout), jnp.float32)}
    k1, k2 = jax.random.split(key)
    return {"w": _nrm(k1, (din, dout)).astype(jnp.bfloat16),
            "b": _nrm(k2, (1, dout))}


def init_mha(key, e):
    k1, k2 = jax.random.split(key)
    return {"in": init_linear(k1, e, 3 * e), "out": init_linear(k2, e, e)}


def init_ln(d):
    return {"g": jnp.ones((1, d), jnp.float32), "b": jnp.zeros((1, d), jnp.float32)}


def init_mmadapter(key, hidden, d_adapter):
    ks = jax.random.split(key, 3)
    return {
        "down": init_linear(ks[0], hidden, d_adapter),
        "up": init_linear(ks[1], d_adapter, hidden, zero=True),   # init_weights(): zeros
        "mha": init_mha(ks[2], d_adapter),
        "gate1": jnp.asarray(0.6, jnp.float32),
    }


def init_bishare(key, hidden):
    ks = jax.random.split(key, 3)
    return {
        "l1": init_linear(ks[0], hidden, hidden // 2),
        "l2": init_linear(ks[1], hidden // 2, hidden, zero=True),  # init_weights(): zeros
        "mha": init_mha(ks[2], hidden // 2),
        "gate1": jnp.asarray(0.6, jnp.float32),
    }


def init_block(key, width, mlp_hidden):
    ks = jax.random.split(key, 3)
    return {
        "ln1": init_ln(width),
        "ln2": init_ln(width),
        "attn": init_mha(ks[0], width),
        "fc": init_linear(ks[1], width, mlp_hidden),
        "proj": init_linear(ks[2], mlp_hidden, width),
    }


def build_params(key, *, embed_dim, vcfg, tcfg):
    kv, kt, _ = jax.random.split(key, 3)

    # ---- vision tower ----
    ks = jax.random.split(kv, 6 + 2 * vcfg["layers"])
    n_patch = (vcfg["image"] // vcfg["patch"]) ** 2
    visual = {
        "conv_w": _nrm(ks[0], (3 * vcfg["patch"] * vcfg["patch"], vcfg["width"])).astype(jnp.bfloat16),
        "class_emb": _nrm(ks[1], (vcfg["width"],), vcfg["width"] ** -0.5),
        "pos_emb": _nrm(ks[2], (n_patch + 1, vcfg["width"]), vcfg["width"] ** -0.5),
        "ln_pre": init_ln(vcfg["width"]),
        "ln_post": init_ln(vcfg["width"]),
        "proj": _nrm(ks[3], (vcfg["width"], embed_dim), vcfg["width"] ** -0.5).astype(jnp.bfloat16),
        "blocks": [init_block(ks[4 + i], vcfg["width"], vcfg["mlp"]) for i in range(vcfg["layers"])],
        "adapters": [init_mmadapter(ks[4 + vcfg["layers"] + i], vcfg["width"], vcfg["adapter_dim"])
                     for i in range(vcfg["layers"])],
    }

    # ---- text tower ----
    ks = jax.random.split(kt, 6 + 3 * tcfg["layers"])
    text = {
        "token_emb": _nrm(ks[0], (tcfg["vocab"], tcfg["width"])),
        "pos_emb": _nrm(ks[1], (tcfg["ctx"], tcfg["width"]), 0.01),
        "ln_final": init_ln(tcfg["width"]),
        "text_proj": _nrm(ks[2], (tcfg["width"], embed_dim), tcfg["width"] ** -0.5).astype(jnp.bfloat16),
        "blocks": [init_block(ks[3 + i], tcfg["width"], tcfg["mlp"]) for i in range(tcfg["layers"])],
        "adapters": [init_mmadapter(ks[3 + tcfg["layers"] + i], tcfg["width"], tcfg["adapter_dim"])
                     for i in range(tcfg["layers"])],
        "share_adapters": [init_bishare(ks[3 + 2 * tcfg["layers"] + i], tcfg["adapter_dim"])
                           for i in range(tcfg["layers"])],
    }

    return {
        "visual": visual,
        "text": text,
        "logit_scale": jnp.asarray(math.log(1.0 / 0.07), jnp.float32),
    }


# ----------------------------------------------------------------------------
# Main
# ----------------------------------------------------------------------------
if __name__ == "__main__":
    EMBED_DIM = 32
    vcfg = dict(image=16, patch=8, width=64, heads=4, layers=2, mlp=256,
                adapter_dim=32, adapter_heads=4)
    tcfg = dict(ctx=8, vocab=64, width=64, heads=4, layers=2, mlp=256,
                adapter_dim=32, adapter_heads=4, share_heads=2)

    root = jax.random.PRNGKey(0)
    kp, ki, kt = jax.random.split(root, 3)
    params = build_params(kp, embed_dim=EMBED_DIM, vcfg=vcfg, tcfg=tcfg)

    image = jax.random.normal(ki, (2, 3, 16, 16), jnp.float32)          # NCHW
    text = jax.random.randint(kt, (2, 8), 0, tcfg["vocab"], jnp.int32)  # token ids

    fwd = jax.jit(lambda p, im, tx: custom_text_clip_forward(p, im, tx, vcfg, tcfg))
    img_f, txt_f, scale = fwd(params, image, text)
    jax.block_until_ready((img_f, txt_f, scale))

    assert img_f.shape == (2, EMBED_DIM) and txt_f.shape == (2, EMBED_DIM)
    assert jnp.all(jnp.isfinite(img_f)) and jnp.all(jnp.isfinite(txt_f))
    # features are L2-normalized
    assert jnp.allclose(jnp.linalg.norm(img_f, axis=-1), 1.0, atol=1e-3)
    assert jnp.allclose(jnp.linalg.norm(txt_f, axis=-1), 1.0, atol=1e-3)
    print("KERNEL_OK")
</pallas_src>

<mosaic_0001>
module attributes {stable_mosaic.version = 11 : i64} {
  func.func @_matmul_kernel(%arg0: i32, %arg1: i32, %arg2: i32, %arg3: memref<16x256xf32, #tpu.memory_space<vmem>>, %arg4: memref<256x128xbf16, #tpu.memory_space<vmem>>, %arg5: memref<16x128xbf16, #tpu.memory_space<vmem>>, %arg6: memref<16x128xf32, #tpu.memory_space<vmem>>) attributes {dimension_semantics = [#tpu.dimension_semantics<parallel>, #tpu.dimension_semantics<parallel>, #tpu.dimension_semantics<arbitrary>], iteration_bounds = array<i64: 1, 1, 1>, scalar_prefetch = 0 : i64, scratch_operands = 1 : i64, tpu.core_type = #tpu.core_type<tc>, window_params = [{transform_indices = @transform_0, window_bounds = array<i64: 16, 256>}, {transform_indices = @transform_1, window_bounds = array<i64: 256, 128>}, {transform_indices = @transform_2, window_bounds = array<i64: 16, 128>}]} {
    %c0_i32 = arith.constant 0 : i32
    %0 = arith.cmpi eq, %arg2, %c0_i32 : i32
    %1 = arith.extui %0 : i1 to i32
    %c0_i32_0 = arith.constant 0 : i32
    %2 = arith.cmpi ne, %1, %c0_i32_0 : i32
    scf.if %2 {
      %cst_10 = arith.constant 0.000000e+00 : f32
      %13 = vector.broadcast %cst_10 : f32 to vector<16x128xf32>
      %c0_11 = arith.constant 0 : index
      %c0_12 = arith.constant 0 : index
      %14 = vector.load %arg6[%c0_11, %c0_12] : memref<16x128xf32, #tpu.memory_space<vmem>>, vector<16x128xf32>
      tpu.vector_store %arg6[%c0_11, %c0_12], %13 {strides = array<i32>} : memref<16x128xf32, #tpu.memory_space<vmem>>, vector<16x128xf32>,
    } else {
    }
    %c0 = arith.constant 0 : index
    %c0_1 = arith.constant 0 : index
    %3 = vector.load %arg6[%c0, %c0_1] : memref<16x128xf32, #tpu.memory_space<vmem>>, vector<16x128xf32>
    %c0_2 = arith.constant 0 : index
    %c0_3 = arith.constant 0 : index
    %4 = vector.load %arg3[%c0_2, %c0_3] : memref<16x256xf32, #tpu.memory_space<vmem>>, vector<16x256xf32>
    %5 = arith.truncf %4 : vector<16x256xf32> to vector<16x256xbf16>
    %c0_4 = arith.constant 0 : index
    %c0_5 = arith.constant 0 : index
    %6 = vector.load %arg4[%c0_4, %c0_5] : memref<256x128xbf16, #tpu.memory_space<vmem>>, vector<256x128xbf16>
    %cst = arith.constant dense<0.000000e+00> : vector<16x128xf32>
    %7 = tpu.matmul %5, %6, %cst {dimension_numbers = #tpu.dot_dimension_numbers<[1], [0], [0], [1], [0, 0, 1, 1], [], []>} : vector<16x256xbf16>, vector<256x128xbf16>, vector<16x128xf32> -> vector<16x128xf32>
    %8 = arith.addf %3, %7 : vector<16x128xf32>
    %c0_6 = arith.constant 0 : index
    %c0_7 = arith.constant 0 : index
    %9 = vector.load %arg6[%c0_6, %c0_7] : memref<16x128xf32, #tpu.memory_space<vmem>>, vector<16x128xf32>
    tpu.vector_store %arg6[%c0_6, %c0_7], %8 {strides = array<i32>} : memref<16x128xf32, #tpu.memory_space<vmem>>, vector<16x128xf32>,
    %c0_i32_8 = arith.constant 0 : i32
    %10 = arith.cmpi eq, %arg2, %c0_i32_8 : i32
    %11 = arith.extui %10 : i1 to i32
    %c0_i32_9 = arith.constant 0 : i32
    %12 = arith.cmpi ne, %11, %c0_i32_9 : i32
    scf.if %12 {
      %c0_10 = arith.constant 0 : index
      %c0_11 = arith.constant 0 : index
      %13 = vector.load %arg6[%c0_10, %c0_11] : memref<16x128xf32, #tpu.memory_space<vmem>>, vector<16x128xf32>
      %14 = arith.truncf %13 : vector<16x128xf32> to vector<16x128xbf16>
      %c0_12 = arith.constant 0 : index
      %c0_13 = arith.constant 0 : index
      %15 = vector.load %arg5[%c0_12, %c0_13] : memref<16x128xbf16, #tpu.memory_space<vmem>>, vector<16x128xbf16>
      tpu.vector_store %arg5[%c0_12, %c0_13], %14 {strides = array<i32>} : memref<16x128xbf16, #tpu.memory_space<vmem>>, vector<16x128xbf16>,
    } else {
    }
    return
  }
  func.func @transform_0(%arg0: i32, %arg1: i32, %arg2: i32) -> (i32, i32) {
    %c0_i32 = arith.constant 0 : i32
    return %arg0, %arg2 : i32, i32
  }
  func.func @transform_1(%arg0: i32, %arg1: i32, %arg2: i32) -> (i32, i32) {
    %c0_i32 = arith.constant 0 : i32
    return %arg2, %arg1 : i32, i32
  }
  func.func @transform_2(%arg0: i32, %arg1: i32, %arg2: i32) -> (i32, i32) {
    %c0_i32 = arith.constant 0 : i32
    return %arg0, %arg1 : i32, i32
  }
}

module attributes {stable_mosaic.version = 11 : i64} {
  func.func @_layernorm_kernel(%arg0: i32, %arg1: memref<16x64xf32, #tpu.memory_space<vmem>>, %arg2: memref<1x64xf32, #tpu.memory_space<vmem>>, %arg3: memref<1x64xf32, #tpu.memory_space<vmem>>, %arg4: memref<16x64xf32, #tpu.memory_space<vmem>>) attributes {dimension_semantics = [#tpu.dimension_semantics<parallel>], iteration_bounds = array<i64: 1>, scalar_prefetch = 0 : i64, scratch_operands = 0 : i64, tpu.core_type = #tpu.core_type<tc>, window_params = [{transform_indices = @transform_0, window_bounds = array<i64: 16, 64>}, {pipeline_mode = #tpu.pipeline_mode<synchronous>, transform_indices = @transform_1, window_bounds = array<i64: 1, 64>}, {pipeline_mode = #tpu.pipeline_mode<synchronous>, transform_indices = @transform_2, window_bounds = array<i64: 1, 64>}, {transform_indices = @transform_3, window_bounds = array<i64: 16, 64>}]} {
    %c0 = arith.constant 0 : index
    %c0_0 = arith.constant 0 : index
    %0 = vector.load %arg1[%c0, %c0_0] : memref<16x64xf32, #tpu.memory_space<vmem>>, vector<16x64xf32>
    %cst = arith.constant dense<0.000000e+00> : vector<16xf32>
    %1 = vector.multi_reduction <add>, %0, %cst [1] : vector<16x64xf32> to vector<16xf32>
    %2 = vector.shape_cast %1 : vector<16xf32> to vector<16x1xf32>
    %cst_1 = arith.constant 6.400000e+01 : f32
    %3 = vector.broadcast %cst_1 : f32 to vector<16x1xf32>
    %4 = arith.divf %2, %3 : vector<16x1xf32>
    %5 = vector.broadcast %4 : vector<16x1xf32> to vector<16x64xf32>
    %6 = arith.subf %0, %5 : vector<16x64xf32>
    %7 = arith.mulf %6, %6 : vector<16x64xf32>
    %cst_2 = arith.constant dense<0.000000e+00> : vector<16xf32>
    %8 = vector.multi_reduction <add>, %7, %cst_2 [1] : vector<16x64xf32> to vector<16xf32>
    %9 = vector.shape_cast %8 : vector<16xf32> to vector<16x1xf32>
    %cst_3 = arith.constant 6.400000e+01 : f32
    %10 = vector.broadcast %cst_3 : f32 to vector<16x1xf32>
    %11 = arith.divf %9, %10 : vector<16x1xf32>
    %cst_4 = arith.constant 9.99999974E-6 : f32
    %12 = vector.broadcast %cst_4 : f32 to vector<16x1xf32>
    %13 = arith.addf %11, %12 : vector<16x1xf32>
    %14 = math.rsqrt %13 : vector<16x1xf32>
    %15 = vector.broadcast %14 : vector<16x1xf32> to vector<16x64xf32>
    %16 = arith.mulf %6, %15 : vector<16x64xf32>
    %c0_5 = arith.constant 0 : index
    %c0_6 = arith.constant 0 : index
    %17 = vector.load %arg2[%c0_5, %c0_6] : memref<1x64xf32, #tpu.memory_space<vmem>>, vector<1x64xf32>
    %18 = vector.broadcast %17 : vector<1x64xf32> to vector<16x64xf32>
    %19 = arith.mulf %16, %18 : vector<16x64xf32>
    %c0_7 = arith.constant 0 : index
    %c0_8 = arith.constant 0 : index
    %20 = vector.load %arg3[%c0_7, %c0_8] : memref<1x64xf32, #tpu.memory_space<vmem>>, vector<1x64xf32>
    %21 = vector.broadcast %20 : vector<1x64xf32> to vector<16x64xf32>
    %22 = arith.addf %19, %21 : vector<16x64xf32>
    %c0_9 = arith.constant 0 : index
    %c0_10 = arith.constant 0 : index
    %23 = vector.load %arg4[%c0_9, %c0_10] : memref<16x64xf32, #tpu.memory_space<vmem>>, vector<16x64xf32>
    tpu.vector_store %arg4[%c0_9, %c0_10], %22 {strides = array<i32>} : memref<16x64xf32, #tpu.memory_space<vmem>>, vector<16x64xf32>,
    return
  }
  func.func @transform_0(%arg0: i32) -> (i32, i32) {
    %c0_i32 = arith.constant 0 : i32
    %c0_i32_0 = arith.constant 0 : i32
    return %arg0, %c0_i32 : i32, i32
  }
  func.func @transform_1(%arg0: i32) -> (i32, i32) {
    %c0_i32 = arith.constant 0 : i32
    %c0_i32_0 = arith.constant 0 : i32
    %c0_i32_1 = arith.constant 0 : i32
    return %c0_i32, %c0_i32_0 : i32, i32
  }
  func.func @transform_2(%arg0: i32) -> (i32, i32) {
    %c0_i32 = arith.constant 0 : i32
    %c0_i32_0 = arith.constant 0 : i32
    %c0_i32_1 = arith.constant 0 : i32
    return %c0_i32, %c0_i32_0 : i32, i32
  }
  func.func @transform_3(%arg0: i32) -> (i32, i32) {
    %c0_i32 = arith.constant 0 : i32
    %c0_i32_0 = arith.constant 0 : i32
    return %arg0, %c0_i32 : i32, i32
  }
}

module attributes {stable_mosaic.version = 11 : i64} {
  func.func @_ln_matmul_kernel(%arg0: i32, %arg1: i32, %arg2: memref<16x64xf32, #tpu.memory_space<vmem>>, %arg3: memref<1x64xf32, #tpu.memory_space<vmem>>, %arg4: memref<1x64xf32, #tpu.memory_space<vmem>>, %arg5: memref<64x256xbf16, #tpu.memory_space<vmem>>, %arg6: memref<1x256xf32, #tpu.memory_space<vmem>>, %arg7: memref<16x256xbf16, #tpu.memory_space<vmem>>, %arg8: memref<16x64xbf16, #tpu.memory_space<vmem>>) attributes {dimension_semantics = [#tpu.dimension_semantics<parallel>, #tpu.dimension_semantics<arbitrary>], iteration_bounds = array<i64: 1, 1>, scalar_prefetch = 0 : i64, scratch_operands = 1 : i64, tpu.core_type = #tpu.core_type<tc>, window_params = [{transform_indices = @transform_0, window_bounds = array<i64: 16, 64>}, {pipeline_mode = #tpu.pipeline_mode<synchronous>, transform_indices = @transform_1, window_bounds = array<i64: 1, 64>}, {pipeline_mode = #tpu.pipeline_mode<synchronous>, transform_indices = @transform_2, window_bounds = array<i64: 1, 64>}, {transform_indices = @transform_3, window_bounds = array<i64: 64, 256>}, {transform_indices = @transform_4, window_bounds = array<i64: 1, 256>}, {transform_indices = @transform_5, window_bounds = array<i64: 16, 256>}]} {
    %c0_i32 = arith.constant 0 : i32
    %0 = arith.cmpi eq, %arg1, %c0_i32 : i32
    %1 = arith.extui %0 : i1 to i32
    %c0_i32_0 = arith.constant 0 : i32
    %2 = arith.cmpi ne, %1, %c0_i32_0 : i32
    scf.if %2 {
      %c0_8 = arith.constant 0 : index
      %c0_9 = arith.constant 0 : index
      %11 = vector.load %arg2[%c0_8, %c0_9] : memref<16x64xf32, #tpu.memory_space<vmem>>, vector<16x64xf32>
      %cst_10 = arith.constant dense<0.000000e+00> : vector<16xf32>
      %12 = vector.multi_reduction <add>, %11, %cst_10 [1] : vector<16x64xf32> to vector<16xf32>
      %13 = vector.shape_cast %12 : vector<16xf32> to vector<16x1xf32>
      %cst_11 = arith.constant 6.400000e+01 : f32
      %14 = vector.broadcast %cst_11 : f32 to vector<16x1xf32>
      %15 = arith.divf %13, %14 : vector<16x1xf32>
      %16 = vector.broadcast %15 : vector<16x1xf32> to vector<16x64xf32>
      %17 = arith.subf %11, %16 : vector<16x64xf32>
      %18 = arith.mulf %17, %17 : vector<16x64xf32>
      %cst_12 = arith.constant dense<0.000000e+00> : vector<16xf32>
      %19 = vector.multi_reduction <add>, %18, %cst_12 [1] : vector<16x64xf32> to vector<16xf32>
      %20 = vector.shape_cast %19 : vector<16xf32> to vector<16x1xf32>
      %cst_13 = arith.constant 6.400000e+01 : f32
      %21 = vector.broadcast %cst_13 : f32 to vector<16x1xf32>
      %22 = arith.divf %20, %21 : vector<16x1xf32>
      %cst_14 = arith.constant 9.99999974E-6 : f32
      %23 = vector.broadcast %cst_14 : f32 to vector<16x1xf32>
      %24 = arith.addf %22, %23 : vector<16x1xf32>
      %25 = math.rsqrt %24 : vector<16x1xf32>
      %26 = vector.broadcast %25 : vector<16x1xf32> to vector<16x64xf32>
      %27 = arith.mulf %17, %26 : vector<16x64xf32>
      %c0_15 = arith.constant 0 : index
      %c0_16 = arith.constant 0 : index
      %28 = vector.load %arg3[%c0_15, %c0_16] : memref<1x64xf32, #tpu.memory_space<vmem>>, vector<1x64xf32>
      %29 = vector.broadcast %28 : vector<1x64xf32> to vector<16x64xf32>
      %30 = arith.mulf %27, %29 : vector<16x64xf32>
      %c0_17 = arith.constant 0 : index
      %c0_18 = arith.constant 0 : index
      %31 = vector.load %arg4[%c0_17, %c0_18] : memref<1x64xf32, #tpu.memory_space<vmem>>, vector<1x64xf32>
      %32 = vector.broadcast %31 : vector<1x64xf32> to vector<16x64xf32>
      %33 = arith.addf %30, %32 : vector<16x64xf32>
      %34 = arith.truncf %33 : vector<16x64xf32> to vector<16x64xbf16>
      %c0_19 = arith.constant 0 : index
      %c0_20 = arith.constant 0 : index
      %35 = vector.load %arg8[%c0_19, %c0_20] : memref<16x64xbf16, #tpu.memory_space<vmem>>, vector<16x64xbf16>
      tpu.vector_store %arg8[%c0_19, %c0_20], %34 {strides = array<i32>} : memref<16x64xbf16, #tpu.memory_space<vmem>>, vector<16x64xbf16>,
    } else {
    }
    %c0 = arith.constant 0 : index
    %c0_1 = arith.constant 0 : index
    %3 = vector.load %arg8[%c0, %c0_1] : memref<16x64xbf16, #tpu.memory_space<vmem>>, vector<16x64xbf16>
    %c0_2 = arith.constant 0 : index
    %c0_3 = arith.constant 0 : index
    %4 = vector.load %arg5[%c0_2, %c0_3] : memref<64x256xbf16, #tpu.memory_space<vmem>>, vector<64x256xbf16>
    %cst = arith.constant dense<0.000000e+00> : vector<16x256xf32>
    %5 = tpu.matmul %3, %4, %cst {dimension_numbers = #tpu.dot_dimension_numbers<[1], [0], [0], [1], [0, 0, 1, 1], [], []>} : vector<16x64xbf16>, vector<64x256xbf16>, vector<16x256xf32> -> vector<16x256xf32>
    %c0_4 = arith.constant 0 : index
    %c0_5 = arith.constant 0 : index
    %6 = vector.load %arg6[%c0_4, %c0_5] : memref<1x256xf32, #tpu.memory_space<vmem>>, vector<1x256xf32>
    %7 = vector.broadcast %6 : vector<1x256xf32> to vector<16x256xf32>
    %8 = arith.addf %5, %7 : vector<16x256xf32>
    %9 = arith.truncf %8 : vector<16x256xf32> to vector<16x256xbf16>
    %c0_6 = arith.constant 0 : index
    %c0_7 = arith.constant 0 : index
    %10 = vector.load %arg7[%c0_6, %c0_7] : memref<16x256xbf16, #tpu.memory_space<vmem>>, vector<16x256xbf16>
    tpu.vector_store %arg7[%c0_6, %c0_7], %9 {strides = array<i32>} : memref<16x256xbf16, #tpu.memory_space<vmem>>, vector<16x256xbf16>,
    return
  }
  func.func @transform_0(%arg0: i32, %arg1: i32) -> (i32, i32) {
    %c0_i32 = arith.constant 0 : i32
    %c0_i32_0 = arith.constant 0 : i32
    return %arg0, %c0_i32 : i32, i32
  }
  func.func @transform_1(%arg0: i32, %arg1: i32) -> (i32, i32) {
    %c0_i32 = arith.constant 0 : i32
    %c0_i32_0 = arith.constant 0 : i32
    %c0_i32_1 = arith.constant 0 : i32
    return %c0_i32, %c0_i32_0 : i32, i32
  }
  func.func @transform_2(%arg0: i32, %arg1: i32) -> (i32, i32) {
    %c0_i32 = arith.constant 0 : i32
    %c0_i32_0 = arith.constant 0 : i32
    %c0_i32_1 = arith.constant 0 : i32
    return %c0_i32, %c0_i32_0 : i32, i32
  }
  func.func @transform_3(%arg0: i32, %arg1: i32) -> (i32, i32) {
    %c0_i32 = arith.constant 0 : i32
    %c0_i32_0 = arith.constant 0 : i32
    return %c0_i32, %arg1 : i32, i32
  }
  func.func @transform_4(%arg0: i32, %arg1: i32) -> (i32, i32) {
    %c0_i32 = arith.constant 0 : i32
    %c0_i32_0 = arith.constant 0 : i32
    return %c0_i32, %arg1 : i32, i32
  }
  func.func @transform_5(%arg0: i32, %arg1: i32) -> (i32, i32) {
    %c0_i32 = arith.constant 0 : i32
    return %arg0, %arg1 : i32, i32
  }
}

module attributes {stable_mosaic.version = 11 : i64} {
  func.func @_mha_kernel(%arg0: i32, %arg1: i32, %arg2: memref<1x1x5x16xbf16, #tpu.memory_space<vmem>>, %arg3: memref<1x1x5x16xbf16, #tpu.memory_space<vmem>>, %arg4: memref<1x1x5x16xbf16, #tpu.memory_space<vmem>>, %arg5: memref<1x16x64xbf16, #tpu.memory_space<vmem>>, %arg6: memref<1x64xf32, #tpu.memory_space<vmem>>, %arg7: memref<1x5x64xbf16, #tpu.memory_space<vmem>>, %arg8: memref<5x64xf32, #tpu.memory_space<vmem>>) attributes {dimension_semantics = [#tpu.dimension_semantics<parallel>, #tpu.dimension_semantics<arbitrary>], iteration_bounds = array<i64: 2, 4>, scalar_prefetch = 0 : i64, scratch_operands = 1 : i64, tpu.core_type = #tpu.core_type<tc>, window_params = [{transform_indices = @transform_0, window_bounds = array<i64: 1, 1, 5, 16>}, {transform_indices = @transform_1, window_bounds = array<i64: 1, 1, 5, 16>}, {transform_indices = @transform_2, window_bounds = array<i64: 1, 1, 5, 16>}, {transform_indices = @transform_3, window_bounds = array<i64: 1, 16, 64>}, {pipeline_mode = #tpu.pipeline_mode<synchronous>, transform_indices = @transform_4, window_bounds = array<i64: 1, 64>}, {transform_indices = @transform_5, window_bounds = array<i64: 1, 5, 64>}]} {
    %c0_i32 = arith.constant 0 : i32
    %0 = arith.cmpi eq, %arg1, %c0_i32 : i32
    %1 = arith.extui %0 : i1 to i32
    %c0_i32_0 = arith.constant 0 : i32
    %2 = arith.cmpi ne, %1, %c0_i32_0 : i32
    scf.if %2 {
      %cst_25 = arith.constant 0.000000e+00 : f32
      %34 = vector.broadcast %cst_25 : f32 to vector<5x64xf32>
      %c0_26 = arith.constant 0 : index
      %c0_27 = arith.constant 0 : index
      %35 = vector.load %arg8[%c0_26, %c0_27] : memref<5x64xf32, #tpu.memory_space<vmem>>, vector<5x64xf32>
      tpu.vector_store %arg8[%c0_26, %c0_27], %34 {strides = array<i32>} : memref<5x64xf32, #tpu.memory_space<vmem>>, vector<5x64xf32>,
    } else {
    }
    %c0 = arith.constant 0 : index
    %c0_1 = arith.constant 0 : index
    %c0_2 = arith.constant 0 : index
    %c0_3 = arith.constant 0 : index
    %3 = vector.load %arg2[%c0, %c0_1, %c0_2, %c0_3] : memref<1x1x5x16xbf16, #tpu.memory_space<vmem>>, vector<1x1x5x16xbf16>
    %4 = vector.shape_cast %3 : vector<1x1x5x16xbf16> to vector<5x16xbf16>
    %c0_4 = arith.constant 0 : index
    %c0_5 = arith.constant 0 : index
    %c0_6 = arith.constant 0 : index
    %c0_7 = arith.constant 0 : index
    %5 = vector.load %arg3[%c0_4, %c0_5, %c0_6, %c0_7] : memref<1x1x5x16xbf16, #tpu.memory_space<vmem>>, vector<1x1x5x16xbf16>
    %6 = vector.shape_cast %5 : vector<1x1x5x16xbf16> to vector<5x16xbf16>
    %c0_8 = arith.constant 0 : index
    %c0_9 = arith.constant 0 : index
    %c0_10 = arith.constant 0 : index
    %c0_11 = arith.constant 0 : index
    %7 = vector.load %arg4[%c0_8, %c0_9, %c0_10, %c0_11] : memref<1x1x5x16xbf16, #tpu.memory_space<vmem>>, vector<1x1x5x16xbf16>
    %8 = vector.shape_cast %7 : vector<1x1x5x16xbf16> to vector<5x16xbf16>
    %cst = arith.constant dense<0.000000e+00> : vector<5x5xf32>
    %9 = tpu.matmul %4, %6, %cst {dimension_numbers = #tpu.dot_dimension_numbers<[1], [1], [0], [0], [0, 0, 1, 0], [], []>} : vector<5x16xbf16>, vector<5x16xbf16>, vector<5x5xf32> -> vector<5x5xf32>
    %cst_12 = arith.constant 2.500000e-01 : f32
    %10 = vector.broadcast %cst_12 : f32 to vector<5x5xf32>
    %11 = arith.mulf %9, %10 : vector<5x5xf32>
    %cst_13 = arith.constant dense<0xFF800000> : vector<5xf32>
    %12 = vector.multi_reduction <maximumf>, %11, %cst_13 [1] : vector<5x5xf32> to vector<5xf32>
    %13 = vector.shape_cast %12 : vector<5xf32> to vector<5x1xf32>
    %14 = vector.broadcast %13 : vector<5x1xf32> to vector<5x5xf32>
    %15 = arith.subf %11, %14 : vector<5x5xf32>
    %16 = math.exp %15 : vector<5x5xf32>
    %cst_14 = arith.constant dense<0.000000e+00> : vector<5xf32>
    %17 = vector.multi_reduction <add>, %16, %cst_14 [1] : vector<5x5xf32> to vector<5xf32>
    %18 = vector.shape_cast %17 : vector<5xf32> to vector<5x1xf32>
    %19 = tpu.reciprocal %18 {approx = true} : vector<5x1xf32> -> vector<5x1xf32>
    %20 = vector.broadcast %19 : vector<5x1xf32> to vector<5x5xf32>
    %21 = arith.mulf %16, %20 : vector<5x5xf32>
    %22 = arith.truncf %21 : vector<5x5xf32> to vector<5x5xbf16>
    %cst_15 = arith.constant dense<0.000000e+00> : vector<5x16xf32>
    %23 = tpu.matmul %22, %8, %cst_15 {dimension_numbers = #tpu.dot_dimension_numbers<[1], [0], [0], [1], [0, 0, 1, 1], [], []>} : vector<5x5xbf16>, vector<5x16xbf16>, vector<5x16xf32> -> vector<5x16xf32>
    %c0_16 = arith.constant 0 : index
    %c0_17 = arith.constant 0 : index
    %24 = vector.load %arg8[%c0_16, %c0_17] : memref<5x64xf32, #tpu.memory_space<vmem>>, vector<5x64xf32>
    %25 = arith.truncf %23 : vector<5x16xf32> to vector<5x16xbf16>
    %c0_18 = arith.constant 0 : index
    %c0_19 = arith.constant 0 : index
    %c0_20 = arith.constant 0 : index
    %26 = vector.load %arg5[%c0_18, %c0_19, %c0_20] : memref<1x16x64xbf16, #tpu.memory_space<vmem>>, vector<1x16x64xbf16>
    %27 = vector.shape_cast %26 : vector<1x16x64xbf16> to vector<16x64xbf16>
    %cst_21 = arith.constant dense<0.000000e+00> : vector<5x64xf32>
    %28 = tpu.matmul %25, %27, %cst_21 {dimension_numbers = #tpu.dot_dimension_numbers<[1], [0], [0], [1], [0, 0, 1, 1], [], []>} : vector<5x16xbf16>, vector<16x64xbf16>, vector<5x64xf32> -> vector<5x64xf32>
    %29 = arith.addf %24, %28 : vector<5x64xf32>
    %c0_22 = arith.constant 0 : index
    %c0_23 = arith.constant 0 : index
    %30 = vector.load %arg8[%c0_22, %c0_23] : memref<5x64xf32, #tpu.memory_space<vmem>>, vector<5x64xf32>
    tpu.vector_store %arg8[%c0_22, %c0_23], %29 {strides = array<i32>} : memref<5x64xf32, #tpu.memory_space<vmem>>, vector<5x64xf32>,
    %c3_i32 = arith.constant 3 : i32
    %31 = arith.cmpi eq, %arg1, %c3_i32 : i32
    %32 = arith.extui %31 : i1 to i32
    %c0_i32_24 = arith.constant 0 : i32
    %33 = arith.cmpi ne, %32, %c0_i32_24 : i32
    scf.if %33 {
      %c0_25 = arith.constant 0 : index
      %c0_26 = arith.constant 0 : index
      %34 = vector.load %arg8[%c0_25, %c0_26] : memref<5x64xf32, #tpu.memory_space<vmem>>, vector<5x64xf32>
      %c0_27 = arith.constant 0 : index
      %c0_28 = arith.constant 0 : index
      %35 = vector.load %arg6[%c0_27, %c0_28] : memref<1x64xf32, #tpu.memory_space<vmem>>, vector<1x64xf32>
      %36 = vector.broadcast %35 : vector<1x64xf32> to vector<5x64xf32>
      %37 = arith.addf %34, %36 : vector<5x64xf32>
      %38 = vector.shape_cast %37 : vector<5x64xf32> to vector<1x5x64xf32>
      %39 = arith.truncf %38 : vector<1x5x64xf32> to vector<1x5x64xbf16>
      %c0_29 = arith.constant 0 : index
      %c0_30 = arith.constant 0 : index
      %c0_31 = arith.constant 0 : index
      %40 = vector.load %arg7[%c0_29, %c0_30, %c0_31] : memref<1x5x64xbf16, #tpu.memory_space<vmem>>, vector<1x5x64xbf16>
      tpu.vector_store %arg7[%c0_29, %c0_30, %c0_31], %39 {strides = array<i32>} : memref<1x5x64xbf16, #tpu.memory_space<vmem>>, vector<1x5x64xbf16>,
    } else {
    }
    return
  }
  func.func @transform_0(%arg0: i32, %arg1: i32) -> (i32, i32, i32, i32) {
    %c0_i32 = arith.constant 0 : i32
    %c0_i32_0 = arith.constant 0 : i32
    %c0_i32_1 = arith.constant 0 : i32
    return %arg0, %arg1, %c0_i32, %c0_i32_0 : i32, i32, i32, i32
  }
  func.func @transform_1(%arg0: i32, %arg1: i32) -> (i32, i32, i32, i32) {
    %c4_i32 = arith.constant 4 : i32
    %0 = arith.addi %c4_i32, %arg1 : i32
    %c0_i32 = arith.constant 0 : i32
    %c0_i32_0 = arith.constant 0 : i32
    %c0_i32_1 = arith.constant 0 : i32
    return %arg0, %0, %c0_i32, %c0_i32_0 : i32, i32, i32, i32
  }
  func.func @transform_2(%arg0: i32, %arg1: i32) -> (i32, i32, i32, i32) {
    %c8_i32 = arith.constant 8 : i32
    %0 = arith.addi %c8_i32, %arg1 : i32
    %c0_i32 = arith.constant 0 : i32
    %c0_i32_0 = arith.constant 0 : i32
    %c0_i32_1 = arith.constant 0 : i32
    return %arg0, %0, %c0_i32, %c0_i32_0 : i32, i32, i32, i32
  }
  func.func @transform_3(%arg0: i32, %arg1: i32) -> (i32, i32, i32) {
    %c0_i32 = arith.constant 0 : i32
    %c0_i32_0 = arith.constant 0 : i32
    %c0_i32_1 = arith.constant 0 : i32
    return %arg1, %c0_i32, %c0_i32_0 : i32, i32, i32
  }
  func.func @transform_4(%arg0: i32, %arg1: i32) -> (i32, i32) {
    %c0_i32 = arith.constant 0 : i32
    %c0_i32_0 = arith.constant 0 : i32
    %c0_i32_1 = arith.constant 0 : i32
    return %c0_i32, %c0_i32_0 : i32, i32
  }
  func.func @transform_5(%arg0: i32, %arg1: i32) -> (i32, i32, i32) {
    %c0_i32 = arith.constant 0 : i32
    %c0_i32_0 = arith.constant 0 : i32
    %c0_i32_1 = arith.constant 0 : i32
    return %arg0, %c0_i32, %c0_i32_0 : i32, i32, i32
  }
}

module attributes {stable_mosaic.version = 11 : i64} {
  func.func @_ln_matmul_kernel(%arg0: i32, %arg1: i32, %arg2: memref<16x64xf32, #tpu.memory_space<vmem>>, %arg3: memref<1x64xf32, #tpu.memory_space<vmem>>, %arg4: memref<1x64xf32, #tpu.memory_space<vmem>>, %arg5: memref<64x256xbf16, #tpu.memory_space<vmem>>, %arg6: memref<1x256xf32, #tpu.memory_space<vmem>>, %arg7: memref<16x256xbf16, #tpu.memory_space<vmem>>, %arg8: memref<16x64xbf16, #tpu.memory_space<vmem>>) attributes {dimension_semantics = [#tpu.dimension_semantics<parallel>, #tpu.dimension_semantics<arbitrary>], iteration_bounds = array<i64: 1, 1>, scalar_prefetch = 0 : i64, scratch_operands = 1 : i64, tpu.core_type = #tpu.core_type<tc>, window_params = [{transform_indices = @transform_0, window_bounds = array<i64: 16, 64>}, {pipeline_mode = #tpu.pipeline_mode<synchronous>, transform_indices = @transform_1, window_bounds = array<i64: 1, 64>}, {pipeline_mode = #tpu.pipeline_mode<synchronous>, transform_indices = @transform_2, window_bounds = array<i64: 1, 64>}, {transform_indices = @transform_3, window_bounds = array<i64: 64, 256>}, {transform_indices = @transform_4, window_bounds = array<i64: 1, 256>}, {transform_indices = @transform_5, window_bounds = array<i64: 16, 256>}]} {
    %c0_i32 = arith.constant 0 : i32
    %0 = arith.cmpi eq, %arg1, %c0_i32 : i32
    %1 = arith.extui %0 : i1 to i32
    %c0_i32_0 = arith.constant 0 : i32
    %2 = arith.cmpi ne, %1, %c0_i32_0 : i32
    scf.if %2 {
      %c0_12 = arith.constant 0 : index
      %c0_13 = arith.constant 0 : index
      %24 = vector.load %arg2[%c0_12, %c0_13] : memref<16x64xf32, #tpu.memory_space<vmem>>, vector<16x64xf32>
      %cst_14 = arith.constant dense<0.000000e+00> : vector<16xf32>
      %25 = vector.multi_reduction <add>, %24, %cst_14 [1] : vector<16x64xf32> to vector<16xf32>
      %26 = vector.shape_cast %25 : vector<16xf32> to vector<16x1xf32>
      %cst_15 = arith.constant 6.400000e+01 : f32
      %27 = vector.broadcast %cst_15 : f32 to vector<16x1xf32>
      %28 = arith.divf %26, %27 : vector<16x1xf32>
      %29 = vector.broadcast %28 : vector<16x1xf32> to vector<16x64xf32>
      %30 = arith.subf %24, %29 : vector<16x64xf32>
      %31 = arith.mulf %30, %30 : vector<16x64xf32>
      %cst_16 = arith.constant dense<0.000000e+00> : vector<16xf32>
      %32 = vector.multi_reduction <add>, %31, %cst_16 [1] : vector<16x64xf32> to vector<16xf32>
      %33 = vector.shape_cast %32 : vector<16xf32> to vector<16x1xf32>
      %cst_17 = arith.constant 6.400000e+01 : f32
      %34 = vector.broadcast %cst_17 : f32 to vector<16x1xf32>
      %35 = arith.divf %33, %34 : vector<16x1xf32>
      %cst_18 = arith.constant 9.99999974E-6 : f32
      %36 = vector.broadcast %cst_18 : f32 to vector<16x1xf32>
      %37 = arith.addf %35, %36 : vector<16x1xf32>
      %38 = math.rsqrt %37 : vector<16x1xf32>
      %39 = vector.broadcast %38 : vector<16x1xf32> to vector<16x64xf32>
      %40 = arith.mulf %30, %39 : vector<16x64xf32>
      %c0_19 = arith.constant 0 : index
      %c0_20 = arith.constant 0 : index
      %41 = vector.load %arg3[%c0_19, %c0_20] : memref<1x64xf32, #tpu.memory_space<vmem>>, vector<1x64xf32>
      %42 = vector.broadcast %41 : vector<1x64xf32> to vector<16x64xf32>
      %43 = arith.mulf %40, %42 : vector<16x64xf32>
      %c0_21 = arith.constant 0 : index
      %c0_22 = arith.constant 0 : index
      %44 = vector.load %arg4[%c0_21, %c0_22] : memref<1x64xf32, #tpu.memory_space<vmem>>, vector<1x64xf32>
      %45 = vector.broadcast %44 : vector<1x64xf32> to vector<16x64xf32>
      %46 = arith.addf %43, %45 : vector<16x64xf32>
      %47 = arith.truncf %46 : vector<16x64xf32> to vector<16x64xbf16>
      %c0_23 = arith.constant 0 : index
      %c0_24 = arith.constant 0 : index
      %48 = vector.load %arg8[%c0_23, %c0_24] : memref<16x64xbf16, #tpu.memory_space<vmem>>, vector<16x64xbf16>
      tpu.vector_store %arg8[%c0_23, %c0_24], %47 {strides = array<i32>} : memref<16x64xbf16, #tpu.memory_space<vmem>>, vector<16x64xbf16>,
    } else {
    }
    %c0 = arith.constant 0 : index
    %c0_1 = arith.constant 0 : index
    %3 = vector.load %arg8[%c0, %c0_1] : memref<16x64xbf16, #tpu.memory_space<vmem>>, vector<16x64xbf16>
    %c0_2 = arith.constant 0 : index
    %c0_3 = arith.constant 0 : index
    %4 = vector.load %arg5[%c0_2, %c0_3] : memref<64x256xbf16, #tpu.memory_space<vmem>>, vector<64x256xbf16>
    %cst = arith.constant dense<0.000000e+00> : vector<16x256xf32>
    %5 = tpu.matmul %3, %4, %cst {dimension_numbers = #tpu.dot_dimension_numbers<[1], [0], [0], [1], [0, 0, 1, 1], [], []>} : vector<16x64xbf16>, vector<64x256xbf16>, vector<16x256xf32> -> vector<16x256xf32>
    %c0_4 = arith.constant 0 : index
    %c0_5 = arith.constant 0 : index
    %6 = vector.load %arg6[%c0_4, %c0_5] : memref<1x256xf32, #tpu.memory_space<vmem>>, vector<1x256xf32>
    %7 = vector.broadcast %6 : vector<1x256xf32> to vector<16x256xf32>
    %8 = arith.addf %5, %7 : vector<16x256xf32>
    %9 = arith.mulf %8, %8 : vector<16x256xf32>
    %10 = arith.mulf %8, %9 : vector<16x256xf32>
    %cst_6 = arith.constant 4.471500e-02 : f32
    %11 = vector.broadcast %cst_6 : f32 to vector<16x256xf32>
    %12 = arith.mulf %11, %10 : vector<16x256xf32>
    %13 = arith.addf %8, %12 : vector<16x256xf32>
    %cst_7 = arith.constant 0.797884583 : f32
    %14 = vector.broadcast %cst_7 : f32 to vector<16x256xf32>
    %15 = arith.mulf %14, %13 : vector<16x256xf32>
    %16 = math.tanh %15 : vector<16x256xf32>
    %cst_8 = arith.constant 1.000000e+00 : f32
    %17 = vector.broadcast %cst_8 : f32 to vector<16x256xf32>
    %18 = arith.addf %17, %16 : vector<16x256xf32>
    %cst_9 = arith.constant 5.000000e-01 : f32
    %19 = vector.broadcast %cst_9 : f32 to vector<16x256xf32>
    %20 = arith.mulf %19, %18 : vector<16x256xf32>
    %21 = arith.mulf %8, %20 : vector<16x256xf32>
    %22 = arith.truncf %21 : vector<16x256xf32> to vector<16x256xbf16>
    %c0_10 = arith.constant 0 : index
    %c0_11 = arith.constant 0 : index
    %23 = vector.load %arg7[%c0_10, %c0_11] : memref<16x256xbf16, #tpu.memory_space<vmem>>, vector<16x256xbf16>
    tpu.vector_store %arg7[%c0_10, %c0_11], %22 {strides = array<i32>} : memref<16x256xbf16, #tpu.memory_space<vmem>>, vector<16x256xbf16>,
    return
  }
  func.func @transform_0(%arg0: i32, %arg1: i32) -> (i32, i32) {
    %c0_i32 = arith.constant 0 : i32
    %c0_i32_0 = arith.constant 0 : i32
    return %arg0, %c0_i32 : i32, i32
  }
  func.func @transform_1(%arg0: i32, %arg1: i32) -> (i32, i32) {
    %c0_i32 = arith.constant 0 : i32
    %c0_i32_0 = arith.constant 0 : i32
    %c0_i32_1 = arith.constant 0 : i32
    return %c0_i32, %c0_i32_0 : i32, i32
  }
  func.func @transform_2(%arg0: i32, %arg1: i32) -> (i32, i32) {
    %c0_i32 = arith.constant 0 : i32
    %c0_i32_0 = arith.constant 0 : i32
    %c0_i32_1 = arith.constant 0 : i32
    return %c0_i32, %c0_i32_0 : i32, i32
  }
  func.func @transform_3(%arg0: i32, %arg1: i32) -> (i32, i32) {
    %c0_i32 = arith.constant 0 : i32
    %c0_i32_0 = arith.constant 0 : i32
    return %c0_i32, %arg1 : i32, i32
  }
  func.func @transform_4(%arg0: i32, %arg1: i32) -> (i32, i32) {
    %c0_i32 = arith.constant 0 : i32
    %c0_i32_0 = arith.constant 0 : i32
    return %c0_i32, %arg1 : i32, i32
  }
  func.func @transform_5(%arg0: i32, %arg1: i32) -> (i32, i32) {
    %c0_i32 = arith.constant 0 : i32
    return %arg0, %arg1 : i32, i32
  }
}

module attributes {stable_mosaic.version = 11 : i64} {
  func.func @_matmul_kernel(%arg0: i32, %arg1: i32, %arg2: i32, %arg3: memref<16x256xbf16, #tpu.memory_space<vmem>>, %arg4: memref<256x128xbf16, #tpu.memory_space<vmem>>, %arg5: memref<1x128xf32, #tpu.memory_space<vmem>>, %arg6: memref<16x128xbf16, #tpu.memory_space<vmem>>, %arg7: memref<16x128xf32, #tpu.memory_space<vmem>>) attributes {dimension_semantics = [#tpu.dimension_semantics<parallel>, #tpu.dimension_semantics<parallel>, #tpu.dimension_semantics<arbitrary>], iteration_bounds = array<i64: 1, 1, 1>, scalar_prefetch = 0 : i64, scratch_operands = 1 : i64, tpu.core_type = #tpu.core_type<tc>, window_params = [{transform_indices = @transform_0, window_bounds = array<i64: 16, 256>}, {transform_indices = @transform_1, window_bounds = array<i64: 256, 128>}, {transform_indices = @transform_2, window_bounds = array<i64: 1, 128>}, {transform_indices = @transform_3, window_bounds = array<i64: 16, 128>}]} {
    %c0_i32 = arith.constant 0 : i32
    %0 = arith.cmpi eq, %arg2, %c0_i32 : i32
    %1 = arith.extui %0 : i1 to i32
    %c0_i32_0 = arith.constant 0 : i32
    %2 = arith.cmpi ne, %1, %c0_i32_0 : i32
    scf.if %2 {
      %cst_10 = arith.constant 0.000000e+00 : f32
      %12 = vector.broadcast %cst_10 : f32 to vector<16x128xf32>
      %c0_11 = arith.constant 0 : index
      %c0_12 = arith.constant 0 : index
      %13 = vector.load %arg7[%c0_11, %c0_12] : memref<16x128xf32, #tpu.memory_space<vmem>>, vector<16x128xf32>
      tpu.vector_store %arg7[%c0_11, %c0_12], %12 {strides = array<i32>} : memref<16x128xf32, #tpu.memory_space<vmem>>, vector<16x128xf32>,
    } else {
    }
    %c0 = arith.constant 0 : index
    %c0_1 = arith.constant 0 : index
    %3 = vector.load %arg7[%c0, %c0_1] : memref<16x128xf32, #tpu.memory_space<vmem>>, vector<16x128xf32>
    %c0_2 = arith.constant 0 : index
    %c0_3 = arith.constant 0 : index
    %4 = vector.load %arg3[%c0_2, %c0_3] : memref<16x256xbf16, #tpu.memory_space<vmem>>, vector<16x256xbf16>
    %c0_4 = arith.constant 0 : index
    %c0_5 = arith.constant 0 : index
    %5 = vector.load %arg4[%c0_4, %c0_5] : memref<256x128xbf16, #tpu.memory_space<vmem>>, vector<256x128xbf16>
    %cst = arith.constant dense<0.000000e+00> : vector<16x128xf32>
    %6 = tpu.matmul %4, %5, %cst {dimension_numbers = #tpu.dot_dimension_numbers<[1], [0], [0], [1], [0, 0, 1, 1], [], []>} : vector<16x256xbf16>, vector<256x128xbf16>, vector<16x128xf32> -> vector<16x128xf32>
    %7 = arith.addf %3, %6 : vector<16x128xf32>
    %c0_6 = arith.constant 0 : index
    %c0_7 = arith.constant 0 : index
    %8 = vector.load %arg7[%c0_6, %c0_7] : memref<16x128xf32, #tpu.memory_space<vmem>>, vector<16x128xf32>
    tpu.vector_store %arg7[%c0_6, %c0_7], %7 {strides = array<i32>} : memref<16x128xf32, #tpu.memory_space<vmem>>, vector<16x128xf32>,
    %c0_i32_8 = arith.constant 0 : i32
    %9 = arith.cmpi eq, %arg2, %c0_i32_8 : i32
    %10 = arith.extui %9 : i1 to i32
    %c0_i32_9 = arith.constant 0 : i32
    %11 = arith.cmpi ne, %10, %c0_i32_9 : i32
    scf.if %11 {
      %c0_10 = arith.constant 0 : index
      %c0_11 = arith.constant 0 : index
      %12 = vector.load %arg7[%c0_10, %c0_11] : memref<16x128xf32, #tpu.memory_space<vmem>>, vector<16x128xf32>
      %c0_12 = arith.constant 0 : index
      %c0_13 = arith.constant 0 : index
      %13 = vector.load %arg5[%c0_12, %c0_13] : memref<1x128xf32, #tpu.memory_space<vmem>>, vector<1x128xf32>
      %14 = vector.broadcast %13 : vector<1x128xf32> to vector<16x128xf32>
      %15 = arith.addf %12, %14 : vector<16x128xf32>
      %16 = arith.truncf %15 : vector<16x128xf32> to vector<16x128xbf16>
      %c0_14 = arith.constant 0 : index
      %c0_15 = arith.constant 0 : index
      %17 = vector.load %arg6[%c0_14, %c0_15] : memref<16x128xbf16, #tpu.memory_space<vmem>>, vector<16x128xbf16>
      tpu.vector_store %arg6[%c0_14, %c0_15], %16 {strides = array<i32>} : memref<16x128xbf16, #tpu.memory_space<vmem>>, vector<16x128xbf16>,
    } else {
    }
    return
  }
  func.func @transform_0(%arg0: i32, %arg1: i32, %arg2: i32) -> (i32, i32) {
    %c0_i32 = arith.constant 0 : i32
    return %arg0, %arg2 : i32, i32
  }
  func.func @transform_1(%arg0: i32, %arg1: i32, %arg2: i32) -> (i32, i32) {
    %c0_i32 = arith.constant 0 : i32
    return %arg2, %arg1 : i32, i32
  }
  func.func @transform_2(%arg0: i32, %arg1: i32, %arg2: i32) -> (i32, i32) {
    %c0_i32 = arith.constant 0 : i32
    %c0_i32_0 = arith.constant 0 : i32
    return %c0_i32, %arg1 : i32, i32
  }
  func.func @transform_3(%arg0: i32, %arg1: i32, %arg2: i32) -> (i32, i32) {
    %c0_i32 = arith.constant 0 : i32
    return %arg0, %arg1 : i32, i32
  }
}

module attributes {stable_mosaic.version = 11 : i64} {
  func.func @_matmul_kernel(%arg0: i32, %arg1: i32, %arg2: i32, %arg3: memref<16x128xf32, #tpu.memory_space<vmem>>, %arg4: memref<128x128xbf16, #tpu.memory_space<vmem>>, %arg5: memref<1x128xf32, #tpu.memory_space<vmem>>, %arg6: memref<16x128xbf16, #tpu.memory_space<vmem>>, %arg7: memref<16x128xf32, #tpu.memory_space<vmem>>) attributes {dimension_semantics = [#tpu.dimension_semantics<parallel>, #tpu.dimension_semantics<parallel>, #tpu.dimension_semantics<arbitrary>], iteration_bounds = array<i64: 1, 1, 1>, scalar_prefetch = 0 : i64, scratch_operands = 1 : i64, tpu.core_type = #tpu.core_type<tc>, window_params = [{transform_indices = @transform_0, window_bounds = array<i64: 16, 128>}, {transform_indices = @transform_1, window_bounds = array<i64: 128, 128>}, {transform_indices = @transform_2, window_bounds = array<i64: 1, 128>}, {transform_indices = @transform_3, window_bounds = array<i64: 16, 128>}]} {
    %c0_i32 = arith.constant 0 : i32
    %0 = arith.cmpi eq, %arg2, %c0_i32 : i32
    %1 = arith.extui %0 : i1 to i32
    %c0_i32_0 = arith.constant 0 : i32
    %2 = arith.cmpi ne, %1, %c0_i32_0 : i32
    scf.if %2 {
      %cst_10 = arith.constant 0.000000e+00 : f32
      %13 = vector.broadcast %cst_10 : f32 to vector<16x128xf32>
      %c0_11 = arith.constant 0 : index
      %c0_12 = arith.constant 0 : index
      %14 = vector.load %arg7[%c0_11, %c0_12] : memref<16x128xf32, #tpu.memory_space<vmem>>, vector<16x128xf32>
      tpu.vector_store %arg7[%c0_11, %c0_12], %13 {strides = array<i32>} : memref<16x128xf32, #tpu.memory_space<vmem>>, vector<16x128xf32>,
    } else {
    }
    %c0 = arith.constant 0 : index
    %c0_1 = arith.constant 0 : index
    %3 = vector.load %arg7[%c0, %c0_1] : memref<16x128xf32, #tpu.memory_space<vmem>>, vector<16x128xf32>
    %c0_2 = arith.constant 0 : index
    %c0_3 = arith.constant 0 : index
    %4 = vector.load %arg3[%c0_2, %c0_3] : memref<16x128xf32, #tpu.memory_space<vmem>>, vector<16x128xf32>
    %5 = arith.truncf %4 : vector<16x128xf32> to vector<16x128xbf16>
    %c0_4 = arith.constant 0 : index
    %c0_5 = arith.constant 0 : index
    %6 = vector.load %arg4[%c0_4, %c0_5] : memref<128x128xbf16, #tpu.memory_space<vmem>>, vector<128x128xbf16>
    %cst = arith.constant dense<0.000000e+00> : vector<16x128xf32>
    %7 = tpu.matmul %5, %6, %cst {dimension_numbers = #tpu.dot_dimension_numbers<[1], [0], [0], [1], [0, 0, 1, 1], [], []>} : vector<16x128xbf16>, vector<128x128xbf16>, vector<16x128xf32> -> vector<16x128xf32>
    %8 = arith.addf %3, %7 : vector<16x128xf32>
    %c0_6 = arith.constant 0 : index
    %c0_7 = arith.constant 0 : index
    %9 = vector.load %arg7[%c0_6, %c0_7] : memref<16x128xf32, #tpu.memory_space<vmem>>, vector<16x128xf32>
    tpu.vector_store %arg7[%c0_6, %c0_7], %8 {strides = array<i32>} : memref<16x128xf32, #tpu.memory_space<vmem>>, vector<16x128xf32>,
    %c0_i32_8 = arith.constant 0 : i32
    %10 = arith.cmpi eq, %arg2, %c0_i32_8 : i32
    %11 = arith.extui %10 : i1 to i32
    %c0_i32_9 = arith.constant 0 : i32
    %12 = arith.cmpi ne, %11, %c0_i32_9 : i32
    scf.if %12 {
      %c0_10 = arith.constant 0 : index
      %c0_11 = arith.constant 0 : index
      %13 = vector.load %arg7[%c0_10, %c0_11] : memref<16x128xf32, #tpu.memory_space<vmem>>, vector<16x128xf32>
      %c0_12 = arith.constant 0 : index
      %c0_13 = arith.constant 0 : index
      %14 = vector.load %arg5[%c0_12, %c0_13] : memref<1x128xf32, #tpu.memory_space<vmem>>, vector<1x128xf32>
      %15 = vector.broadcast %14 : vector<1x128xf32> to vector<16x128xf32>
      %16 = arith.addf %13, %15 : vector<16x128xf32>
      %17 = arith.mulf %16, %16 : vector<16x128xf32>
      %18 = arith.mulf %16, %17 : vector<16x128xf32>
      %cst_14 = arith.constant 4.471500e-02 : f32
      %19 = vector.broadcast %cst_14 : f32 to vector<16x128xf32>
      %20 = arith.mulf %19, %18 : vector<16x128xf32>
      %21 = arith.addf %16, %20 : vector<16x128xf32>
      %cst_15 = arith.constant 0.797884583 : f32
      %22 = vector.broadcast %cst_15 : f32 to vector<16x128xf32>
      %23 = arith.mulf %22, %21 : vector<16x128xf32>
      %24 = math.tanh %23 : vector<16x128xf32>
      %cst_16 = arith.constant 1.000000e+00 : f32
      %25 = vector.broadcast %cst_16 : f32 to vector<16x128xf32>
      %26 = arith.addf %25, %24 : vector<16x128xf32>
      %cst_17 = arith.constant 5.000000e-01 : f32
      %27 = vector.broadcast %cst_17 : f32 to vector<16x128xf32>
      %28 = arith.mulf %27, %26 : vector<16x128xf32>
      %29 = arith.mulf %16, %28 : vector<16x128xf32>
      %30 = arith.truncf %29 : vector<16x128xf32> to vector<16x128xbf16>
      %c0_18 = arith.constant 0 : index
      %c0_19 = arith.constant 0 : index
      %31 = vector.load %arg6[%c0_18, %c0_19] : memref<16x128xbf16, #tpu.memory_space<vmem>>, vector<16x128xbf16>
      tpu.vector_store %arg6[%c0_18, %c0_19], %30 {strides = array<i32>} : memref<16x128xbf16, #tpu.memory_space<vmem>>, vector<16x128xbf16>,
    } else {
    }
    return
  }
  func.func @transform_0(%arg0: i32, %arg1: i32, %arg2: i32) -> (i32, i32) {
    %c0_i32 = arith.constant 0 : i32
    return %arg0, %arg2 : i32, i32
  }
  func.func @transform_1(%arg0: i32, %arg1: i32, %arg2: i32) -> (i32, i32) {
    %c0_i32 = arith.constant 0 : i32
    return %arg2, %arg1 : i32, i32
  }
  func.func @transform_2(%arg0: i32, %arg1: i32, %arg2: i32) -> (i32, i32) {
    %c0_i32 = arith.constant 0 : i32
    %c0_i32_0 = arith.constant 0 : i32
    return %c0_i32, %arg1 : i32, i32
  }
  func.func @transform_3(%arg0: i32, %arg1: i32, %arg2: i32) -> (i32, i32) {
    %c0_i32 = arith.constant 0 : i32
    return %arg0, %arg1 : i32, i32
  }
}

module attributes {stable_mosaic.version = 11 : i64} {
  func.func @_matmul_kernel(%arg0: i32, %arg1: i32, %arg2: i32, %arg3: memref<16x128xbf16, #tpu.memory_space<vmem>>, %arg4: memref<128x128xbf16, #tpu.memory_space<vmem>>, %arg5: memref<1x128xf32, #tpu.memory_space<vmem>>, %arg6: memref<16x128xbf16, #tpu.memory_space<vmem>>, %arg7: memref<16x128xf32, #tpu.memory_space<vmem>>) attributes {dimension_semantics = [#tpu.dimension_semantics<parallel>, #tpu.dimension_semantics<parallel>, #tpu.dimension_semantics<arbitrary>], iteration_bounds = array<i64: 1, 1, 1>, scalar_prefetch = 0 : i64, scratch_operands = 1 : i64, tpu.core_type = #tpu.core_type<tc>, window_params = [{transform_indices = @transform_0, window_bounds = array<i64: 16, 128>}, {transform_indices = @transform_1, window_bounds = array<i64: 128, 128>}, {transform_indices = @transform_2, window_bounds = array<i64: 1, 128>}, {transform_indices = @transform_3, window_bounds = array<i64: 16, 128>}]} {
    %c0_i32 = arith.constant 0 : i32
    %0 = arith.cmpi eq, %arg2, %c0_i32 : i32
    %1 = arith.extui %0 : i1 to i32
    %c0_i32_0 = arith.constant 0 : i32
    %2 = arith.cmpi ne, %1, %c0_i32_0 : i32
    scf.if %2 {
      %cst_10 = arith.constant 0.000000e+00 : f32
      %12 = vector.broadcast %cst_10 : f32 to vector<16x128xf32>
      %c0_11 = arith.constant 0 : index
      %c0_12 = arith.constant 0 : index
      %13 = vector.load %arg7[%c0_11, %c0_12] : memref<16x128xf32, #tpu.memory_space<vmem>>, vector<16x128xf32>
      tpu.vector_store %arg7[%c0_11, %c0_12], %12 {strides = array<i32>} : memref<16x128xf32, #tpu.memory_space<vmem>>, vector<16x128xf32>,
    } else {
    }
    %c0 = arith.constant 0 : index
    %c0_1 = arith.constant 0 : index
    %3 = vector.load %arg7[%c0, %c0_1] : memref<16x128xf32, #tpu.memory_space<vmem>>, vector<16x128xf32>
    %c0_2 = arith.constant 0 : index
    %c0_3 = arith.constant 0 : index
    %4 = vector.load %arg3[%c0_2, %c0_3] : memref<16x128xbf16, #tpu.memory_space<vmem>>, vector<16x128xbf16>
    %c0_4 = arith.constant 0 : index
    %c0_5 = arith.constant 0 : index
    %5 = vector.load %arg4[%c0_4, %c0_5] : memref<128x128xbf16, #tpu.memory_space<vmem>>, vector<128x128xbf16>
    %cst = arith.constant dense<0.000000e+00> : vector<16x128xf32>
    %6 = tpu.matmul %4, %5, %cst {dimension_numbers = #tpu.dot_dimension_numbers<[1], [0], [0], [1], [0, 0, 1, 1], [], []>} : vector<16x128xbf16>, vector<128x128xbf16>, vector<16x128xf32> -> vector<16x128xf32>
    %7 = arith.addf %3, %6 : vector<16x128xf32>
    %c0_6 = arith.constant 0 : index
    %c0_7 = arith.constant 0 : index
    %8 = vector.load %arg7[%c0_6, %c0_7] : memref<16x128xf32, #tpu.memory_space<vmem>>, vector<16x128xf32>
    tpu.vector_store %arg7[%c0_6, %c0_7], %7 {strides = array<i32>} : memref<16x128xf32, #tpu.memory_space<vmem>>, vector<16x128xf32>,
    %c0_i32_8 = arith.constant 0 : i32
    %9 = arith.cmpi eq, %arg2, %c0_i32_8 : i32
    %10 = arith.extui %9 : i1 to i32
    %c0_i32_9 = arith.constant 0 : i32
    %11 = arith.cmpi ne, %10, %c0_i32_9 : i32
    scf.if %11 {
      %c0_10 = arith.constant 0 : index
      %c0_11 = arith.constant 0 : index
      %12 = vector.load %arg7[%c0_10, %c0_11] : memref<16x128xf32, #tpu.memory_space<vmem>>, vector<16x128xf32>
      %c0_12 = arith.constant 0 : index
      %c0_13 = arith.constant 0 : index
      %13 = vector.load %arg5[%c0_12, %c0_13] : memref<1x128xf32, #tpu.memory_space<vmem>>, vector<1x128xf32>
      %14 = vector.broadcast %13 : vector<1x128xf32> to vector<16x128xf32>
      %15 = arith.addf %12, %14 : vector<16x128xf32>
      %16 = arith.truncf %15 : vector<16x128xf32> to vector<16x128xbf16>
      %c0_14 = arith.constant 0 : index
      %c0_15 = arith.constant 0 : index
      %17 = vector.load %arg6[%c0_14, %c0_15] : memref<16x128xbf16, #tpu.memory_space<vmem>>, vector<16x128xbf16>
      tpu.vector_store %arg6[%c0_14, %c0_15], %16 {strides = array<i32>} : memref<16x128xbf16, #tpu.memory_space<vmem>>, vector<16x128xbf16>,
    } else {
    }
    return
  }
  func.func @transform_0(%arg0: i32, %arg1: i32, %arg2: i32) -> (i32, i32) {
    %c0_i32 = arith.constant 0 : i32
    return %arg0, %arg2 : i32, i32
  }
  func.func @transform_1(%arg0: i32, %arg1: i32, %arg2: i32) -> (i32, i32) {
    %c0_i32 = arith.constant 0 : i32
    return %arg2, %arg1 : i32, i32
  }
  func.func @transform_2(%arg0: i32, %arg1: i32, %arg2: i32) -> (i32, i32) {
    %c0_i32 = arith.constant 0 : i32
    %c0_i32_0 = arith.constant 0 : i32
    return %c0_i32, %arg1 : i32, i32
  }
  func.func @transform_3(%arg0: i32, %arg1: i32, %arg2: i32) -> (i32, i32) {
    %c0_i32 = arith.constant 0 : i32
    return %arg0, %arg1 : i32, i32
  }
}

module attributes {stable_mosaic.version = 11 : i64} {
  func.func @_mha_kernel(%arg0: i32, %arg1: i32, %arg2: memref<1x1x5x8xbf16, #tpu.memory_space<vmem>>, %arg3: memref<1x1x5x8xbf16, #tpu.memory_space<vmem>>, %arg4: memref<1x1x5x8xbf16, #tpu.memory_space<vmem>>, %arg5: memref<1x8x32xbf16, #tpu.memory_space<vmem>>, %arg6: memref<1x32xf32, #tpu.memory_space<vmem>>, %arg7: memref<1x5x32xbf16, #tpu.memory_space<vmem>>, %arg8: memref<5x32xf32, #tpu.memory_space<vmem>>) attributes {dimension_semantics = [#tpu.dimension_semantics<parallel>, #tpu.dimension_semantics<arbitrary>], iteration_bounds = array<i64: 2, 4>, scalar_prefetch = 0 : i64, scratch_operands = 1 : i64, tpu.core_type = #tpu.core_type<tc>, window_params = [{transform_indices = @transform_0, window_bounds = array<i64: 1, 1, 5, 8>}, {transform_indices = @transform_1, window_bounds = array<i64: 1, 1, 5, 8>}, {transform_indices = @transform_2, window_bounds = array<i64: 1, 1, 5, 8>}, {transform_indices = @transform_3, window_bounds = array<i64: 1, 8, 32>}, {pipeline_mode = #tpu.pipeline_mode<synchronous>, transform_indices = @transform_4, window_bounds = array<i64: 1, 32>}, {transform_indices = @transform_5, window_bounds = array<i64: 1, 5, 32>}]} {
    %c0_i32 = arith.constant 0 : i32
    %0 = arith.cmpi eq, %arg1, %c0_i32 : i32
    %1 = arith.extui %0 : i1 to i32
    %c0_i32_0 = arith.constant 0 : i32
    %2 = arith.cmpi ne, %1, %c0_i32_0 : i32
    scf.if %2 {
      %cst_25 = arith.constant 0.000000e+00 : f32
      %34 = vector.broadcast %cst_25 : f32 to vector<5x32xf32>
      %c0_26 = arith.constant 0 : index
      %c0_27 = arith.constant 0 : index
      %35 = vector.load %arg8[%c0_26, %c0_27] : memref<5x32xf32, #tpu.memory_space<vmem>>, vector<5x32xf32>
      tpu.vector_store %arg8[%c0_26, %c0_27], %34 {strides = array<i32>} : memref<5x32xf32, #tpu.memory_space<vmem>>, vector<5x32xf32>,
    } else {
    }
    %c0 = arith.constant 0 : index
    %c0_1 = arith.constant 0 : index
    %c0_2 = arith.constant 0 : index
    %c0_3 = arith.constant 0 : index
    %3 = vector.load %arg2[%c0, %c0_1, %c0_2, %c0_3] : memref<1x1x5x8xbf16, #tpu.memory_space<vmem>>, vector<1x1x5x8xbf16>
    %4 = vector.shape_cast %3 : vector<1x1x5x8xbf16> to vector<5x8xbf16>
    %c0_4 = arith.constant 0 : index
    %c0_5 = arith.constant 0 : index
    %c0_6 = arith.constant 0 : index
    %c0_7 = arith.constant 0 : index
    %5 = vector.load %arg3[%c0_4, %c0_5, %c0_6, %c0_7] : memref<1x1x5x8xbf16, #tpu.memory_space<vmem>>, vector<1x1x5x8xbf16>
    %6 = vector.shape_cast %5 : vector<1x1x5x8xbf16> to vector<5x8xbf16>
    %c0_8 = arith.constant 0 : index
    %c0_9 = arith.constant 0 : index
    %c0_10 = arith.constant 0 : index
    %c0_11 = arith.constant 0 : index
    %7 = vector.load %arg4[%c0_8, %c0_9, %c0_10, %c0_11] : memref<1x1x5x8xbf16, #tpu.memory_space<vmem>>, vector<1x1x5x8xbf16>
    %8 = vector.shape_cast %7 : vector<1x1x5x8xbf16> to vector<5x8xbf16>
    %cst = arith.constant dense<0.000000e+00> : vector<5x5xf32>
    %9 = tpu.matmul %4, %6, %cst {dimension_numbers = #tpu.dot_dimension_numbers<[1], [1], [0], [0], [0, 0, 1, 0], [], []>} : vector<5x8xbf16>, vector<5x8xbf16>, vector<5x5xf32> -> vector<5x5xf32>
    %cst_12 = arith.constant 0.353553385 : f32
    %10 = vector.broadcast %cst_12 : f32 to vector<5x5xf32>
    %11 = arith.mulf %9, %10 : vector<5x5xf32>
    %cst_13 = arith.constant dense<0xFF800000> : vector<5xf32>
    %12 = vector.multi_reduction <maximumf>, %11, %cst_13 [1] : vector<5x5xf32> to vector<5xf32>
    %13 = vector.shape_cast %12 : vector<5xf32> to vector<5x1xf32>
    %14 = vector.broadcast %13 : vector<5x1xf32> to vector<5x5xf32>
    %15 = arith.subf %11, %14 : vector<5x5xf32>
    %16 = math.exp %15 : vector<5x5xf32>
    %cst_14 = arith.constant dense<0.000000e+00> : vector<5xf32>
    %17 = vector.multi_reduction <add>, %16, %cst_14 [1] : vector<5x5xf32> to vector<5xf32>
    %18 = vector.shape_cast %17 : vector<5xf32> to vector<5x1xf32>
    %19 = tpu.reciprocal %18 {approx = true} : vector<5x1xf32> -> vector<5x1xf32>
    %20 = vector.broadcast %19 : vector<5x1xf32> to vector<5x5xf32>
    %21 = arith.mulf %16, %20 : vector<5x5xf32>
    %22 = arith.truncf %21 : vector<5x5xf32> to vector<5x5xbf16>
    %cst_15 = arith.constant dense<0.000000e+00> : vector<5x8xf32>
    %23 = tpu.matmul %22, %8, %cst_15 {dimension_numbers = #tpu.dot_dimension_numbers<[1], [0], [0], [1], [0, 0, 1, 1], [], []>} : vector<5x5xbf16>, vector<5x8xbf16>, vector<5x8xf32> -> vector<5x8xf32>
    %c0_16 = arith.constant 0 : index
    %c0_17 = arith.constant 0 : index
    %24 = vector.load %arg8[%c0_16, %c0_17] : memref<5x32xf32, #tpu.memory_space<vmem>>, vector<5x32xf32>
    %25 = arith.truncf %23 : vector<5x8xf32> to vector<5x8xbf16>
    %c0_18 = arith.constant 0 : index
    %c0_19 = arith.constant 0 : index
    %c0_20 = arith.constant 0 : index
    %26 = vector.load %arg5[%c0_18, %c0_19, %c0_20] : memref<1x8x32xbf16, #tpu.memory_space<vmem>>, vector<1x8x32xbf16>
    %27 = vector.shape_cast %26 : vector<1x8x32xbf16> to vector<8x32xbf16>
    %cst_21 = arith.constant dense<0.000000e+00> : vector<5x32xf32>
    %28 = tpu.matmul %25, %27, %cst_21 {dimension_numbers = #tpu.dot_dimension_numbers<[1], [0], [0], [1], [0, 0, 1, 1], [], []>} : vector<5x8xbf16>, vector<8x32xbf16>, vector<5x32xf32> -> vector<5x32xf32>
    %29 = arith.addf %24, %28 : vector<5x32xf32>
    %c0_22 = arith.constant 0 : index
    %c0_23 = arith.constant 0 : index
    %30 = vector.load %arg8[%c0_22, %c0_23] : memref<5x32xf32, #tpu.memory_space<vmem>>, vector<5x32xf32>
    tpu.vector_store %arg8[%c0_22, %c0_23], %29 {strides = array<i32>} : memref<5x32xf32, #tpu.memory_space<vmem>>, vector<5x32xf32>,
    %c3_i32 = arith.constant 3 : i32
    %31 = arith.cmpi eq, %arg1, %c3_i32 : i32
    %32 = arith.extui %31 : i1 to i32
    %c0_i32_24 = arith.constant 0 : i32
    %33 = arith.cmpi ne, %32, %c0_i32_24 : i32
    scf.if %33 {
      %c0_25 = arith.constant 0 : index
      %c0_26 = arith.constant 0 : index
      %34 = vector.load %arg8[%c0_25, %c0_26] : memref<5x32xf32, #tpu.memory_space<vmem>>, vector<5x32xf32>
      %c0_27 = arith.constant 0 : index
      %c0_28 = arith.constant 0 : index
      %35 = vector.load %arg6[%c0_27, %c0_28] : memref<1x32xf32, #tpu.memory_space<vmem>>, vector<1x32xf32>
      %36 = vector.broadcast %35 : vector<1x32xf32> to vector<5x32xf32>
      %37 = arith.addf %34, %36 : vector<5x32xf32>
      %38 = vector.shape_cast %37 : vector<5x32xf32> to vector<1x5x32xf32>
      %39 = arith.truncf %38 : vector<1x5x32xf32> to vector<1x5x32xbf16>
      %c0_29 = arith.constant 0 : index
      %c0_30 = arith.constant 0 : index
      %c0_31 = arith.constant 0 : index
      %40 = vector.load %arg7[%c0_29, %c0_30, %c0_31] : memref<1x5x32xbf16, #tpu.memory_space<vmem>>, vector<1x5x32xbf16>
      tpu.vector_store %arg7[%c0_29, %c0_30, %c0_31], %39 {strides = array<i32>} : memref<1x5x32xbf16, #tpu.memory_space<vmem>>, vector<1x5x32xbf16>,
    } else {
    }
    return
  }
  func.func @transform_0(%arg0: i32, %arg1: i32) -> (i32, i32, i32, i32) {
    %c0_i32 = arith.constant 0 : i32
    %c0_i32_0 = arith.constant 0 : i32
    %c0_i32_1 = arith.constant 0 : i32
    return %arg0, %arg1, %c0_i32, %c0_i32_0 : i32, i32, i32, i32
  }
  func.func @transform_1(%arg0: i32, %arg1: i32) -> (i32, i32, i32, i32) {
    %c4_i32 = arith.constant 4 : i32
    %0 = arith.addi %c4_i32, %arg1 : i32
    %c0_i32 = arith.constant 0 : i32
    %c0_i32_0 = arith.constant 0 : i32
    %c0_i32_1 = arith.constant 0 : i32
    return %arg0, %0, %c0_i32, %c0_i32_0 : i32, i32, i32, i32
  }
  func.func @transform_2(%arg0: i32, %arg1: i32) -> (i32, i32, i32, i32) {
    %c8_i32 = arith.constant 8 : i32
    %0 = arith.addi %c8_i32, %arg1 : i32
    %c0_i32 = arith.constant 0 : i32
    %c0_i32_0 = arith.constant 0 : i32
    %c0_i32_1 = arith.constant 0 : i32
    return %arg0, %0, %c0_i32, %c0_i32_0 : i32, i32, i32, i32
  }
  func.func @transform_3(%arg0: i32, %arg1: i32) -> (i32, i32, i32) {
    %c0_i32 = arith.constant 0 : i32
    %c0_i32_0 = arith.constant 0 : i32
    %c0_i32_1 = arith.constant 0 : i32
    return %arg1, %c0_i32, %c0_i32_0 : i32, i32, i32
  }
  func.func @transform_4(%arg0: i32, %arg1: i32) -> (i32, i32) {
    %c0_i32 = arith.constant 0 : i32
    %c0_i32_0 = arith.constant 0 : i32
    %c0_i32_1 = arith.constant 0 : i32
    return %c0_i32, %c0_i32_0 : i32, i32
  }
  func.func @transform_5(%arg0: i32, %arg1: i32) -> (i32, i32, i32) {
    %c0_i32 = arith.constant 0 : i32
    %c0_i32_0 = arith.constant 0 : i32
    %c0_i32_1 = arith.constant 0 : i32
    return %arg0, %c0_i32, %c0_i32_0 : i32, i32, i32
  }
}

module attributes {stable_mosaic.version = 11 : i64} {
  func.func @_matmul_kernel(%arg0: i32, %arg1: i32, %arg2: i32, %arg3: memref<16x128xf32, #tpu.memory_space<vmem>>, %arg4: memref<128x128xbf16, #tpu.memory_space<vmem>>, %arg5: memref<1x128xf32, #tpu.memory_space<vmem>>, %arg6: memref<16x128xbf16, #tpu.memory_space<vmem>>, %arg7: memref<16x128xf32, #tpu.memory_space<vmem>>) attributes {dimension_semantics = [#tpu.dimension_semantics<parallel>, #tpu.dimension_semantics<parallel>, #tpu.dimension_semantics<arbitrary>], iteration_bounds = array<i64: 1, 1, 1>, scalar_prefetch = 0 : i64, scratch_operands = 1 : i64, tpu.core_type = #tpu.core_type<tc>, window_params = [{transform_indices = @transform_0, window_bounds = array<i64: 16, 128>}, {transform_indices = @transform_1, window_bounds = array<i64: 128, 128>}, {transform_indices = @transform_2, window_bounds = array<i64: 1, 128>}, {transform_indices = @transform_3, window_bounds = array<i64: 16, 128>}]} {
    %c0_i32 = arith.constant 0 : i32
    %0 = arith.cmpi eq, %arg2, %c0_i32 : i32
    %1 = arith.extui %0 : i1 to i32
    %c0_i32_0 = arith.constant 0 : i32
    %2 = arith.cmpi ne, %1, %c0_i32_0 : i32
    scf.if %2 {
      %cst_10 = arith.constant 0.000000e+00 : f32
      %13 = vector.broadcast %cst_10 : f32 to vector<16x128xf32>
      %c0_11 = arith.constant 0 : index
      %c0_12 = arith.constant 0 : index
      %14 = vector.load %arg7[%c0_11, %c0_12] : memref<16x128xf32, #tpu.memory_space<vmem>>, vector<16x128xf32>
      tpu.vector_store %arg7[%c0_11, %c0_12], %13 {strides = array<i32>} : memref<16x128xf32, #tpu.memory_space<vmem>>, vector<16x128xf32>,
    } else {
    }
    %c0 = arith.constant 0 : index
    %c0_1 = arith.constant 0 : index
    %3 = vector.load %arg7[%c0, %c0_1] : memref<16x128xf32, #tpu.memory_space<vmem>>, vector<16x128xf32>
    %c0_2 = arith.constant 0 : index
    %c0_3 = arith.constant 0 : index
    %4 = vector.load %arg3[%c0_2, %c0_3] : memref<16x128xf32, #tpu.memory_space<vmem>>, vector<16x128xf32>
    %5 = arith.truncf %4 : vector<16x128xf32> to vector<16x128xbf16>
    %c0_4 = arith.constant 0 : index
    %c0_5 = arith.constant 0 : index
    %6 = vector.load %arg4[%c0_4, %c0_5] : memref<128x128xbf16, #tpu.memory_space<vmem>>, vector<128x128xbf16>
    %cst = arith.constant dense<0.000000e+00> : vector<16x128xf32>
    %7 = tpu.matmul %5, %6, %cst {dimension_numbers = #tpu.dot_dimension_numbers<[1], [0], [0], [1], [0, 0, 1, 1], [], []>} : vector<16x128xbf16>, vector<128x128xbf16>, vector<16x128xf32> -> vector<16x128xf32>
    %8 = arith.addf %3, %7 : vector<16x128xf32>
    %c0_6 = arith.constant 0 : index
    %c0_7 = arith.constant 0 : index
    %9 = vector.load %arg7[%c0_6, %c0_7] : memref<16x128xf32, #tpu.memory_space<vmem>>, vector<16x128xf32>
    tpu.vector_store %arg7[%c0_6, %c0_7], %8 {strides = array<i32>} : memref<16x128xf32, #tpu.memory_space<vmem>>, vector<16x128xf32>,
    %c0_i32_8 = arith.constant 0 : i32
    %10 = arith.cmpi eq, %arg2, %c0_i32_8 : i32
    %11 = arith.extui %10 : i1 to i32
    %c0_i32_9 = arith.constant 0 : i32
    %12 = arith.cmpi ne, %11, %c0_i32_9 : i32
    scf.if %12 {
      %c0_10 = arith.constant 0 : index
      %c0_11 = arith.constant 0 : index
      %13 = vector.load %arg7[%c0_10, %c0_11] : memref<16x128xf32, #tpu.memory_space<vmem>>, vector<16x128xf32>
      %c0_12 = arith.constant 0 : index
      %c0_13 = arith.constant 0 : index
      %14 = vector.load %arg5[%c0_12, %c0_13] : memref<1x128xf32, #tpu.memory_space<vmem>>, vector<1x128xf32>
      %15 = vector.broadcast %14 : vector<1x128xf32> to vector<16x128xf32>
      %16 = arith.addf %13, %15 : vector<16x128xf32>
      %17 = arith.truncf %16 : vector<16x128xf32> to vector<16x128xbf16>
      %c0_14 = arith.constant 0 : index
      %c0_15 = arith.constant 0 : index
      %18 = vector.load %arg6[%c0_14, %c0_15] : memref<16x128xbf16, #tpu.memory_space<vmem>>, vector<16x128xbf16>
      tpu.vector_store %arg6[%c0_14, %c0_15], %17 {strides = array<i32>} : memref<16x128xbf16, #tpu.memory_space<vmem>>, vector<16x128xbf16>,
    } else {
    }
    return
  }
  func.func @transform_0(%arg0: i32, %arg1: i32, %arg2: i32) -> (i32, i32) {
    %c0_i32 = arith.constant 0 : i32
    return %arg0, %arg2 : i32, i32
  }
  func.func @transform_1(%arg0: i32, %arg1: i32, %arg2: i32) -> (i32, i32) {
    %c0_i32 = arith.constant 0 : i32
    return %arg2, %arg1 : i32, i32
  }
  func.func @transform_2(%arg0: i32, %arg1: i32, %arg2: i32) -> (i32, i32) {
    %c0_i32 = arith.constant 0 : i32
    %c0_i32_0 = arith.constant 0 : i32
    return %c0_i32, %arg1 : i32, i32
  }
  func.func @transform_3(%arg0: i32, %arg1: i32, %arg2: i32) -> (i32, i32) {
    %c0_i32 = arith.constant 0 : i32
    return %arg0, %arg1 : i32, i32
  }
}

module attributes {stable_mosaic.version = 11 : i64} {
  func.func @_l2norm_kernel(%arg0: i32, %arg1: memref<2x32xbf16, #tpu.memory_space<vmem>>, %arg2: memref<2x32xf32, #tpu.memory_space<vmem>>) attributes {dimension_semantics = [#tpu.dimension_semantics<arbitrary>], iteration_bounds = array<i64: 1>, scalar_prefetch = 0 : i64, scratch_operands = 0 : i64, tpu.core_type = #tpu.core_type<tc>, window_params = [{pipeline_mode = #tpu.pipeline_mode<synchronous>, transform_indices = @transform_0, window_bounds = array<i64: 2, 32>}, {pipeline_mode = #tpu.pipeline_mode<synchronous>, transform_indices = @transform_1, window_bounds = array<i64: 2, 32>}]} {
    %c0 = arith.constant 0 : index
    %c0_0 = arith.constant 0 : index
    %0 = vector.load %arg1[%c0, %c0_0] : memref<2x32xbf16, #tpu.memory_space<vmem>>, vector<2x32xbf16>
    %1 = arith.extf %0 : vector<2x32xbf16> to vector<2x32xf32>
    %2 = arith.mulf %1, %1 : vector<2x32xf32>
    %cst = arith.constant dense<0.000000e+00> : vector<2xf32>
    %3 = vector.multi_reduction <add>, %2, %cst [1] : vector<2x32xf32> to vector<2xf32>
    %4 = vector.shape_cast %3 : vector<2xf32> to vector<2x1xf32>
    %cst_1 = arith.constant 1.000000e-24 : f32
    %5 = vector.broadcast %cst_1 : f32 to vector<2x1xf32>
    %6 = arith.maximumf %4, %5 : vector<2x1xf32>
    %7 = math.rsqrt %6 : vector<2x1xf32>
    %8 = vector.broadcast %7 : vector<2x1xf32> to vector<2x32xf32>
    %9 = arith.mulf %1, %8 : vector<2x32xf32>
    %c0_2 = arith.constant 0 : index
    %c0_3 = arith.constant 0 : index
    %10 = vector.load %arg2[%c0_2, %c0_3] : memref<2x32xf32, #tpu.memory_space<vmem>>, vector<2x32xf32>
    tpu.vector_store %arg2[%c0_2, %c0_3], %9 {strides = array<i32>} : memref<2x32xf32, #tpu.memory_space<vmem>>, vector<2x32xf32>,
    return
  }
  func.func @transform_0(%arg0: i32) -> (i32, i32) {
    %c0_i32 = arith.constant 0 : i32
    %c0_i32_0 = arith.constant 0 : i32
    %c0_i32_1 = arith.constant 0 : i32
    return %c0_i32, %c0_i32_0 : i32, i32
  }
  func.func @transform_1(%arg0: i32) -> (i32, i32) {
    %c0_i32 = arith.constant 0 : i32
    %c0_i32_0 = arith.constant 0 : i32
    %c0_i32_1 = arith.constant 0 : i32
    return %c0_i32, %c0_i32_0 : i32, i32
  }
}

module attributes {stable_mosaic.version = 11 : i64} {
  func.func @_ln_matmul_kernel(%arg0: i32, %arg1: i32, %arg2: memref<16x64xf32, #tpu.memory_space<vmem>>, %arg3: memref<1x64xf32, #tpu.memory_space<vmem>>, %arg4: memref<1x64xf32, #tpu.memory_space<vmem>>, %arg5: memref<64x128xbf16, #tpu.memory_space<vmem>>, %arg6: memref<16x128xbf16, #tpu.memory_space<vmem>>, %arg7: memref<16x64xbf16, #tpu.memory_space<vmem>>) attributes {dimension_semantics = [#tpu.dimension_semantics<parallel>, #tpu.dimension_semantics<arbitrary>], iteration_bounds = array<i64: 1, 1>, scalar_prefetch = 0 : i64, scratch_operands = 1 : i64, tpu.core_type = #tpu.core_type<tc>, window_params = [{transform_indices = @transform_0, window_bounds = array<i64: 16, 64>}, {pipeline_mode = #tpu.pipeline_mode<synchronous>, transform_indices = @transform_1, window_bounds = array<i64: 1, 64>}, {pipeline_mode = #tpu.pipeline_mode<synchronous>, transform_indices = @transform_2, window_bounds = array<i64: 1, 64>}, {transform_indices = @transform_3, window_bounds = array<i64: 64, 128>}, {transform_indices = @transform_4, window_bounds = array<i64: 16, 128>}]} {
    %c0_i32 = arith.constant 0 : i32
    %0 = arith.cmpi eq, %arg1, %c0_i32 : i32
    %1 = arith.extui %0 : i1 to i32
    %c0_i32_0 = arith.constant 0 : i32
    %2 = arith.cmpi ne, %1, %c0_i32_0 : i32
    scf.if %2 {
      %c0_6 = arith.constant 0 : index
      %c0_7 = arith.constant 0 : index
      %8 = vector.load %arg2[%c0_6, %c0_7] : memref<16x64xf32, #tpu.memory_space<vmem>>, vector<16x64xf32>
      %cst_8 = arith.constant dense<0.000000e+00> : vector<16xf32>
      %9 = vector.multi_reduction <add>, %8, %cst_8 [1] : vector<16x64xf32> to vector<16xf32>
      %10 = vector.shape_cast %9 : vector<16xf32> to vector<16x1xf32>
      %cst_9 = arith.constant 6.400000e+01 : f32
      %11 = vector.broadcast %cst_9 : f32 to vector<16x1xf32>
      %12 = arith.divf %10, %11 : vector<16x1xf32>
      %13 = vector.broadcast %12 : vector<16x1xf32> to vector<16x64xf32>
      %14 = arith.subf %8, %13 : vector<16x64xf32>
      %15 = arith.mulf %14, %14 : vector<16x64xf32>
      %cst_10 = arith.constant dense<0.000000e+00> : vector<16xf32>
      %16 = vector.multi_reduction <add>, %15, %cst_10 [1] : vector<16x64xf32> to vector<16xf32>
      %17 = vector.shape_cast %16 : vector<16xf32> to vector<16x1xf32>
      %cst_11 = arith.constant 6.400000e+01 : f32
      %18 = vector.broadcast %cst_11 : f32 to vector<16x1xf32>
      %19 = arith.divf %17, %18 : vector<16x1xf32>
      %cst_12 = arith.constant 9.99999974E-6 : f32
      %20 = vector.broadcast %cst_12 : f32 to vector<16x1xf32>
      %21 = arith.addf %19, %20 : vector<16x1xf32>
      %22 = math.rsqrt %21 : vector<16x1xf32>
      %23 = vector.broadcast %22 : vector<16x1xf32> to vector<16x64xf32>
      %24 = arith.mulf %14, %23 : vector<16x64xf32>
      %c0_13 = arith.constant 0 : index
      %c0_14 = arith.constant 0 : index
      %25 = vector.load %arg3[%c0_13, %c0_14] : memref<1x64xf32, #tpu.memory_space<vmem>>, vector<1x64xf32>
      %26 = vector.broadcast %25 : vector<1x64xf32> to vector<16x64xf32>
      %27 = arith.mulf %24, %26 : vector<16x64xf32>
      %c0_15 = arith.constant 0 : index
      %c0_16 = arith.constant 0 : index
      %28 = vector.load %arg4[%c0_15, %c0_16] : memref<1x64xf32, #tpu.memory_space<vmem>>, vector<1x64xf32>
      %29 = vector.broadcast %28 : vector<1x64xf32> to vector<16x64xf32>
      %30 = arith.addf %27, %29 : vector<16x64xf32>
      %31 = arith.truncf %30 : vector<16x64xf32> to vector<16x64xbf16>
      %c0_17 = arith.constant 0 : index
      %c0_18 = arith.constant 0 : index
      %32 = vector.load %arg7[%c0_17, %c0_18] : memref<16x64xbf16, #tpu.memory_space<vmem>>, vector<16x64xbf16>
      tpu.vector_store %arg7[%c0_17, %c0_18], %31 {strides = array<i32>} : memref<16x64xbf16, #tpu.memory_space<vmem>>, vector<16x64xbf16>,
    } else {
    }
    %c0 = arith.constant 0 : index
    %c0_1 = arith.constant 0 : index
    %3 = vector.load %arg7[%c0, %c0_1] : memref<16x64xbf16, #tpu.memory_space<vmem>>, vector<16x64xbf16>
    %c0_2 = arith.constant 0 : index
    %c0_3 = arith.constant 0 : index
    %4 = vector.load %arg5[%c0_2, %c0_3] : memref<64x128xbf16, #tpu.memory_space<vmem>>, vector<64x128xbf16>
    %cst = arith.constant dense<0.000000e+00> : vector<16x128xf32>
    %5 = tpu.matmul %3, %4, %cst {dimension_numbers = #tpu.dot_dimension_numbers<[1], [0], [0], [1], [0, 0, 1, 1], [], []>} : vector<16x64xbf16>, vector<64x128xbf16>, vector<16x128xf32> -> vector<16x128xf32>
    %6 = arith.truncf %5 : vector<16x128xf32> to vector<16x128xbf16>
    %c0_4 = arith.constant 0 : index
    %c0_5 = arith.constant 0 : index
    %7 = vector.load %arg6[%c0_4, %c0_5] : memref<16x128xbf16, #tpu.memory_space<vmem>>, vector<16x128xbf16>
    tpu.vector_store %arg6[%c0_4, %c0_5], %6 {strides = array<i32>} : memref<16x128xbf16, #tpu.memory_space<vmem>>, vector<16x128xbf16>,
    return
  }
  func.func @transform_0(%arg0: i32, %arg1: i32) -> (i32, i32) {
    %c0_i32 = arith.constant 0 : i32
    %c0_i32_0 = arith.constant 0 : i32
    return %arg0, %c0_i32 : i32, i32
  }
  func.func @transform_1(%arg0: i32, %arg1: i32) -> (i32, i32) {
    %c0_i32 = arith.constant 0 : i32
    %c0_i32_0 = arith.constant 0 : i32
    %c0_i32_1 = arith.constant 0 : i32
    return %c0_i32, %c0_i32_0 : i32, i32
  }
  func.func @transform_2(%arg0: i32, %arg1: i32) -> (i32, i32) {
    %c0_i32 = arith.constant 0 : i32
    %c0_i32_0 = arith.constant 0 : i32
    %c0_i32_1 = arith.constant 0 : i32
    return %c0_i32, %c0_i32_0 : i32, i32
  }
  func.func @transform_3(%arg0: i32, %arg1: i32) -> (i32, i32) {
    %c0_i32 = arith.constant 0 : i32
    %c0_i32_0 = arith.constant 0 : i32
    return %c0_i32, %arg1 : i32, i32
  }
  func.func @transform_4(%arg0: i32, %arg1: i32) -> (i32, i32) {
    %c0_i32 = arith.constant 0 : i32
    return %arg0, %arg1 : i32, i32
  }
}

module attributes {stable_mosaic.version = 11 : i64} {
  func.func @_mha_kernel(%arg0: i32, %arg1: i32, %arg2: memref<1x1x8x16xbf16, #tpu.memory_space<vmem>>, %arg3: memref<1x1x8x16xbf16, #tpu.memory_space<vmem>>, %arg4: memref<1x1x8x16xbf16, #tpu.memory_space<vmem>>, %arg5: memref<1x16x64xbf16, #tpu.memory_space<vmem>>, %arg6: memref<1x64xf32, #tpu.memory_space<vmem>>, %arg7: memref<8x8xf32, #tpu.memory_space<vmem>>, %arg8: memref<1x8x64xbf16, #tpu.memory_space<vmem>>, %arg9: memref<8x64xf32, #tpu.memory_space<vmem>>) attributes {dimension_semantics = [#tpu.dimension_semantics<parallel>, #tpu.dimension_semantics<arbitrary>], iteration_bounds = array<i64: 2, 4>, scalar_prefetch = 0 : i64, scratch_operands = 1 : i64, tpu.core_type = #tpu.core_type<tc>, window_params = [{transform_indices = @transform_0, window_bounds = array<i64: 1, 1, 8, 16>}, {transform_indices = @transform_1, window_bounds = array<i64: 1, 1, 8, 16>}, {transform_indices = @transform_2, window_bounds = array<i64: 1, 1, 8, 16>}, {transform_indices = @transform_3, window_bounds = array<i64: 1, 16, 64>}, {pipeline_mode = #tpu.pipeline_mode<synchronous>, transform_indices = @transform_4, window_bounds = array<i64: 1, 64>}, {pipeline_mode = #tpu.pipeline_mode<synchronous>, transform_indices = @transform_5, window_bounds = array<i64: 8, 8>}, {transform_indices = @transform_6, window_bounds = array<i64: 1, 8, 64>}]} {
    %c0_i32 = arith.constant 0 : i32
    %0 = arith.cmpi eq, %arg1, %c0_i32 : i32
    %1 = arith.extui %0 : i1 to i32
    %c0_i32_0 = arith.constant 0 : i32
    %2 = arith.cmpi ne, %1, %c0_i32_0 : i32
    scf.if %2 {
      %cst_27 = arith.constant 0.000000e+00 : f32
      %36 = vector.broadcast %cst_27 : f32 to vector<8x64xf32>
      %c0_28 = arith.constant 0 : index
      %c0_29 = arith.constant 0 : index
      %37 = vector.load %arg9[%c0_28, %c0_29] : memref<8x64xf32, #tpu.memory_space<vmem>>, vector<8x64xf32>
      tpu.vector_store %arg9[%c0_28, %c0_29], %36 {strides = array<i32>} : memref<8x64xf32, #tpu.memory_space<vmem>>, vector<8x64xf32>,
    } else {
    }
    %c0 = arith.constant 0 : index
    %c0_1 = arith.constant 0 : index
    %c0_2 = arith.constant 0 : index
    %c0_3 = arith.constant 0 : index
    %3 = vector.load %arg2[%c0, %c0_1, %c0_2, %c0_3] : memref<1x1x8x16xbf16, #tpu.memory_space<vmem>>, vector<1x1x8x16xbf16>
    %4 = vector.shape_cast %3 : vector<1x1x8x16xbf16> to vector<8x16xbf16>
    %c0_4 = arith.constant 0 : index
    %c0_5 = arith.constant 0 : index
    %c0_6 = arith.constant 0 : index
    %c0_7 = arith.constant 0 : index
    %5 = vector.load %arg3[%c0_4, %c0_5, %c0_6, %c0_7] : memref<1x1x8x16xbf16, #tpu.memory_space<vmem>>, vector<1x1x8x16xbf16>
    %6 = vector.shape_cast %5 : vector<1x1x8x16xbf16> to vector<8x16xbf16>
    %c0_8 = arith.constant 0 : index
    %c0_9 = arith.constant 0 : index
    %c0_10 = arith.constant 0 : index
    %c0_11 = arith.constant 0 : index
    %7 = vector.load %arg4[%c0_8, %c0_9, %c0_10, %c0_11] : memref<1x1x8x16xbf16, #tpu.memory_space<vmem>>, vector<1x1x8x16xbf16>
    %8 = vector.shape_cast %7 : vector<1x1x8x16xbf16> to vector<8x16xbf16>
    %cst = arith.constant dense<0.000000e+00> : vector<8x8xf32>
    %9 = tpu.matmul %4, %6, %cst {dimension_numbers = #tpu.dot_dimension_numbers<[1], [1], [0], [0], [0, 0, 1, 0], [], []>} : vector<8x16xbf16>, vector<8x16xbf16>, vector<8x8xf32> -> vector<8x8xf32>
    %cst_12 = arith.constant 2.500000e-01 : f32
    %10 = vector.broadcast %cst_12 : f32 to vector<8x8xf32>
    %11 = arith.mulf %9, %10 : vector<8x8xf32>
    %c0_13 = arith.constant 0 : index
    %c0_14 = arith.constant 0 : index
    %12 = vector.load %arg7[%c0_13, %c0_14] : memref<8x8xf32, #tpu.memory_space<vmem>>, vector<8x8xf32>
    %13 = arith.addf %11, %12 : vector<8x8xf32>
    %cst_15 = arith.constant dense<0xFF800000> : vector<8xf32>
    %14 = vector.multi_reduction <maximumf>, %13, %cst_15 [1] : vector<8x8xf32> to vector<8xf32>
    %15 = vector.shape_cast %14 : vector<8xf32> to vector<8x1xf32>
    %16 = vector.broadcast %15 : vector<8x1xf32> to vector<8x8xf32>
    %17 = arith.subf %13, %16 : vector<8x8xf32>
    %18 = math.exp %17 : vector<8x8xf32>
    %cst_16 = arith.constant dense<0.000000e+00> : vector<8xf32>
    %19 = vector.multi_reduction <add>, %18, %cst_16 [1] : vector<8x8xf32> to vector<8xf32>
    %20 = vector.shape_cast %19 : vector<8xf32> to vector<8x1xf32>
    %21 = tpu.reciprocal %20 {approx = true} : vector<8x1xf32> -> vector<8x1xf32>
    %22 = vector.broadcast %21 : vector<8x1xf32> to vector<8x8xf32>
    %23 = arith.mulf %18, %22 : vector<8x8xf32>
    %24 = arith.truncf %23 : vector<8x8xf32> to vector<8x8xbf16>
    %cst_17 = arith.constant dense<0.000000e+00> : vector<8x16xf32>
    %25 = tpu.matmul %24, %8, %cst_17 {dimension_numbers = #tpu.dot_dimension_numbers<[1], [0], [0], [1], [0, 0, 1, 1], [], []>} : vector<8x8xbf16>, vector<8x16xbf16>, vector<8x16xf32> -> vector<8x16xf32>
    %c0_18 = arith.constant 0 : index
    %c0_19 = arith.constant 0 : index
    %26 = vector.load %arg9[%c0_18, %c0_19] : memref<8x64xf32, #tpu.memory_space<vmem>>, vector<8x64xf32>
    %27 = arith.truncf %25 : vector<8x16xf32> to vector<8x16xbf16>
    %c0_20 = arith.constant 0 : index
    %c0_21 = arith.constant 0 : index
    %c0_22 = arith.constant 0 : index
    %28 = vector.load %arg5[%c0_20, %c0_21, %c0_22] : memref<1x16x64xbf16, #tpu.memory_space<vmem>>, vector<1x16x64xbf16>
    %29 = vector.shape_cast %28 : vector<1x16x64xbf16> to vector<16x64xbf16>
    %cst_23 = arith.constant dense<0.000000e+00> : vector<8x64xf32>
    %30 = tpu.matmul %27, %29, %cst_23 {dimension_numbers = #tpu.dot_dimension_numbers<[1], [0], [0], [1], [0, 0, 1, 1], [], []>} : vector<8x16xbf16>, vector<16x64xbf16>, vector<8x64xf32> -> vector<8x64xf32>
    %31 = arith.addf %26, %30 : vector<8x64xf32>
    %c0_24 = arith.constant 0 : index
    %c0_25 = arith.constant 0 : index
    %32 = vector.load %arg9[%c0_24, %c0_25] : memref<8x64xf32, #tpu.memory_space<vmem>>, vector<8x64xf32>
    tpu.vector_store %arg9[%c0_24, %c0_25], %31 {strides = array<i32>} : memref<8x64xf32, #tpu.memory_space<vmem>>, vector<8x64xf32>,
    %c3_i32 = arith.constant 3 : i32
    %33 = arith.cmpi eq, %arg1, %c3_i32 : i32
    %34 = arith.extui %33 : i1 to i32
    %c0_i32_26 = arith.constant 0 : i32
    %35 = arith.cmpi ne, %34, %c0_i32_26 : i32
    scf.if %35 {
      %c0_27 = arith.constant 0 : index
      %c0_28 = arith.constant 0 : index
      %36 = vector.load %arg9[%c0_27, %c0_28] : memref<8x64xf32, #tpu.memory_space<vmem>>, vector<8x64xf32>
      %c0_29 = arith.constant 0 : index
      %c0_30 = arith.constant 0 : index
      %37 = vector.load %arg6[%c0_29, %c0_30] : memref<1x64xf32, #tpu.memory_space<vmem>>, vector<1x64xf32>
      %38 = vector.broadcast %37 : vector<1x64xf32> to vector<8x64xf32>
      %39 = arith.addf %36, %38 : vector<8x64xf32>
      %40 = vector.shape_cast %39 : vector<8x64xf32> to vector<1x8x64xf32>
      %41 = arith.truncf %40 : vector<1x8x64xf32> to vector<1x8x64xbf16>
      %c0_31 = arith.constant 0 : index
      %c0_32 = arith.constant 0 : index
      %c0_33 = arith.constant 0 : index
      %42 = vector.load %arg8[%c0_31, %c0_32, %c0_33] : memref<1x8x64xbf16, #tpu.memory_space<vmem>>, vector<1x8x64xbf16>
      tpu.vector_store %arg8[%c0_31, %c0_32, %c0_33], %41 {strides = array<i32>} : memref<1x8x64xbf16, #tpu.memory_space<vmem>>, vector<1x8x64xbf16>,
    } else {
    }
    return
  }
  func.func @transform_0(%arg0: i32, %arg1: i32) -> (i32, i32, i32, i32) {
    %c0_i32 = arith.constant 0 : i32
    %c0_i32_0 = arith.constant 0 : i32
    %c0_i32_1 = arith.constant 0 : i32
    return %arg0, %arg1, %c0_i32, %c0_i32_0 : i32, i32, i32, i32
  }
  func.func @transform_1(%arg0: i32, %arg1: i32) -> (i32, i32, i32, i32) {
    %c4_i32 = arith.constant 4 : i32
    %0 = arith.addi %c4_i32, %arg1 : i32
    %c0_i32 = arith.constant 0 : i32
    %c0_i32_0 = arith.constant 0 : i32
    %c0_i32_1 = arith.constant 0 : i32
    return %arg0, %0, %c0_i32, %c0_i32_0 : i32, i32, i32, i32
  }
  func.func @transform_2(%arg0: i32, %arg1: i32) -> (i32, i32, i32, i32) {
    %c8_i32 = arith.constant 8 : i32
    %0 = arith.addi %c8_i32, %arg1 : i32
    %c0_i32 = arith.constant 0 : i32
    %c0_i32_0 = arith.constant 0 : i32
    %c0_i32_1 = arith.constant 0 : i32
    return %arg0, %0, %c0_i32, %c0_i32_0 : i32, i32, i32, i32
  }
  func.func @transform_3(%arg0: i32, %arg1: i32) -> (i32, i32, i32) {
    %c0_i32 = arith.constant 0 : i32
    %c0_i32_0 = arith.constant 0 : i32
    %c0_i32_1 = arith.constant 0 : i32
    return %arg1, %c0_i32, %c0_i32_0 : i32, i32, i32
  }
  func.func @transform_4(%arg0: i32, %arg1: i32) -> (i32, i32) {
    %c0_i32 = arith.constant 0 : i32
    %c0_i32_0 = arith.constant 0 : i32
    %c0_i32_1 = arith.constant 0 : i32
    return %c0_i32, %c0_i32_0 : i32, i32
  }
  func.func @transform_5(%arg0: i32, %arg1: i32) -> (i32, i32) {
    %c0_i32 = arith.constant 0 : i32
    %c0_i32_0 = arith.constant 0 : i32
    %c0_i32_1 = arith.constant 0 : i32
    return %c0_i32, %c0_i32_0 : i32, i32
  }
  func.func @transform_6(%arg0: i32, %arg1: i32) -> (i32, i32, i32) {
    %c0_i32 = arith.constant 0 : i32
    %c0_i32_0 = arith.constant 0 : i32
    %c0_i32_1 = arith.constant 0 : i32
    return %arg0, %c0_i32, %c0_i32_0 : i32, i32, i32
  }
}

module attributes {stable_mosaic.version = 11 : i64} {
  func.func @_mha_kernel(%arg0: i32, %arg1: i32, %arg2: memref<1x1x8x8xbf16, #tpu.memory_space<vmem>>, %arg3: memref<1x1x8x8xbf16, #tpu.memory_space<vmem>>, %arg4: memref<1x1x8x8xbf16, #tpu.memory_space<vmem>>, %arg5: memref<1x8x32xbf16, #tpu.memory_space<vmem>>, %arg6: memref<1x32xf32, #tpu.memory_space<vmem>>, %arg7: memref<1x8x32xbf16, #tpu.memory_space<vmem>>, %arg8: memref<8x32xf32, #tpu.memory_space<vmem>>) attributes {dimension_semantics = [#tpu.dimension_semantics<parallel>, #tpu.dimension_semantics<arbitrary>], iteration_bounds = array<i64: 2, 4>, scalar_prefetch = 0 : i64, scratch_operands = 1 : i64, tpu.core_type = #tpu.core_type<tc>, window_params = [{transform_indices = @transform_0, window_bounds = array<i64: 1, 1, 8, 8>}, {transform_indices = @transform_1, window_bounds = array<i64: 1, 1, 8, 8>}, {transform_indices = @transform_2, window_bounds = array<i64: 1, 1, 8, 8>}, {transform_indices = @transform_3, window_bounds = array<i64: 1, 8, 32>}, {pipeline_mode = #tpu.pipeline_mode<synchronous>, transform_indices = @transform_4, window_bounds = array<i64: 1, 32>}, {transform_indices = @transform_5, window_bounds = array<i64: 1, 8, 32>}]} {
    %c0_i32 = arith.constant 0 : i32
    %0 = arith.cmpi eq, %arg1, %c0_i32 : i32
    %1 = arith.extui %0 : i1 to i32
    %c0_i32_0 = arith.constant 0 : i32
    %2 = arith.cmpi ne, %1, %c0_i32_0 : i32
    scf.if %2 {
      %cst_25 = arith.constant 0.000000e+00 : f32
      %34 = vector.broadcast %cst_25 : f32 to vector<8x32xf32>
      %c0_26 = arith.constant 0 : index
      %c0_27 = arith.constant 0 : index
      %35 = vector.load %arg8[%c0_26, %c0_27] : memref<8x32xf32, #tpu.memory_space<vmem>>, vector<8x32xf32>
      tpu.vector_store %arg8[%c0_26, %c0_27], %34 {strides = array<i32>} : memref<8x32xf32, #tpu.memory_space<vmem>>, vector<8x32xf32>,
    } else {
    }
    %c0 = arith.constant 0 : index
    %c0_1 = arith.constant 0 : index
    %c0_2 = arith.constant 0 : index
    %c0_3 = arith.constant 0 : index
    %3 = vector.load %arg2[%c0, %c0_1, %c0_2, %c0_3] : memref<1x1x8x8xbf16, #tpu.memory_space<vmem>>, vector<1x1x8x8xbf16>
    %4 = vector.shape_cast %3 : vector<1x1x8x8xbf16> to vector<8x8xbf16>
    %c0_4 = arith.constant 0 : index
    %c0_5 = arith.constant 0 : index
    %c0_6 = arith.constant 0 : index
    %c0_7 = arith.constant 0 : index
    %5 = vector.load %arg3[%c0_4, %c0_5, %c0_6, %c0_7] : memref<1x1x8x8xbf16, #tpu.memory_space<vmem>>, vector<1x1x8x8xbf16>
    %6 = vector.shape_cast %5 : vector<1x1x8x8xbf16> to vector<8x8xbf16>
    %c0_8 = arith.constant 0 : index
    %c0_9 = arith.constant 0 : index
    %c0_10 = arith.constant 0 : index
    %c0_11 = arith.constant 0 : index
    %7 = vector.load %arg4[%c0_8, %c0_9, %c0_10, %c0_11] : memref<1x1x8x8xbf16, #tpu.memory_space<vmem>>, vector<1x1x8x8xbf16>
    %8 = vector.shape_cast %7 : vector<1x1x8x8xbf16> to vector<8x8xbf16>
    %cst = arith.constant dense<0.000000e+00> : vector<8x8xf32>
    %9 = tpu.matmul %4, %6, %cst {dimension_numbers = #tpu.dot_dimension_numbers<[1], [1], [0], [0], [0, 0, 1, 0], [], []>} : vector<8x8xbf16>, vector<8x8xbf16>, vector<8x8xf32> -> vector<8x8xf32>
    %cst_12 = arith.constant 0.353553385 : f32
    %10 = vector.broadcast %cst_12 : f32 to vector<8x8xf32>
    %11 = arith.mulf %9, %10 : vector<8x8xf32>
    %cst_13 = arith.constant dense<0xFF800000> : vector<8xf32>
    %12 = vector.multi_reduction <maximumf>, %11, %cst_13 [1] : vector<8x8xf32> to vector<8xf32>
    %13 = vector.shape_cast %12 : vector<8xf32> to vector<8x1xf32>
    %14 = vector.broadcast %13 : vector<8x1xf32> to vector<8x8xf32>
    %15 = arith.subf %11, %14 : vector<8x8xf32>
    %16 = math.exp %15 : vector<8x8xf32>
    %cst_14 = arith.constant dense<0.000000e+00> : vector<8xf32>
    %17 = vector.multi_reduction <add>, %16, %cst_14 [1] : vector<8x8xf32> to vector<8xf32>
    %18 = vector.shape_cast %17 : vector<8xf32> to vector<8x1xf32>
    %19 = tpu.reciprocal %18 {approx = true} : vector<8x1xf32> -> vector<8x1xf32>
    %20 = vector.broadcast %19 : vector<8x1xf32> to vector<8x8xf32>
    %21 = arith.mulf %16, %20 : vector<8x8xf32>
    %22 = arith.truncf %21 : vector<8x8xf32> to vector<8x8xbf16>
    %cst_15 = arith.constant dense<0.000000e+00> : vector<8x8xf32>
    %23 = tpu.matmul %22, %8, %cst_15 {dimension_numbers = #tpu.dot_dimension_numbers<[1], [0], [0], [1], [0, 0, 1, 1], [], []>} : vector<8x8xbf16>, vector<8x8xbf16>, vector<8x8xf32> -> vector<8x8xf32>
    %c0_16 = arith.constant 0 : index
    %c0_17 = arith.constant 0 : index
    %24 = vector.load %arg8[%c0_16, %c0_17] : memref<8x32xf32, #tpu.memory_space<vmem>>, vector<8x32xf32>
    %25 = arith.truncf %23 : vector<8x8xf32> to vector<8x8xbf16>
    %c0_18 = arith.constant 0 : index
    %c0_19 = arith.constant 0 : index
    %c0_20 = arith.constant 0 : index
    %26 = vector.load %arg5[%c0_18, %c0_19, %c0_20] : memref<1x8x32xbf16, #tpu.memory_space<vmem>>, vector<1x8x32xbf16>
    %27 = vector.shape_cast %26 : vector<1x8x32xbf16> to vector<8x32xbf16>
    %cst_21 = arith.constant dense<0.000000e+00> : vector<8x32xf32>
    %28 = tpu.matmul %25, %27, %cst_21 {dimension_numbers = #tpu.dot_dimension_numbers<[1], [0], [0], [1], [0, 0, 1, 1], [], []>} : vector<8x8xbf16>, vector<8x32xbf16>, vector<8x32xf32> -> vector<8x32xf32>
    %29 = arith.addf %24, %28 : vector<8x32xf32>
    %c0_22 = arith.constant 0 : index
    %c0_23 = arith.constant 0 : index
    %30 = vector.load %arg8[%c0_22, %c0_23] : memref<8x32xf32, #tpu.memory_space<vmem>>, vector<8x32xf32>
    tpu.vector_store %arg8[%c0_22, %c0_23], %29 {strides = array<i32>} : memref<8x32xf32, #tpu.memory_space<vmem>>, vector<8x32xf32>,
    %c3_i32 = arith.constant 3 : i32
    %31 = arith.cmpi eq, %arg1, %c3_i32 : i32
    %32 = arith.extui %31 : i1 to i32
    %c0_i32_24 = arith.constant 0 : i32
    %33 = arith.cmpi ne, %32, %c0_i32_24 : i32
    scf.if %33 {
      %c0_25 = arith.constant 0 : index
      %c0_26 = arith.constant 0 : index
      %34 = vector.load %arg8[%c0_25, %c0_26] : memref<8x32xf32, #tpu.memory_space<vmem>>, vector<8x32xf32>
      %c0_27 = arith.constant 0 : index
      %c0_28 = arith.constant 0 : index
      %35 = vector.load %arg6[%c0_27, %c0_28] : memref<1x32xf32, #tpu.memory_space<vmem>>, vector<1x32xf32>
      %36 = vector.broadcast %35 : vector<1x32xf32> to vector<8x32xf32>
      %37 = arith.addf %34, %36 : vector<8x32xf32>
      %38 = vector.shape_cast %37 : vector<8x32xf32> to vector<1x8x32xf32>
      %39 = arith.truncf %38 : vector<1x8x32xf32> to vector<1x8x32xbf16>
      %c0_29 = arith.constant 0 : index
      %c0_30 = arith.constant 0 : index
      %c0_31 = arith.constant 0 : index
      %40 = vector.load %arg7[%c0_29, %c0_30, %c0_31] : memref<1x8x32xbf16, #tpu.memory_space<vmem>>, vector<1x8x32xbf16>
      tpu.vector_store %arg7[%c0_29, %c0_30, %c0_31], %39 {strides = array<i32>} : memref<1x8x32xbf16, #tpu.memory_space<vmem>>, vector<1x8x32xbf16>,
    } else {
    }
    return
  }
  func.func @transform_0(%arg0: i32, %arg1: i32) -> (i32, i32, i32, i32) {
    %c0_i32 = arith.constant 0 : i32
    %c0_i32_0 = arith.constant 0 : i32
    %c0_i32_1 = arith.constant 0 : i32
    return %arg0, %arg1, %c0_i32, %c0_i32_0 : i32, i32, i32, i32
  }
  func.func @transform_1(%arg0: i32, %arg1: i32) -> (i32, i32, i32, i32) {
    %c4_i32 = arith.constant 4 : i32
    %0 = arith.addi %c4_i32, %arg1 : i32
    %c0_i32 = arith.constant 0 : i32
    %c0_i32_0 = arith.constant 0 : i32
    %c0_i32_1 = arith.constant 0 : i32
    return %arg0, %0, %c0_i32, %c0_i32_0 : i32, i32, i32, i32
  }
  func.func @transform_2(%arg0: i32, %arg1: i32) -> (i32, i32, i32, i32) {
    %c8_i32 = arith.constant 8 : i32
    %0 = arith.addi %c8_i32, %arg1 : i32
    %c0_i32 = arith.constant 0 : i32
    %c0_i32_0 = arith.constant 0 : i32
    %c0_i32_1 = arith.constant 0 : i32
    return %arg0, %0, %c0_i32, %c0_i32_0 : i32, i32, i32, i32
  }
  func.func @transform_3(%arg0: i32, %arg1: i32) -> (i32, i32, i32) {
    %c0_i32 = arith.constant 0 : i32
    %c0_i32_0 = arith.constant 0 : i32
    %c0_i32_1 = arith.constant 0 : i32
    return %arg1, %c0_i32, %c0_i32_0 : i32, i32, i32
  }
  func.func @transform_4(%arg0: i32, %arg1: i32) -> (i32, i32) {
    %c0_i32 = arith.constant 0 : i32
    %c0_i32_0 = arith.constant 0 : i32
    %c0_i32_1 = arith.constant 0 : i32
    return %c0_i32, %c0_i32_0 : i32, i32
  }
  func.func @transform_5(%arg0: i32, %arg1: i32) -> (i32, i32, i32) {
    %c0_i32 = arith.constant 0 : i32
    %c0_i32_0 = arith.constant 0 : i32
    %c0_i32_1 = arith.constant 0 : i32
    return %arg0, %c0_i32, %c0_i32_0 : i32, i32, i32
  }
}

module attributes {stable_mosaic.version = 11 : i64} {
  func.func @_mha_kernel(%arg0: i32, %arg1: i32, %arg2: memref<1x1x8x8xbf16, #tpu.memory_space<vmem>>, %arg3: memref<1x1x8x8xbf16, #tpu.memory_space<vmem>>, %arg4: memref<1x1x8x8xbf16, #tpu.memory_space<vmem>>, %arg5: memref<1x8x16xbf16, #tpu.memory_space<vmem>>, %arg6: memref<1x16xf32, #tpu.memory_space<vmem>>, %arg7: memref<1x8x16xbf16, #tpu.memory_space<vmem>>, %arg8: memref<8x16xf32, #tpu.memory_space<vmem>>) attributes {dimension_semantics = [#tpu.dimension_semantics<parallel>, #tpu.dimension_semantics<arbitrary>], iteration_bounds = array<i64: 2, 2>, scalar_prefetch = 0 : i64, scratch_operands = 1 : i64, tpu.core_type = #tpu.core_type<tc>, window_params = [{transform_indices = @transform_0, window_bounds = array<i64: 1, 1, 8, 8>}, {transform_indices = @transform_1, window_bounds = array<i64: 1, 1, 8, 8>}, {transform_indices = @transform_2, window_bounds = array<i64: 1, 1, 8, 8>}, {transform_indices = @transform_3, window_bounds = array<i64: 1, 8, 16>}, {pipeline_mode = #tpu.pipeline_mode<synchronous>, transform_indices = @transform_4, window_bounds = array<i64: 1, 16>}, {transform_indices = @transform_5, window_bounds = array<i64: 1, 8, 16>}]} {
    %c0_i32 = arith.constant 0 : i32
    %0 = arith.cmpi eq, %arg1, %c0_i32 : i32
    %1 = arith.extui %0 : i1 to i32
    %c0_i32_0 = arith.constant 0 : i32
    %2 = arith.cmpi ne, %1, %c0_i32_0 : i32
    scf.if %2 {
      %cst_25 = arith.constant 0.000000e+00 : f32
      %34 = vector.broadcast %cst_25 : f32 to vector<8x16xf32>
      %c0_26 = arith.constant 0 : index
      %c0_27 = arith.constant 0 : index
      %35 = vector.load %arg8[%c0_26, %c0_27] : memref<8x16xf32, #tpu.memory_space<vmem>>, vector<8x16xf32>
      tpu.vector_store %arg8[%c0_26, %c0_27], %34 {strides = array<i32>} : memref<8x16xf32, #tpu.memory_space<vmem>>, vector<8x16xf32>,
    } else {
    }
    %c0 = arith.constant 0 : index
    %c0_1 = arith.constant 0 : index
    %c0_2 = arith.constant 0 : index
    %c0_3 = arith.constant 0 : index
    %3 = vector.load %arg2[%c0, %c0_1, %c0_2, %c0_3] : memref<1x1x8x8xbf16, #tpu.memory_space<vmem>>, vector<1x1x8x8xbf16>
    %4 = vector.shape_cast %3 : vector<1x1x8x8xbf16> to vector<8x8xbf16>
    %c0_4 = arith.constant 0 : index
    %c0_5 = arith.constant 0 : index
    %c0_6 = arith.constant 0 : index
    %c0_7 = arith.constant 0 : index
    %5 = vector.load %arg3[%c0_4, %c0_5, %c0_6, %c0_7] : memref<1x1x8x8xbf16, #tpu.memory_space<vmem>>, vector<1x1x8x8xbf16>
    %6 = vector.shape_cast %5 : vector<1x1x8x8xbf16> to vector<8x8xbf16>
    %c0_8 = arith.constant 0 : index
    %c0_9 = arith.constant 0 : index
    %c0_10 = arith.constant 0 : index
    %c0_11 = arith.constant 0 : index
    %7 = vector.load %arg4[%c0_8, %c0_9, %c0_10, %c0_11] : memref<1x1x8x8xbf16, #tpu.memory_space<vmem>>, vector<1x1x8x8xbf16>
    %8 = vector.shape_cast %7 : vector<1x1x8x8xbf16> to vector<8x8xbf16>
    %cst = arith.constant dense<0.000000e+00> : vector<8x8xf32>
    %9 = tpu.matmul %4, %6, %cst {dimension_numbers = #tpu.dot_dimension_numbers<[1], [1], [0], [0], [0, 0, 1, 0], [], []>} : vector<8x8xbf16>, vector<8x8xbf16>, vector<8x8xf32> -> vector<8x8xf32>
    %cst_12 = arith.constant 0.353553385 : f32
    %10 = vector.broadcast %cst_12 : f32 to vector<8x8xf32>
    %11 = arith.mulf %9, %10 : vector<8x8xf32>
    %cst_13 = arith.constant dense<0xFF800000> : vector<8xf32>
    %12 = vector.multi_reduction <maximumf>, %11, %cst_13 [1] : vector<8x8xf32> to vector<8xf32>
    %13 = vector.shape_cast %12 : vector<8xf32> to vector<8x1xf32>
    %14 = vector.broadcast %13 : vector<8x1xf32> to vector<8x8xf32>
    %15 = arith.subf %11, %14 : vector<8x8xf32>
    %16 = math.exp %15 : vector<8x8xf32>
    %cst_14 = arith.constant dense<0.000000e+00> : vector<8xf32>
    %17 = vector.multi_reduction <add>, %16, %cst_14 [1] : vector<8x8xf32> to vector<8xf32>
    %18 = vector.shape_cast %17 : vector<8xf32> to vector<8x1xf32>
    %19 = tpu.reciprocal %18 {approx = true} : vector<8x1xf32> -> vector<8x1xf32>
    %20 = vector.broadcast %19 : vector<8x1xf32> to vector<8x8xf32>
    %21 = arith.mulf %16, %20 : vector<8x8xf32>
    %22 = arith.truncf %21 : vector<8x8xf32> to vector<8x8xbf16>
    %cst_15 = arith.constant dense<0.000000e+00> : vector<8x8xf32>
    %23 = tpu.matmul %22, %8, %cst_15 {dimension_numbers = #tpu.dot_dimension_numbers<[1], [0], [0], [1], [0, 0, 1, 1], [], []>} : vector<8x8xbf16>, vector<8x8xbf16>, vector<8x8xf32> -> vector<8x8xf32>
    %c0_16 = arith.constant 0 : index
    %c0_17 = arith.constant 0 : index
    %24 = vector.load %arg8[%c0_16, %c0_17] : memref<8x16xf32, #tpu.memory_space<vmem>>, vector<8x16xf32>
    %25 = arith.truncf %23 : vector<8x8xf32> to vector<8x8xbf16>
    %c0_18 = arith.constant 0 : index
    %c0_19 = arith.constant 0 : index
    %c0_20 = arith.constant 0 : index
    %26 = vector.load %arg5[%c0_18, %c0_19, %c0_20] : memref<1x8x16xbf16, #tpu.memory_space<vmem>>, vector<1x8x16xbf16>
    %27 = vector.shape_cast %26 : vector<1x8x16xbf16> to vector<8x16xbf16>
    %cst_21 = arith.constant dense<0.000000e+00> : vector<8x16xf32>
    %28 = tpu.matmul %25, %27, %cst_21 {dimension_numbers = #tpu.dot_dimension_numbers<[1], [0], [0], [1], [0, 0, 1, 1], [], []>} : vector<8x8xbf16>, vector<8x16xbf16>, vector<8x16xf32> -> vector<8x16xf32>
    %29 = arith.addf %24, %28 : vector<8x16xf32>
    %c0_22 = arith.constant 0 : index
    %c0_23 = arith.constant 0 : index
    %30 = vector.load %arg8[%c0_22, %c0_23] : memref<8x16xf32, #tpu.memory_space<vmem>>, vector<8x16xf32>
    tpu.vector_store %arg8[%c0_22, %c0_23], %29 {strides = array<i32>} : memref<8x16xf32, #tpu.memory_space<vmem>>, vector<8x16xf32>,
    %c1_i32 = arith.constant 1 : i32
    %31 = arith.cmpi eq, %arg1, %c1_i32 : i32
    %32 = arith.extui %31 : i1 to i32
    %c0_i32_24 = arith.constant 0 : i32
    %33 = arith.cmpi ne, %32, %c0_i32_24 : i32
    scf.if %33 {
      %c0_25 = arith.constant 0 : index
      %c0_26 = arith.constant 0 : index
      %34 = vector.load %arg8[%c0_25, %c0_26] : memref<8x16xf32, #tpu.memory_space<vmem>>, vector<8x16xf32>
      %c0_27 = arith.constant 0 : index
      %c0_28 = arith.constant 0 : index
      %35 = vector.load %arg6[%c0_27, %c0_28] : memref<1x16xf32, #tpu.memory_space<vmem>>, vector<1x16xf32>
      %36 = vector.broadcast %35 : vector<1x16xf32> to vector<8x16xf32>
      %37 = arith.addf %34, %36 : vector<8x16xf32>
      %38 = vector.shape_cast %37 : vector<8x16xf32> to vector<1x8x16xf32>
      %39 = arith.truncf %38 : vector<1x8x16xf32> to vector<1x8x16xbf16>
      %c0_29 = arith.constant 0 : index
      %c0_30 = arith.constant 0 : index
      %c0_31 = arith.constant 0 : index
      %40 = vector.load %arg7[%c0_29, %c0_30, %c0_31] : memref<1x8x16xbf16, #tpu.memory_space<vmem>>, vector<1x8x16xbf16>
      tpu.vector_store %arg7[%c0_29, %c0_30, %c0_31], %39 {strides = array<i32>} : memref<1x8x16xbf16, #tpu.memory_space<vmem>>, vector<1x8x16xbf16>,
    } else {
    }
    return
  }
  func.func @transform_0(%arg0: i32, %arg1: i32) -> (i32, i32, i32, i32) {
    %c0_i32 = arith.constant 0 : i32
    %c0_i32_0 = arith.constant 0 : i32
    %c0_i32_1 = arith.constant 0 : i32
    return %arg0, %arg1, %c0_i32, %c0_i32_0 : i32, i32, i32, i32
  }
  func.func @transform_1(%arg0: i32, %arg1: i32) -> (i32, i32, i32, i32) {
    %c2_i32 = arith.constant 2 : i32
    %0 = arith.addi %c2_i32, %arg1 : i32
    %c0_i32 = arith.constant 0 : i32
    %c0_i32_0 = arith.constant 0 : i32
    %c0_i32_1 = arith.constant 0 : i32
    return %arg0, %0, %c0_i32, %c0_i32_0 : i32, i32, i32, i32
  }
  func.func @transform_2(%arg0: i32, %arg1: i32) -> (i32, i32, i32, i32) {
    %c4_i32 = arith.constant 4 : i32
    %0 = arith.addi %c4_i32, %arg1 : i32
    %c0_i32 = arith.constant 0 : i32
    %c0_i32_0 = arith.constant 0 : i32
    %c0_i32_1 = arith.constant 0 : i32
    return %arg0, %0, %c0_i32, %c0_i32_0 : i32, i32, i32, i32
  }
  func.func @transform_3(%arg0: i32, %arg1: i32) -> (i32, i32, i32) {
    %c0_i32 = arith.constant 0 : i32
    %c0_i32_0 = arith.constant 0 : i32
    %c0_i32_1 = arith.constant 0 : i32
    return %arg1, %c0_i32, %c0_i32_0 : i32, i32, i32
  }
  func.func @transform_4(%arg0: i32, %arg1: i32) -> (i32, i32) {
    %c0_i32 = arith.constant 0 : i32
    %c0_i32_0 = arith.constant 0 : i32
    %c0_i32_1 = arith.constant 0 : i32
    return %c0_i32, %c0_i32_0 : i32, i32
  }
  func.func @transform_5(%arg0: i32, %arg1: i32) -> (i32, i32, i32) {
    %c0_i32 = arith.constant 0 : i32
    %c0_i32_0 = arith.constant 0 : i32
    %c0_i32_1 = arith.constant 0 : i32
    return %arg0, %c0_i32, %c0_i32_0 : i32, i32, i32
  }
}

</mosaic_0001>

<bundles_post_ra>
// kernel: _lambda_.55
= control target key start
LH: loop header
LB: loop body
LE: loop exit
PB: predicated region body
PF: predicated region fallthrough
CT: control target
= control target key end

     0   :  { %vm16_vm0 = vcmask 523264   ;;  %s118_s0 = inlined_call_operand.vmem [shape: f32[16,64], index: 0, kind: input, shape index: {}]   ;;  %s119_s1 = inlined_call_operand.vmem [shape: f32[1,64], index: 1, kind: input, shape index: {}]   ;;  %s120_s2 = inlined_call_operand.vmem [shape: f32[1,64], index: 2, kind: input, shape index: {}]   ;;  %s121_s3 = inlined_call_operand.vmem [shape: f32[16,64], index: 3, kind: output, shape index: {}]  }
   0x1   :  { %v14_v0 = vld [vmem:[%s118_s0] sm:$0xff]  ;;  %v15_v1 = vld [vmem:[%s118_s0 + $0x8] sm:$0xff] }
   0x2   :  { %v17_v2 = vsel %vm16_vm0, %v14_v0, 0.0  ;;  %v20_v3 = vsel %vm16_vm0, %v15_v1, 0.0  ;;  %v68_v21 = vld [vmem:[%s119_s1] ss:$0 sm:$0xff] }
   0x3   :  { %18 = vadd.xlane.f32.xlu0 %v17_v2  ;;  %v69_v23 = vld [vmem:[%s120_s2] ss:$0 sm:$0xff] }
   0x7   :  { %21 = vadd.xlane.f32.xlu0 %v20_v3 }
  0x8c   :  { %v19_v4 = vpop.xlane.xlu0 %18 }
  0x8d   :  { %v24_v5 = vmul.f32 0.015625, %v19_v4 }
  0x8f   :  { %v26_v6 = vsub.f32 %v14_v0, %v24_v5 }
  0x90   :  { %v22_v7 = vpop.xlane.xlu0 %21 }
  0x91   :  { %v25_v8 = vmul.f32 0.015625, %v22_v7  ;;  %v28_v9 = vmul.f32 %v26_v6, %v26_v6 }
  0x93   :  { %v27_v10 = vsub.f32 %v15_v1, %v25_v8  ;;  %v30_v11 = vsel %vm16_vm0, %v28_v9, 0.0 }
  0x94   :  { %31 = vadd.xlane.f32.xlu1 %v30_v11 }
  0x95   :  { %v29_v12 = vmul.f32 %v27_v10, %v27_v10 }
  0x97   :  { %v33_v13 = vsel %vm16_vm0, %v29_v12, 0.0 }
  0x98   :  { %34 = vadd.xlane.f32.xlu1 %v33_v13 }
 0x11d   :  { %v32_v14 = vpop.xlane.xlu1 %31 }
 0x11e   :  { %v36_v15 = vmul.f32 0.015625, %v32_v14 }
 0x120   :  { %v38_v16 = vadd.f32 1e-05, %v36_v15 }
 0x121   :  { %v35_v17 = vpop.xlane.xlu1 %34 }
 0x122   :  { %70 = vrsqrt.f32 %v38_v16  ;;  %v37_v18 = vmul.f32 0.015625, %v35_v17 }
 0x124   :  { %v39_v19 = vadd.f32 1e-05, %v37_v18 }
 0x126   :  { %72 = vrsqrt.f32 %v39_v19 }
 0x12f   :  { %v71_v20 = vpop.eup %70 }
 0x130   :  { %v42_v22 = vmul.f32 %v71_v20, %v26_v6 }
 0x132   :  { %v51_v24 = vmul.f32 %v68_v21, %v42_v22 }
 0x133   :  { %v73_v25 = vpop.eup %72 }
 0x134   :  { %v60_v26 = vadd.f32 %v69_v23, %v51_v24  ;;  %v43_v27 = vmul.f32 %v73_v25, %v27_v10 }
 0x136   :  { %62 = vst.msk [vmem:[%s121_s3] sm:$0xff] %vm16_vm0, %v60_v26  ;;  %v52_v28 = vmul.f32 %v68_v21, %v43_v27 }
 0x138   :  { %v61_v29 = vadd.f32 %v69_v23, %v52_v28 }
 0x13a   :  { %63 = vst.msk [vmem:[%s121_s3 + $0x8] sm:$0xff] %vm16_vm0, %v61_v29 }

// kernel: _lambda_.54
= control target key start
LH: loop header
LB: loop body
LE: loop exit
PB: predicated region body
PF: predicated region fallthrough
CT: control target
= control target key end

     0   :  { %s359_s1 = inlined_call_operand.vmem [shape: bf16[256,128], index: 1, kind: input, shape index: {}]   ;;  %s360_s0 = inlined_call_operand.vmem [shape: f32[16,256], index: 0, kind: input, shape index: {}]   ;;  %s361_s2 = inlined_call_operand.vmem [shape: bf16[16,128], index: 2, kind: output, shape index: {}]  }
   0x1   :  { %v265_v0 = vld [vmem:[%s359_s1 + $0x78] sm:$0xff]   ;;  %v267_v2 = vld [vmem:[%s359_s1 + $0x70] sm:$0xff]   ;;  %v269_v4 = vld [vmem:[%s359_s1 + $0x68] sm:$0xff]  }
   0x2   :  { %v266_v1 = vld [vmem:[%s359_s1 + $0x38] sm:$0xff]   ;;  %243 = vmatprep.subr.bf16.mxu0 %v265_v0  ;;  %v268_v3 = vld [vmem:[%s359_s1 + $0x30] sm:$0xff]   ;;  %v270_v5 = vld [vmem:[%s359_s1 + $0x28] sm:$0xff]  }
   0x3   :  { %244 = vmatpush3.bf16.msra.mxu0 %v266_v1  ;;  %v271_v6 = vld [vmem:[%s359_s1 + $0x60] sm:$0xff]   ;;  %v273_v8 = vld [vmem:[%s359_s1 + $0x58] sm:$0xff]   ;;  %v275_v10 = vld [vmem:[%s359_s1 + $0x50] sm:$0xff]  }
   0x4   :  { %245 = vmatprep.subr.bf16.mxu0 %v267_v2  ;;  %v272_v7 = vld [vmem:[%s359_s1 + $0x20] sm:$0xff]   ;;  %v274_v9 = vld [vmem:[%s359_s1 + $0x18] sm:$0xff]   ;;  %v21_v11 = vld [vmem:[%s360_s0 + $0x8] sm:$0xff] }
   0x5   :  { %v23_v12 = vld [vmem:[%s360_s0 + $0x18] sm:$0xff]  ;;  %v276_v14 = vld [vmem:[%s359_s1 + $0x10] sm:$0xff]   ;;  %v277_v15 = vld [vmem:[%s359_s1 + $0x48] sm:$0xff]  }
   0x6   :  { %v25_v13 = vpack.c.bf16 %v23_v12, %v21_v11  ;;  %v278_v16 = vld [vmem:[%s359_s1 + $0x8] sm:$0xff]   ;;  %v279_v17 = vld [vmem:[%s359_s1 + $0x40] sm:$0xff]   ;;  %v22_v20 = vld [vmem:[%s360_s0 + $0x10] sm:$0xff] }
   0x7   :  { %246 = vmatpush3.bf16.msra.mxu0 %v268_v3  ;;  %v280_v18 = vld [vmem:[%s359_s1] sm:$0xff]  }
   0x8   :  { %247 = vmatprep.subr.bf16.mxu0 %v269_v4  ;;  %186 = vmatprep.mubr.bf16.mxu0 %v25_v13  ;;  %v20_v19 = vld [vmem:[%s360_s0] sm:$0xff] }
   0x9   :  { %v24_v21 = vpack.c.bf16 %v22_v20, %v20_v19 }
   0xb   :  { %248 = vmatpush3.bf16.msra.mxu0 %v270_v5 }
   0xc   :  { %249 = vmatprep.subr.bf16.mxu0 %v271_v6 }
   0xf   :  { %250 = vmatpush3.bf16.msra.mxu0 %v272_v7 }
  0x10   :  { %251 = vmatprep.subr.bf16.mxu0 %v273_v8 }
  0x13   :  { %252 = vmatpush3.bf16.msra.mxu0 %v274_v9 }
  0x14   :  { %253 = vmatprep.subr.bf16.mxu0 %v275_v10 }
  0x17   :  { %254 = vmatpush3.bf16.msra.mxu0 %v276_v14 }
  0x18   :  { %255 = vmatprep.subr.bf16.mxu0 %v277_v15 }
  0x1b   :  { %256 = vmatpush3.bf16.msra.mxu0 %v278_v16 }
  0x1c   :  { %257 = vmatprep.subr.bf16.mxu0 %v279_v17 }
  0x1f   :  { %258 = vmatpush3.bf16.msra.mxu0 %v280_v18 }
  0x22   :  { %187 = vmatmul.mubr.bf16.vlgmr.msra.gmra.mxu0 %v24_v21 }
  0xe2   :  { %v259_v22 = vpop.f32.mrf.mxu0 }
  0xe4   :  { %v260_v23 = vpop.f32.mrf.mxu0 }
  0xe5   :  { %v261_v26 = vadd.f32 %v260_v23, %v259_v22 }
  0xe6   :  { %v262_v24 = vpop.f32.mrf.mxu0 }
  0xe8   :  { %v263_v25 = vpop.f32.mrf.mxu0 }
  0xe9   :  { %v264_v27 = vadd.f32 %v263_v25, %v262_v24 }
  0xeb   :  { %v241_v28 = vpack.c.bf16 %v264_v27, %v261_v26 }
  0xed   :  { %242 = vst [vmem:[%s361_s2] sm:$0xff] %v241_v28  }

// kernel: _lambda_.56
= control target key start
LH: loop header
LB: loop body
LE: loop exit
PB: predicated region body
PF: predicated region fallthrough
CT: control target
= control target key end

     0   :  { %vm27_vm0 = vcmask 523264   ;;  %v254_v22 = vmov 0   ;;  %vm81_vm1 = vcmask 519168   ;;  %v96_v42 = vlaneseq  ;;  %s335_s0 = inlined_call_operand.vmem [shape: f32[16,64], index: 0, kind: input, shape index: {}]   ;;  %s336_s3 = inlined_call_operand.vmem [shape: bf16[64,256], index: 3, kind: input, shape index: {}]   ;;  %s337_s1 = inlined_call_operand.vmem [shape: f32[1,64], index: 1, kind: input, shape index: {}]   ;;  %s338_s2 = inlined_call_operand.vmem [shape: f32[1,64], index: 2, kind: input, shape index: {}]   ;;  %s339_s4 = inlined_call_operand.vmem [shape: f32[1,256], index: 4, kind: input, shape index: {}]   ;;  %s340_s5 = inlined_call_operand.vmem [shape: bf16[16,256], index: 5, kind: output, shape index: {}]  }
   0x1   :  { %v25_v0 = vld [vmem:[%s335_s0] sm:$0xff]  ;;  %v26_v1 = vld [vmem:[%s335_s0 + $0x8] sm:$0xff]  ;;  %v237_v14 = vld [vmem:[%s336_s3 + $0x34] ss:$8 sps:$4 sm:$0xff]   ;;  %187 = vmatprep.mubr.bf16.mxu0 %v254_v22 }
   0x2   :  { %v28_v2 = vsel %vm27_vm0, %v25_v0, 0.0  ;;  %v31_v3 = vsel %vm27_vm0, %v26_v1, 0.0  ;;  %v239_v15 = vld [vmem:[%s336_s3 + $0x30] ss:$8 sps:$4 sm:$0xff]   ;;  %163 = vmatprep.subr.bf16.mxu0 %v237_v14  ;;  %v240_v16 = vld [vmem:[%s336_s3 + $0x24] ss:$8 sps:$4 sm:$0xff]  }
   0x3   :  { %29 = vadd.xlane.f32.xlu0 %v28_v2  ;;  %164 = vmatpush1.bf16.msra.mxu0 %v239_v15  ;;  %v242_v17 = vld [vmem:[%s336_s3 + $0x20] ss:$8 sps:$4 sm:$0xff]   ;;  %v243_v18 = vld [vmem:[%s336_s3 + $0x14] ss:$8 sps:$4 sm:$0xff]   ;;  %v245_v19 = vld [vmem:[%s336_s3 + $0x10] ss:$8 sps:$4 sm:$0xff]  }
   0x4   :  { %165 = vmatprep.subr.bf16.mxu0 %v240_v16  ;;  %v246_v20 = vld [vmem:[%s336_s3 + $0x4] ss:$8 sps:$4 sm:$0xff]   ;;  %v248_v21 = vld [vmem:[%s336_s3] ss:$8 sps:$4 sm:$0xff]   ;;  %v97_v43 = vshrl.u32 %v96_v42, 7 }
   0x5   :  { %v216_v30 = vld [vmem:[%s337_s1] ss:$0 sm:$0xff] }
   0x6   :  { %v217_v32 = vld [vmem:[%s338_s2] ss:$0 sm:$0xff]  ;;  %v98_v44 = vsub.s32 0, %v97_v43  ;;  %v102_v45 = vsub.s32 1, %v97_v43 }
   0x7   :  { %32 = vadd.xlane.f32.xlu0 %v31_v3  ;;  %166 = vmatpush1.bf16.msra.mxu0 %v242_v17  ;;  %v94_v46 = vld [vmem:[%s339_s4] sm:$0x3] }
   0x8   :  { %167 = vmatprep.subr.bf16.mxu0 %v243_v18  ;;  %v99_v47 = vrot.slane %v94_v46, %v98_v44  ;;  %v103_v48 = vrot.slane %v94_v46, %v102_v45 }
   0xb   :  { %168 = vmatpush1.bf16.msra.mxu0 %v245_v19 }
   0xc   :  { %169 = vmatprep.subr.bf16.mxu0 %v246_v20 }
   0xf   :  { %170 = vmatpush1.bf16.msra.mxu0 %v248_v21 }
  0x8c   :  { %v30_v4 = vpop.xlane.xlu0 %29 }
  0x8d   :  { %v35_v5 = vmul.f32 0.015625, %v30_v4 }
  0x8f   :  { %v37_v6 = vsub.f32 %v25_v0, %v35_v5 }
  0x90   :  { %v33_v7 = vpop.xlane.xlu0 %32 }
  0x91   :  { %v36_v8 = vmul.f32 0.015625, %v33_v7  ;;  %v39_v9 = vmul.f32 %v37_v6, %v37_v6 }
  0x93   :  { %v38_v10 = vsub.f32 %v26_v1, %v36_v8  ;;  %v41_v11 = vsel %vm27_vm0, %v39_v9, 0.0 }
  0x94   :  { %42 = vadd.xlane.f32.xlu1 %v41_v11 }
  0x95   :  { %v40_v12 = vmul.f32 %v38_v10, %v38_v10 }
  0x97   :  { %v44_v13 = vsel %vm27_vm0, %v40_v12, 0.0 }
  0x98   :  { %45 = vadd.xlane.f32.xlu1 %v44_v13 }
 0x11d   :  { %v43_v23 = vpop.xlane.xlu1 %42 }
 0x11e   :  { %v47_v24 = vmul.f32 0.015625, %v43_v23 }
 0x120   :  { %v49_v25 = vadd.f32 1e-05, %v47_v24 }
 0x121   :  { %v46_v26 = vpop.xlane.xlu1 %45 }
 0x122   :  { %250 = vrsqrt.f32 %v49_v25  ;;  %v48_v27 = vmul.f32 0.015625, %v46_v26 }
 0x124   :  { %v50_v28 = vadd.f32 1e-05, %v48_v27 }
 0x126   :  { %252 = vrsqrt.f32 %v50_v28 }
 0x12f   :  { %v251_v29 = vpop.eup %250 }
 0x130   :  { %v53_v31 = vmul.f32 %v251_v29, %v37_v6 }
 0x132   :  { %v62_v33 = vmul.f32 %v216_v30, %v53_v31 }
 0x133   :  { %v253_v34 = vpop.eup %252 }
 0x134   :  { %v71_v35 = vadd.f32 %v217_v32, %v62_v33  ;;  %v54_v36 = vmul.f32 %v253_v34, %v38_v10 }
 0x136   :  { %v232_v37 = vpack.c.bf16 %v71_v35, %v71_v35  ;;  %v63_v38 = vmul.f32 %v216_v30, %v54_v36 }
 0x138   :  { %82 = vst.msk [vmem:[#allocation2] sm:$0xf] %vm81_vm1, %v232_v37  ;;  %v72_v39 = vadd.f32 %v217_v32, %v63_v38 }
 0x13a   :  { %v233_v40 = vpack.c.bf16 %v72_v39, %v72_v39 }
 0x13c   :  { %83 = vst.msk [vmem:[#allocation2 + $0x4] sm:$0xf] %vm81_vm1, %v233_v40 }
 0x143   :  { %v249_v41 = vld [vmem:[#allocation2] sm:$0xff]  }
 0x144   :  { %229 = vmatmul.mubr.msk.bf16.vlgmr.msra.gmra.mxu0 %vm27_vm0, %v249_v41 }
 0x204   :  { %v189_v49 = vpop.f32.mrf.mxu0 }
 0x205   :  { %v190_v51 = vadd.f32 %v189_v49, %v99_v47 }
 0x206   :  { %v191_v50 = vpop.f32.mrf.mxu0 }
 0x207   :  { %v192_v52 = vadd.f32 %v191_v50, %v103_v48 }
 0x208   :  { %v193_v53 = vpop.f32.mrf.mxu0 }
 0x209   :  { %v234_v54 = vpack.c.bf16 %v192_v52, %v190_v51  ;;  %v194_v56 = vadd.f32 %v193_v53, %v99_v47 }
 0x20a   :  { %v195_v55 = vpop.f32.mrf.mxu0 }
 0x20b   :  { %210 = vst [vmem:[%s340_s5] sm:$0xff] %v234_v54  ;;  %v196_v57 = vadd.f32 %v195_v55, %v103_v48 }
 0x20d   :  { %v235_v58 = vpack.c.bf16 %v196_v57, %v194_v56 }
 0x20f   :  { %211 = vst [vmem:[%s340_s5 + $0x8] sm:$0xff] %v235_v58 }

// kernel: _lambda_.57
= control target key start
LH: loop header
LB: loop body
LE: loop exit
PB: predicated region body
PF: predicated region fallthrough
CT: control target
= control target key end

     0   :  { %s827_s18 = smov 0   ;;  %s829_s19 = smov 0   ;;  %s924_s0 = inlined_call_operand.vmem [shape: bf16[2,12,5,16], index: 0, kind: input, shape index: {}, may-alias: {0,1,2}]   ;;  %s925_s1 = inlined_call_operand.vmem [shape: bf16[2,12,5,16], index: 1, kind: input, shape index: {}, may-alias: {0,1,2}]   ;;  %s926_s2 = inlined_call_operand.vmem [shape: bf16[2,12,5,16], index: 2, kind: input, shape index: {}, may-alias: {0,1,2}]   ;;  %s927_s3 = inlined_call_operand.vmem [shape: bf16[4,16,64], index: 3, kind: input, shape index: {}]   ;;  %s928_s4 = inlined_call_operand.vmem [shape: f32[1,64], index: 4, kind: input, shape index: {}]   ;;  %s929_s5 = inlined_call_operand.vmem [shape: bf16[2,5,64], index: 5, kind: output, shape index: {}]  }
   0x1   :  { %s831_s20 = smov 0   ;;  %s833_s21 = smov 0  }
   0x2   :  { %s835_s22 = smov 0  }
   0x3 LB: > { %s24_s23 = sadd.s32 1, %s783_s20  ;;  %s27_s24 = sadd.s32 1, %s787_s21  ;;  %s791_s22 = sphi %s835_s22, %s15_s22   ;;  %s787_s21 = sphi %s833_s21, %s933_s21   ;;  %s783_s20 = sphi %s831_s20, %s932_s20   ;;  %s779_s19 = sphi %s829_s19, %s931_s19   ;;  %s775_s18 = sphi %s827_s18, %s930_s18  }
   0x4   : > { %p25_p0 = scmp.ge.s32.totalorder %s24_s23, 4  ;;  %p662_p1 = scmp.ge.s32.totalorder %s791_s22, 1 }
   0x5   : > { %p252_p2 = scmp.lt.s32.totalorder %s791_s22, 9 }
   0x6   : > { %s935_s23 = smov (%p25_p0, %s24_s23), 0  ;;  %s937_s24 = smov (!%p25_p0, %s27_s24), %s787_s21 }
   0x7   : > { %p253_p3 = pnand %p662_p1, %p252_p2  ;;  %p29_p4 = scmp.ge.s32.totalorder %s937_s24, 2 }
   0x8   : > { %p305_p5 = scmp.lt.s32.totalorder (!%p253_p3), %s779_s19, 1  ;;  %p307_p6 = scmp.lt.s32.totalorder (!%p253_p3), %s775_s18, 11 }
   0x9   : > { %s939_s24 = smov (%p29_p4, %s937_s24), 0  ;;  %256 = sbr.rel (%p253_p3) target bundleno = 951 (0x3b7), region = 40 }
   0xa   : > { %s313_s25 = sadd.s32 (!%p253_p3), 4, %s775_s18  ;;  %s323_s26 = sadd.s32 (!%p253_p3), 8, %s775_s18 }
   0xb   : > { %p316_p7 = scmp.lt.s32.totalorder (!%p253_p3), %s313_s25, 11  ;;  %p326_p8 = scmp.lt.s32.totalorder (!%p253_p3), %s323_s26, 11 }
   0xc   : > { %p333_p9 = scmp.lt.s32.totalorder (!%p253_p3), %s775_s18, 3  ;;  %p669_p10 = scmp.ne.s32.totalorder (!%p253_p3), %s775_s18, 0 }
   0xe   : > { %s941_s19 = smov (!%p305_p5, %s779_s19), 1  ;;  %s943_s25 = smov (!%p316_p7, %s313_s25), 11 }
   0xf   : > { %s308_s27 = scalar_select %p307_p6, %s775_s18, 11 }
  0x10   : > { %s703_s28 = smul.u32 12, %s941_s19  ;;  %s668_s30 = sshll.u32 %s941_s19, 2 }
  0x11   : > { %s868_s9 = scalar_lea.vmem %s929_s5, %s668_s30  ;;  %s945_s26 = smov (!%p326_p8, %s323_s26), 11 }
  0x12   : > { %s310_s29 = sadd.s32 %s703_s28, %s308_s27  ;;  %s319_s13 = sadd.s32 %s703_s28, %s943_s25 }
  0x13   : > { %s863_s6 = sshll.u32 %s310_s29, 2  ;;  %s664_s14 = sshll.u32 %s319_s13, 2 }
  0x14   : > { %s312_s12 = scalar_lea.vmem %s924_s0, %s863_s6  ;;  %s329_s15 = sadd.s32 %s703_s28, %s945_s26 }
  0x15   : > { %s321_s19 = scalar_lea.vmem %s925_s1, %s664_s14  ;;  %s878_s27 = sshll.u32 %s329_s15, 2 }
  0x16   : > { %s331_s7 = scalar_lea.vmem %s926_s2, %s878_s27  ;;  %346 = sbr.rel (%p669_p10) target bundleno = 29 (0x1d), region = 44 }
  0x17   : > { %s334_s8 = scalar_select %p333_p9, %s775_s18, 3 }
  0x19   : > { %s678_s10 = sshll.u32 %s334_s8, 3 }
  0x1a   : > { %s888_s25 = scalar_lea.vmem %s927_s3, %s678_s10 }
  0x1b   : > { %vm347_vm0 = vcmask 520192   ;;  %v793_v0 = vmov 0.0  }
  0x1c   : > { %348 = vst.msk [vmem:[#allocation2] sm:$0x1f] %vm347_vm0, %v793_v0 }
  0x1d PF: > { %v350_v1 = vld [vmem:[%s321_s19] sm:$0x7]  ;;  %vm352_vm1 = vcmask 130048   ;;  %v794_v2 = vmov 0.0   ;;  %vm795_vm2 = vmmov 0   ;;  %vm400_vm3 = vcmask 36864  }
  0x1e   : > { %685 = vmatprep.subr.bf16.mxu0 %v794_v2  ;;  %v357_v3 = vsel %vm352_vm1, %v350_v1, 0  ;;  %687 = vmatprep.mubr.msk.bf16.mxu0 %vm795_vm2, %v794_v2  ;;  %v349_v4 = vld [vmem:[%s312_s12] sm:$0x7]  ;;  %vm417_vm4 = vcmask 1041408   ;;  %vm418_vm5 = vcmask 1042432   ;;  %v796_v17 = vmov 65535  }
  0x1f   : > { %686 = vmatpush3.bf16.xpose.msra.mxu0 %v357_v3  ;;  %691 = vmatprep.subr.bf16.mxu1 %v794_v2  ;;  %v351_v16 = vld [vmem:[%s331_s7] sm:$0x7]  ;;  %v419_v18 = vsel %vm417_vm4, 4294967295, %v796_v17  ;;  %vm413_vm6 = vcmask 39936   ;;  %vm518_vm7 = vcmask 520192   ;;  %p674_p11 = scmp.ne.s32.totalorder %s775_s18, 3 }
  0x20   : > { %693 = vmatprep.mubr.msk.bf16.mxu1 %vm795_vm2, %v794_v2  ;;  %v420_v19 = vsel %vm418_vm5, %v419_v18, 0  ;;  %v748_v24 = vld [vmem:[%s888_s25] sm:$0xff]  }
  0x21   : > { %v422_v20 = vand.u32 %v420_v19, %v351_v16 }
  0x23   : > { %692 = vmatpush3.bf16.msra.mxu1 %v422_v20  ;;  %v464_v31 = vld [vmem:[#allocation2] sm:$0x1f] }
  0x24   : > { %697 = vmatprep.subr.bf16.mxu1 %v794_v2 }
  0x26   : > { %688 = vmatmul.mubr.msk.bf16.vlgmr.msra.gmra.mxu0 %vm352_vm1, %v349_v4 }
  0xe6   : > { %v393_v5 = vpop.f32.mrf.mxu0 }
  0xe7   : > { %v399_v6 = vmul.f32 0.25, %v393_v5 }
  0xe8   : > { %v689_v7 = vpop.f32.mrf.mxu0 }
  0xe9   : > { %v401_v8 = vsel %vm400_vm3, %v399_v6, -inf }
  0xea   : > { %402 = vmax.xlane.f32.xlu0 %v401_v8  ;;  %v396_v9 = vpop.f32.mrf.mxu0 }
  0xec   : > { %v690_v10 = vpop.f32.mrf.mxu0 }
 0x173   : > { %v403_v11 = vpop.xlane.xlu0 %402 }
 0x174   : > { %v404_v12 = vsub.f32 %v399_v6, %v403_v11 }
 0x176   : > { %v405_v13 = vmul.f32 1.442695, %v404_v12 }
 0x178   : > { %749 = vpow2.f32 %v405_v13 }
 0x185   : > { %v750_v14 = vpop.eup %749 }
 0x186   : > { %v407_v15 = vsel %vm400_vm3, %v750_v14, 0.0 }
 0x187   : > { %408 = vadd.xlane.f32.xlu0 %v407_v15 }
 0x210   : > { %v409_v21 = vpop.xlane.xlu0 %408 }
 0x211   : > { %751 = vrcp.f32 %v409_v21 }
 0x21e   : > { %v752_v22 = vpop.eup %751 }
 0x21f   : > { %v411_v23 = vmul.f32 %v752_v22, %v750_v14 }
 0x221   : > { %v412_v25 = vpack.c.bf16 %v411_v23, %v411_v23 }
 0x223   : > { %694 = vmatmul.mubr.msk.bf16.vlgmr.msra.gmra.mxu1 %vm413_vm6, %v412_v25 }
 0x224   : > { %698 = vmatpush3.bf16.msra.mxu1 %v748_v24  ;;  %699 = vmatprep.mubr.msk.bf16.mxu1 %vm795_vm2, %v794_v2 }
 0x2e3   : > { %v458_v26 = vpop.f32.mrf.mxu1 }
 0x2e4   : > { %v465_v27 = vpack.c.bf16 %v458_v26, %v458_v26 }
 0x2e5   : > { %v695_v28 = vpop.f32.mrf.mxu1 }
 0x2e6   : > { %700 = vmatmul.mubr.msk.bf16.vlgmr.msra.gmra.mxu1 %vm352_vm1, %v465_v27 }
 0x2e7   : > { %v461_v29 = vpop.f32.mrf.mxu1 }
 0x2e9   : > { %v696_v30 = vpop.f32.mrf.mxu1 }
 0x3a6   : > { %v511_v32 = vpop.f32.mrf.mxu1 }
 0x3a7   : > { %v517_v33 = vadd.f32 %v511_v32, %v464_v31 }
 0x3a8   : > { %v701_v34 = vpop.f32.mrf.mxu1  ;;  %523 = sbr.rel (%p674_p11) target bundleno = 951 (0x3b7), region = 48 }
 0x3a9   : > { %519 = vst.msk [vmem:[#allocation2] sm:$0x1f] %vm518_vm7, %v517_v33 }
 0x3aa   : > { %v514_v35 = vpop.f32.mrf.mxu1 }
 0x3ac   : > { %v702_v36 = vpop.f32.mrf.mxu1 }
 0x3ad   : > { %v675_v38 = vld [vmem:[%s928_s4] ss:$0 sm:$0xff]  ;;  %vm534_vm8 = vcmask 518144   ;;  %vm535_vm9 = vsmask.f32 2304 }
 0x3ae   : > { %vm536_vm10 = vmand %vm534_vm8, %vm535_vm9  ;;  %v537_v40 = vld [vmem:[%s868_s9] sm:$0x7] }
 0x3b0   : > { %v524_v37 = vld [vmem:[#allocation2] sm:$0x1f] }
 0x3b1   : > { %v532_v39 = vadd.f32 %v675_v38, %v524_v37 }
 0x3b3   : > { %v533_v41 = vpack.c.bf16 %v532_v39, %v532_v39 }
 0x3b5   : > { %v538_v42 = vsel %vm536_vm10, %v533_v41, %v537_v40 }
 0x3b6   : > { %539 = vst [vmem:[%s868_s9] sm:$0x7] %v538_v42 }
 0x3b7 PF: > { %s15_s22 = sadd.s32 1, %s791_s22   ;;  %s930_s18 = smov %s783_s20 }
 0x3b8   : > { %p12_p12 = scmp.ge.s32.totalorder %s15_s22, 10   ;;  %s931_s19 = smov %s787_s21 }
 0x3b9   : > { %s932_s20 = smov %s935_s23  ;;  %s933_s21 = smov %s939_s24 }
 0x3ba   :  { %14 = sbr.rel (!%p12_p12) target bundleno = 3 (0x3), region = 87 }

// kernel: _lambda_.58
= control target key start
LH: loop header
LB: loop body
LE: loop exit
PB: predicated region body
PF: predicated region fallthrough
CT: control target
= control target key end

     0   :  { %vm27_vm0 = vcmask 523264   ;;  %v298_v22 = vmov 0   ;;  %vm81_vm1 = vcmask 519168   ;;  %v96_v42 = vlaneseq  ;;  %s379_s0 = inlined_call_operand.vmem [shape: f32[16,64], index: 0, kind: input, shape index: {}]   ;;  %s380_s3 = inlined_call_operand.vmem [shape: bf16[64,256], index: 3, kind: input, shape index: {}]   ;;  %s381_s1 = inlined_call_operand.vmem [shape: f32[1,64], index: 1, kind: input, shape index: {}]   ;;  %s382_s2 = inlined_call_operand.vmem [shape: f32[1,64], index: 2, kind: input, shape index: {}]   ;;  %s383_s4 = inlined_call_operand.vmem [shape: f32[1,256], index: 4, kind: input, shape index: {}]   ;;  %s384_s5 = inlined_call_operand.vmem [shape: bf16[16,256], index: 5, kind: output, shape index: {}]  }
   0x1   :  { %v25_v0 = vld [vmem:[%s379_s0] sm:$0xff]  ;;  %v26_v1 = vld [vmem:[%s379_s0 + $0x8] sm:$0xff]  ;;  %v273_v14 = vld [vmem:[%s380_s3 + $0x34] ss:$8 sps:$4 sm:$0xff]   ;;  %187 = vmatprep.mubr.bf16.mxu0 %v298_v22 }
   0x2   :  { %v28_v2 = vsel %vm27_vm0, %v25_v0, 0.0  ;;  %v31_v3 = vsel %vm27_vm0, %v26_v1, 0.0  ;;  %v275_v15 = vld [vmem:[%s380_s3 + $0x30] ss:$8 sps:$4 sm:$0xff]   ;;  %163 = vmatprep.subr.bf16.mxu0 %v273_v14  ;;  %v276_v16 = vld [vmem:[%s380_s3 + $0x24] ss:$8 sps:$4 sm:$0xff]  }
   0x3   :  { %29 = vadd.xlane.f32.xlu0 %v28_v2  ;;  %164 = vmatpush1.bf16.msra.mxu0 %v275_v15  ;;  %v278_v17 = vld [vmem:[%s380_s3 + $0x20] ss:$8 sps:$4 sm:$0xff]   ;;  %v279_v18 = vld [vmem:[%s380_s3 + $0x14] ss:$8 sps:$4 sm:$0xff]   ;;  %v281_v19 = vld [vmem:[%s380_s3 + $0x10] ss:$8 sps:$4 sm:$0xff]  }
   0x4   :  { %165 = vmatprep.subr.bf16.mxu0 %v276_v16  ;;  %v282_v20 = vld [vmem:[%s380_s3 + $0x4] ss:$8 sps:$4 sm:$0xff]   ;;  %v284_v21 = vld [vmem:[%s380_s3] ss:$8 sps:$4 sm:$0xff]   ;;  %v97_v43 = vshrl.u32 %v96_v42, 7 }
   0x5   :  { %v252_v30 = vld [vmem:[%s381_s1] ss:$0 sm:$0xff] }
   0x6   :  { %v253_v32 = vld [vmem:[%s382_s2] ss:$0 sm:$0xff]  ;;  %v98_v44 = vsub.s32 0, %v97_v43  ;;  %v102_v46 = vsub.s32 1, %v97_v43 }
   0x7   :  { %32 = vadd.xlane.f32.xlu0 %v31_v3  ;;  %166 = vmatpush1.bf16.msra.mxu0 %v278_v17  ;;  %v94_v45 = vld [vmem:[%s383_s4] sm:$0x3] }
   0x8   :  { %167 = vmatprep.subr.bf16.mxu0 %v279_v18  ;;  %v99_v47 = vrot.slane %v94_v45, %v98_v44  ;;  %v103_v48 = vrot.slane %v94_v45, %v102_v46 }
   0xb   :  { %168 = vmatpush1.bf16.msra.mxu0 %v281_v19 }
   0xc   :  { %169 = vmatprep.subr.bf16.mxu0 %v282_v20 }
   0xf   :  { %170 = vmatpush1.bf16.msra.mxu0 %v284_v21 }
  0x8c   :  { %v30_v4 = vpop.xlane.xlu0 %29 }
  0x8d   :  { %v35_v5 = vmul.f32 0.015625, %v30_v4 }
  0x8f   :  { %v37_v6 = vsub.f32 %v25_v0, %v35_v5 }
  0x90   :  { %v33_v7 = vpop.xlane.xlu0 %32 }
  0x91   :  { %v36_v8 = vmul.f32 0.015625, %v33_v7  ;;  %v39_v9 = vmul.f32 %v37_v6, %v37_v6 }
  0x93   :  { %v38_v10 = vsub.f32 %v26_v1, %v36_v8  ;;  %v41_v11 = vsel %vm27_vm0, %v39_v9, 0.0 }
  0x94   :  { %42 = vadd.xlane.f32.xlu1 %v41_v11 }
  0x95   :  { %v40_v12 = vmul.f32 %v38_v10, %v38_v10 }
  0x97   :  { %v44_v13 = vsel %vm27_vm0, %v40_v12, 0.0 }
  0x98   :  { %45 = vadd.xlane.f32.xlu1 %v44_v13 }
 0x11d   :  { %v43_v23 = vpop.xlane.xlu1 %42 }
 0x11e   :  { %v47_v24 = vmul.f32 0.015625, %v43_v23 }
 0x120   :  { %v49_v25 = vadd.f32 1e-05, %v47_v24 }
 0x121   :  { %v46_v26 = vpop.xlane.xlu1 %45 }
 0x122   :  { %286 = vrsqrt.f32 %v49_v25  ;;  %v48_v27 = vmul.f32 0.015625, %v46_v26 }
 0x124   :  { %v50_v28 = vadd.f32 1e-05, %v48_v27 }
 0x126   :  { %288 = vrsqrt.f32 %v50_v28 }
 0x12f   :  { %v287_v29 = vpop.eup %286 }
 0x130   :  { %v53_v31 = vmul.f32 %v287_v29, %v37_v6 }
 0x132   :  { %v62_v33 = vmul.f32 %v252_v30, %v53_v31 }
 0x133   :  { %v289_v34 = vpop.eup %288 }
 0x134   :  { %v71_v35 = vadd.f32 %v253_v32, %v62_v33  ;;  %v54_v36 = vmul.f32 %v289_v34, %v38_v10 }
 0x136   :  { %v268_v37 = vpack.c.bf16 %v71_v35, %v71_v35  ;;  %v63_v38 = vmul.f32 %v252_v30, %v54_v36 }
 0x138   :  { %82 = vst.msk [vmem:[#allocation2] sm:$0xf] %vm81_vm1, %v268_v37  ;;  %v72_v39 = vadd.f32 %v253_v32, %v63_v38 }
 0x13a   :  { %v269_v40 = vpack.c.bf16 %v72_v39, %v72_v39 }
 0x13c   :  { %83 = vst.msk [vmem:[#allocation2 + $0x4] sm:$0xf] %vm81_vm1, %v269_v40 }
 0x143   :  { %v285_v41 = vld [vmem:[#allocation2] sm:$0xff]  }
 0x144   :  { %265 = vmatmul.mubr.msk.bf16.vlgmr.msra.gmra.mxu0 %vm27_vm0, %v285_v41 }
 0x204   :  { %v189_v49 = vpop.f32.mrf.mxu0 }
 0x205   :  { %v190_v50 = vadd.f32 %v189_v49, %v99_v47 }
 0x206   :  { %v191_v51 = vpop.f32.mrf.mxu0 }
 0x207   :  { %v198_v52 = vmul.f32 %v190_v50, %v190_v50  ;;  %v192_v53 = vadd.f32 %v191_v51, %v103_v48 }
 0x208   :  { %v193_v54 = vpop.f32.mrf.mxu0 }
 0x209   :  { %v202_v55 = vmul.f32 %v198_v52, %v190_v50  ;;  %v199_v56 = vmul.f32 %v192_v53, %v192_v53  ;;  %v194_v57 = vadd.f32 %v193_v54, %v99_v47 }
 0x20a   :  { %v195_v58 = vpop.f32.mrf.mxu0 }
 0x20b   :  { %v206_v59 = vmul.f32 0.044715, %v202_v55  ;;  %v203_v60 = vmul.f32 %v199_v56, %v192_v53  ;;  %v200_v61 = vmul.f32 %v194_v57, %v194_v57  ;;  %v196_v62 = vadd.f32 %v195_v58, %v103_v48 }
 0x20d   :  { %v210_v63 = vadd.f32 %v206_v59, %v190_v50  ;;  %v207_v0 = vmul.f32 0.044715, %v203_v60  ;;  %v204_v1 = vmul.f32 %v200_v61, %v194_v57  ;;  %v201_v2 = vmul.f32 %v196_v62, %v196_v62 }
 0x20f   :  { %v214_v3 = vmul.f32 0.7978846, %v210_v63  ;;  %v211_v4 = vadd.f32 %v207_v0, %v192_v53  ;;  %v208_v5 = vmul.f32 0.044715, %v204_v1  ;;  %v205_v6 = vmul.f32 %v201_v2, %v196_v62 }
 0x211   :  { %290 = vtanh.f32 %v214_v3  ;;  %v215_v7 = vmul.f32 0.7978846, %v211_v4  ;;  %v212_v8 = vadd.f32 %v208_v5, %v194_v57  ;;  %v209_v9 = vmul.f32 0.044715, %v205_v6 }
 0x213   :  { %292 = vtanh.f32 %v215_v7  ;;  %v216_v10 = vmul.f32 0.7978846, %v212_v8  ;;  %v213_v11 = vadd.f32 %v209_v9, %v196_v62 }
 0x215   :  { %294 = vtanh.f32 %v216_v10  ;;  %v217_v12 = vmul.f32 0.7978846, %v213_v11 }
 0x217   :  { %296 = vtanh.f32 %v217_v12 }
 0x21e   :  { %v291_v13 = vpop.eup %290 }
 0x21f   :  { %v222_v14 = vadd.f32 1.0, %v291_v13 }
 0x220   :  { %v293_v15 = vpop.eup %292 }
 0x221   :  { %v226_v16 = vmul.f32 0.5, %v222_v14  ;;  %v223_v17 = vadd.f32 1.0, %v293_v15 }
 0x222   :  { %v295_v18 = vpop.eup %294 }
 0x223   :  { %v227_v19 = vmul.f32 0.5, %v223_v17  ;;  %v224_v20 = vadd.f32 1.0, %v295_v18  ;;  %v230_v22 = vmul.f32 %v226_v16, %v190_v50 }
 0x224   :  { %v297_v21 = vpop.eup %296 }
 0x225   :  { %v231_v23 = vmul.f32 %v227_v19, %v192_v53  ;;  %v228_v24 = vmul.f32 0.5, %v224_v20  ;;  %v225_v25 = vadd.f32 1.0, %v297_v21 }
 0x227   :  { %v270_v26 = vpack.c.bf16 %v231_v23, %v230_v22  ;;  %v229_v27 = vmul.f32 0.5, %v225_v25  ;;  %v232_v28 = vmul.f32 %v228_v24, %v194_v57 }
 0x229   :  { %246 = vst [vmem:[%s384_s5] sm:$0xff] %v270_v26  ;;  %v233_v29 = vmul.f32 %v229_v27, %v196_v62 }
 0x22b   :  { %v271_v30 = vpack.c.bf16 %v233_v29, %v232_v28 }
 0x22d   :  { %247 = vst [vmem:[%s384_s5 + $0x8] sm:$0xff] %v271_v30 }

// kernel: _lambda_.59
= control target key start
LH: loop header
LB: loop body
LE: loop exit
PB: predicated region body
PF: predicated region fallthrough
CT: control target
= control target key end

     0   :  { %s385_s1 = inlined_call_operand.vmem [shape: bf16[256,128], index: 1, kind: input, shape index: {}]   ;;  %s386_s0 = inlined_call_operand.vmem [shape: bf16[16,256], index: 0, kind: input, shape index: {}]   ;;  %s387_s2 = inlined_call_operand.vmem [shape: f32[1,128], index: 2, kind: input, shape index: {}]   ;;  %s388_s3 = inlined_call_operand.vmem [shape: bf16[16,128], index: 3, kind: output, shape index: {}]  }
   0x1   :  { %v286_v0 = vld [vmem:[%s385_s1 + $0x78] sm:$0xff]   ;;  %v288_v2 = vld [vmem:[%s385_s1 + $0x70] sm:$0xff]   ;;  %v290_v4 = vld [vmem:[%s385_s1 + $0x68] sm:$0xff]  }
   0x2   :  { %v287_v1 = vld [vmem:[%s385_s1 + $0x38] sm:$0xff]   ;;  %264 = vmatprep.subr.bf16.mxu0 %v286_v0  ;;  %v289_v3 = vld [vmem:[%s385_s1 + $0x30] sm:$0xff]   ;;  %v291_v5 = vld [vmem:[%s385_s1 + $0x28] sm:$0xff]  }
   0x3   :  { %265 = vmatpush3.bf16.msra.mxu0 %v287_v1  ;;  %v292_v6 = vld [vmem:[%s385_s1 + $0x60] sm:$0xff]   ;;  %v294_v8 = vld [vmem:[%s385_s1 + $0x58] sm:$0xff]   ;;  %v296_v10 = vld [vmem:[%s385_s1 + $0x50] sm:$0xff]  }
   0x4   :  { %266 = vmatprep.subr.bf16.mxu0 %v288_v2  ;;  %v293_v7 = vld [vmem:[%s385_s1 + $0x20] sm:$0xff]   ;;  %v295_v9 = vld [vmem:[%s385_s1 + $0x18] sm:$0xff]   ;;  %v297_v12 = vld [vmem:[%s385_s1 + $0x10] sm:$0xff]  }
   0x5   :  { %v304_v11 = vld [vmem:[%s386_s0 + $0x4] ss:$8 sps:$4 sm:$0xff]   ;;  %v302_v17 = vld [vmem:[%s386_s0] ss:$8 sps:$4 sm:$0xff]  }
   0x6   :  { %195 = vmatprep.mubr.bf16.mxu0 %v304_v11  ;;  %v298_v13 = vld [vmem:[%s385_s1 + $0x48] sm:$0xff]   ;;  %v300_v15 = vld [vmem:[%s385_s1 + $0x40] sm:$0xff]  }
   0x7   :  { %267 = vmatpush3.bf16.msra.mxu0 %v289_v3  ;;  %v299_v14 = vld [vmem:[%s385_s1 + $0x8] sm:$0xff]   ;;  %v301_v16 = vld [vmem:[%s385_s1] sm:$0xff]  }
   0x8   :  { %268 = vmatprep.subr.bf16.mxu0 %v290_v4  ;;  %v254_v22 = vld [vmem:[%s387_s2] ss:$0 sm:$0xff] }
   0xb   :  { %269 = vmatpush3.bf16.msra.mxu0 %v291_v5 }
   0xc   :  { %270 = vmatprep.subr.bf16.mxu0 %v292_v6 }
   0xf   :  { %271 = vmatpush3.bf16.msra.mxu0 %v293_v7 }
  0x10   :  { %272 = vmatprep.subr.bf16.mxu0 %v294_v8 }
  0x13   :  { %273 = vmatpush3.bf16.msra.mxu0 %v295_v9 }
  0x14   :  { %274 = vmatprep.subr.bf16.mxu0 %v296_v10 }
  0x17   :  { %275 = vmatpush3.bf16.msra.mxu0 %v297_v12 }
  0x18   :  { %276 = vmatprep.subr.bf16.mxu0 %v298_v13 }
  0x1b   :  { %277 = vmatpush3.bf16.msra.mxu0 %v299_v14 }
  0x1c   :  { %278 = vmatprep.subr.bf16.mxu0 %v300_v15 }
  0x1f   :  { %279 = vmatpush3.bf16.msra.mxu0 %v301_v16 }
  0x22   :  { %196 = vmatmul.mubr.bf16.vlgmr.msra.gmra.mxu0 %v302_v17 }
  0xe2   :  { %v280_v18 = vpop.f32.mrf.mxu0 }
  0xe4   :  { %v281_v19 = vpop.f32.mrf.mxu0 }
  0xe5   :  { %v282_v21 = vadd.f32 %v281_v19, %v280_v18 }
  0xe6   :  { %v283_v20 = vpop.f32.mrf.mxu0 }
  0xe7   :  { %v220_v25 = vadd.f32 %v282_v21, %v254_v22 }
  0xe8   :  { %v284_v23 = vpop.f32.mrf.mxu0 }
  0xe9   :  { %v285_v24 = vadd.f32 %v284_v23, %v283_v20 }
  0xeb   :  { %v221_v26 = vadd.f32 %v285_v24, %v254_v22 }
  0xed   :  { %v262_v27 = vpack.c.bf16 %v221_v26, %v220_v25 }
  0xef   :  { %263 = vst [vmem:[%s388_s3] sm:$0xff] %v262_v27  }

// kernel: _lambda_.60
= control target key start
LH: loop header
LB: loop body
LE: loop exit
PB: predicated region body
PF: predicated region fallthrough
CT: control target
= control target key end

     0   :  { %v242_v0 = vmov 0.0   ;;  %vm243_vm0 = vmmov 0   ;;  %s300_s1 = inlined_call_operand.vmem [shape: bf16[128,128], index: 1, kind: input, shape index: {}]   ;;  %s301_s0 = inlined_call_operand.vmem [shape: f32[16,128], index: 0, kind: input, shape index: {}]   ;;  %s302_s2 = inlined_call_operand.vmem [shape: f32[1,128], index: 2, kind: input, shape index: {}]   ;;  %s303_s3 = inlined_call_operand.vmem [shape: bf16[16,128], index: 3, kind: output, shape index: {}]  }
   0x1   :  { %208 = vmatprep.subr.bf16.mxu0 %v242_v0  ;;  %v230_v1 = vld [vmem:[%s300_s1 + $0x38] sm:$0xff]   ;;  %224 = vmatprep.mubr.msk.bf16.mxu0 %vm243_vm0, %v242_v0  ;;  %v231_v2 = vld [vmem:[%s300_s1 + $0x30] sm:$0xff]   ;;  %v232_v3 = vld [vmem:[%s300_s1 + $0x28] sm:$0xff]  }
   0x2   :  { %209 = vmatpush3.bf16.msra.mxu0 %v230_v1  ;;  %v233_v4 = vld [vmem:[%s300_s1 + $0x20] sm:$0xff]   ;;  %v234_v5 = vld [vmem:[%s300_s1 + $0x18] sm:$0xff]   ;;  %v235_v6 = vld [vmem:[%s300_s1 + $0x10] sm:$0xff]  }
   0x3   :  { %210 = vmatprep.subr.bf16.mxu0 %v242_v0  ;;  %v236_v7 = vld [vmem:[%s300_s1 + $0x8] sm:$0xff]   ;;  %v237_v8 = vld [vmem:[%s300_s1] sm:$0xff]  }
   0x4   :  { %v23_v9 = vld [vmem:[%s301_s0] sm:$0xff]  ;;  %v24_v10 = vld [vmem:[%s301_s0 + $0x8] sm:$0xff] }
   0x5   :  { %v25_v11 = vpack.c.bf16 %v24_v10, %v23_v9  ;;  %v189_v12 = vld [vmem:[%s302_s2] ss:$0 sm:$0xff] }
   0x6   :  { %211 = vmatpush3.bf16.msra.mxu0 %v231_v2 }
   0x7   :  { %212 = vmatprep.subr.bf16.mxu0 %v242_v0 }
   0xa   :  { %213 = vmatpush3.bf16.msra.mxu0 %v232_v3 }
   0xb   :  { %214 = vmatprep.subr.bf16.mxu0 %v242_v0 }
   0xe   :  { %215 = vmatpush3.bf16.msra.mxu0 %v233_v4 }
   0xf   :  { %216 = vmatprep.subr.bf16.mxu0 %v242_v0 }
  0x12   :  { %217 = vmatpush3.bf16.msra.mxu0 %v234_v5 }
  0x13   :  { %218 = vmatprep.subr.bf16.mxu0 %v242_v0 }
  0x16   :  { %219 = vmatpush3.bf16.msra.mxu0 %v235_v6 }
  0x17   :  { %220 = vmatprep.subr.bf16.mxu0 %v242_v0 }
  0x1a   :  { %221 = vmatpush3.bf16.msra.mxu0 %v236_v7 }
  0x1b   :  { %222 = vmatprep.subr.bf16.mxu0 %v242_v0 }
  0x1e   :  { %223 = vmatpush3.bf16.msra.mxu0 %v237_v8 }
  0x21   :  { %225 = vmatmul.mubr.bf16.vlgmr.msra.gmra.mxu0 %v25_v11 }
  0xe1   :  { %v124_v13 = vpop.f32.mrf.mxu0 }
  0xe2   :  { %v147_v14 = vadd.f32 %v189_v12, %v124_v13 }
  0xe3   :  { %v226_v15 = vpop.f32.mrf.mxu0 }
  0xe4   :  { %v149_v16 = vmul.f32 %v147_v14, %v147_v14 }
  0xe5   :  { %v127_v17 = vpop.f32.mrf.mxu0 }
  0xe6   :  { %v151_v18 = vmul.f32 %v149_v16, %v147_v14  ;;  %v148_v19 = vadd.f32 %v189_v12, %v127_v17 }
  0xe7   :  { %v227_v20 = vpop.f32.mrf.mxu0 }
  0xe8   :  { %v153_v21 = vmul.f32 0.044715, %v151_v18  ;;  %v150_v22 = vmul.f32 %v148_v19, %v148_v19 }
  0xea   :  { %v155_v23 = vadd.f32 %v153_v21, %v147_v14  ;;  %v152_v24 = vmul.f32 %v150_v22, %v148_v19 }
  0xec   :  { %v157_v25 = vmul.f32 0.7978846, %v155_v23  ;;  %v154_v26 = vmul.f32 0.044715, %v152_v24 }
  0xee   :  { %238 = vtanh.f32 %v157_v25  ;;  %v156_v27 = vadd.f32 %v154_v26, %v148_v19 }
  0xf0   :  { %v158_v28 = vmul.f32 0.7978846, %v156_v27 }
  0xf2   :  { %240 = vtanh.f32 %v158_v28 }
  0xfb   :  { %v239_v29 = vpop.eup %238 }
  0xfc   :  { %v161_v30 = vadd.f32 1.0, %v239_v29 }
  0xfe   :  { %v163_v32 = vmul.f32 0.5, %v161_v30 }
  0xff   :  { %v241_v31 = vpop.eup %240 }
 0x100   :  { %v162_v33 = vadd.f32 1.0, %v241_v31  ;;  %v165_v35 = vmul.f32 %v163_v32, %v147_v14 }
 0x102   :  { %v164_v34 = vmul.f32 0.5, %v162_v33 }
 0x104   :  { %v166_v36 = vmul.f32 %v164_v34, %v148_v19 }
 0x106   :  { %v197_v37 = vpack.c.bf16 %v166_v36, %v165_v35 }
 0x108   :  { %198 = vst [vmem:[%s303_s3] sm:$0xff] %v197_v37  }

// kernel: _lambda_.61
= control target key start
LH: loop header
LB: loop body
LE: loop exit
PB: predicated region body
PF: predicated region fallthrough
CT: control target
= control target key end

     0   :  { %v227_v0 = vmov 0.0   ;;  %vm228_vm0 = vmmov 0   ;;  %s282_s1 = inlined_call_operand.vmem [shape: bf16[128,128], index: 1, kind: input, shape index: {}]   ;;  %s283_s0 = inlined_call_operand.vmem [shape: bf16[16,128], index: 0, kind: input, shape index: {}]   ;;  %s284_s2 = inlined_call_operand.vmem [shape: f32[1,128], index: 2, kind: input, shape index: {}]   ;;  %s285_s3 = inlined_call_operand.vmem [shape: bf16[16,128], index: 3, kind: output, shape index: {}]  }
   0x1   :  { %196 = vmatprep.subr.bf16.mxu0 %v227_v0  ;;  %v218_v1 = vld [vmem:[%s282_s1 + $0x38] sm:$0xff]   ;;  %212 = vmatprep.mubr.msk.bf16.mxu0 %vm228_vm0, %v227_v0  ;;  %v219_v2 = vld [vmem:[%s282_s1 + $0x30] sm:$0xff]   ;;  %v220_v3 = vld [vmem:[%s282_s1 + $0x28] sm:$0xff]  }
   0x2   :  { %197 = vmatpush3.bf16.msra.mxu0 %v218_v1  ;;  %v221_v4 = vld [vmem:[%s282_s1 + $0x20] sm:$0xff]   ;;  %v222_v5 = vld [vmem:[%s282_s1 + $0x18] sm:$0xff]   ;;  %v223_v6 = vld [vmem:[%s282_s1 + $0x10] sm:$0xff]  }
   0x3   :  { %198 = vmatprep.subr.bf16.mxu0 %v227_v0  ;;  %v224_v7 = vld [vmem:[%s282_s1 + $0x8] sm:$0xff]   ;;  %v225_v8 = vld [vmem:[%s282_s1] sm:$0xff]  }
   0x4   :  { %v226_v9 = vld [vmem:[%s283_s0] sm:$0xff]  }
   0x5   :  { %v177_v11 = vld [vmem:[%s284_s2] ss:$0 sm:$0xff] }
   0x6   :  { %199 = vmatpush3.bf16.msra.mxu0 %v219_v2 }
   0x7   :  { %200 = vmatprep.subr.bf16.mxu0 %v227_v0 }
   0xa   :  { %201 = vmatpush3.bf16.msra.mxu0 %v220_v3 }
   0xb   :  { %202 = vmatprep.subr.bf16.mxu0 %v227_v0 }
   0xe   :  { %203 = vmatpush3.bf16.msra.mxu0 %v221_v4 }
   0xf   :  { %204 = vmatprep.subr.bf16.mxu0 %v227_v0 }
  0x12   :  { %205 = vmatpush3.bf16.msra.mxu0 %v222_v5 }
  0x13   :  { %206 = vmatprep.subr.bf16.mxu0 %v227_v0 }
  0x16   :  { %207 = vmatpush3.bf16.msra.mxu0 %v223_v6 }
  0x17   :  { %208 = vmatprep.subr.bf16.mxu0 %v227_v0 }
  0x1a   :  { %209 = vmatpush3.bf16.msra.mxu0 %v224_v7 }
  0x1b   :  { %210 = vmatprep.subr.bf16.mxu0 %v227_v0 }
  0x1e   :  { %211 = vmatpush3.bf16.msra.mxu0 %v225_v8 }
  0x21   :  { %213 = vmatmul.mubr.bf16.vlgmr.msra.gmra.mxu0 %v226_v9 }
  0xe1   :  { %v129_v10 = vpop.f32.mrf.mxu0 }
  0xe2   :  { %v152_v14 = vadd.f32 %v177_v11, %v129_v10 }
  0xe3   :  { %v214_v12 = vpop.f32.mrf.mxu0 }
  0xe5   :  { %v132_v13 = vpop.f32.mrf.mxu0 }
  0xe6   :  { %v153_v15 = vadd.f32 %v177_v11, %v132_v13 }
  0xe7   :  { %v215_v16 = vpop.f32.mrf.mxu0 }
  0xe8   :  { %v185_v17 = vpack.c.bf16 %v153_v15, %v152_v14 }
  0xea   :  { %186 = vst [vmem:[%s285_s3] sm:$0xff] %v185_v17  }

// kernel: _lambda_.62
= control target key start
LH: loop header
LB: loop body
LE: loop exit
PB: predicated region body
PF: predicated region fallthrough
CT: control target
= control target key end

     0   :  { %s817_s18 = smov 0   ;;  %s819_s19 = smov 0   ;;  %s914_s0 = inlined_call_operand.vmem [shape: bf16[2,12,5,8], index: 0, kind: input, shape index: {}, may-alias: {0,1,2}]   ;;  %s915_s1 = inlined_call_operand.vmem [shape: bf16[2,12,5,8], index: 1, kind: input, shape index: {}, may-alias: {0,1,2}]   ;;  %s916_s2 = inlined_call_operand.vmem [shape: bf16[2,12,5,8], index: 2, kind: input, shape index: {}, may-alias: {0,1,2}]   ;;  %s917_s3 = inlined_call_operand.vmem [shape: bf16[4,8,32], index: 3, kind: input, shape index: {}]   ;;  %s918_s4 = inlined_call_operand.vmem [shape: f32[1,32], index: 4, kind: input, shape index: {}]   ;;  %s919_s5 = inlined_call_operand.vmem [shape: bf16[2,5,32], index: 5, kind: output, shape index: {}]  }
   0x1   :  { %s821_s20 = smov 0   ;;  %s823_s21 = smov 0  }
   0x2   :  { %s825_s22 = smov 0  }
   0x3 LB: > { %s24_s23 = sadd.s32 1, %s773_s20  ;;  %s27_s24 = sadd.s32 1, %s777_s21  ;;  %s781_s22 = sphi %s825_s22, %s15_s22   ;;  %s777_s21 = sphi %s823_s21, %s923_s21   ;;  %s773_s20 = sphi %s821_s20, %s922_s20   ;;  %s769_s19 = sphi %s819_s19, %s921_s19   ;;  %s765_s18 = sphi %s817_s18, %s920_s18  }
   0x4   : > { %p25_p0 = scmp.ge.s32.totalorder %s24_s23, 4  ;;  %p656_p1 = scmp.ge.s32.totalorder %s781_s22, 1 }
   0x5   : > { %p251_p2 = scmp.lt.s32.totalorder %s781_s22, 9 }
   0x6   : > { %s925_s23 = smov (%p25_p0, %s24_s23), 0  ;;  %s927_s24 = smov (!%p25_p0, %s27_s24), %s777_s21 }
   0x7   : > { %p252_p3 = pnand %p656_p1, %p251_p2  ;;  %p29_p4 = scmp.ge.s32.totalorder %s927_s24, 2 }
   0x8   : > { %p303_p5 = scmp.lt.s32.totalorder (!%p252_p3), %s769_s19, 1  ;;  %p305_p6 = scmp.lt.s32.totalorder (!%p252_p3), %s765_s18, 11 }
   0x9   : > { %s929_s24 = smov (%p29_p4, %s927_s24), 0  ;;  %255 = sbr.rel (%p252_p3) target bundleno = 951 (0x3b7), region = 40 }
   0xa   : > { %s311_s25 = sadd.s32 (!%p252_p3), 4, %s765_s18  ;;  %s321_s26 = sadd.s32 (!%p252_p3), 8, %s765_s18 }
   0xb   : > { %p314_p7 = scmp.lt.s32.totalorder (!%p252_p3), %s311_s25, 11  ;;  %p324_p8 = scmp.lt.s32.totalorder (!%p252_p3), %s321_s26, 11 }
   0xc   : > { %p331_p9 = scmp.lt.s32.totalorder (!%p252_p3), %s765_s18, 3  ;;  %p662_p10 = scmp.ne.s32.totalorder (!%p252_p3), %s765_s18, 0 }
   0xe   : > { %s931_s19 = smov (!%p303_p5, %s769_s19), 1  ;;  %s933_s25 = smov (!%p314_p7, %s311_s25), 11 }
   0xf   : > { %s306_s27 = scalar_select %p305_p6, %s765_s18, 11 }
  0x10   : > { %s694_s28 = smul.u32 12, %s931_s19  ;;  %s661_s30 = sshll.u32 %s931_s19, 2 }
  0x11   : > { %s858_s9 = scalar_lea.vmem %s919_s5, %s661_s30  ;;  %s935_s26 = smov (!%p324_p8, %s321_s26), 11 }
  0x12   : > { %s308_s29 = sadd.s32 %s694_s28, %s306_s27  ;;  %s317_s13 = sadd.s32 %s694_s28, %s933_s25 }
  0x13   : > { %s853_s6 = sshll.u32 %s308_s29, 2  ;;  %s658_s14 = sshll.u32 %s317_s13, 2 }
  0x14   : > { %s310_s12 = scalar_lea.vmem %s914_s0, %s853_s6  ;;  %s327_s15 = sadd.s32 %s694_s28, %s935_s26 }
  0x15   : > { %s319_s19 = scalar_lea.vmem %s915_s1, %s658_s14  ;;  %s868_s27 = sshll.u32 %s327_s15, 2 }
  0x16   : > { %s329_s7 = scalar_lea.vmem %s916_s2, %s868_s27  ;;  %343 = sbr.rel (%p662_p10) target bundleno = 29 (0x1d), region = 44 }
  0x17   : > { %s332_s8 = scalar_select %p331_p9, %s765_s18, 3 }
  0x19   : > { %s660_s10 = sshll.u32 %s332_s8, 2 }
  0x1a   : > { %s878_s25 = scalar_lea.vmem %s917_s3, %s660_s10 }
  0x1b   : > { %vm344_vm0 = vcmask 258048   ;;  %v783_v0 = vmov 0.0  }
  0x1c   : > { %345 = vst.msk [vmem:[#allocation2] sm:$0x1f] %vm344_vm0, %v783_v0 }
  0x1d PF: > { %v347_v1 = vld [vmem:[%s319_s19] sm:$0x7]  ;;  %vm349_vm1 = vcmask 64512   ;;  %v784_v2 = vmov 0.0   ;;  %vm785_vm2 = vmmov 0   ;;  %vm397_vm3 = vcmask 36864  }
  0x1e   : > { %676 = vmatprep.subr.bf16.mxu0 %v784_v2  ;;  %v354_v3 = vsel %vm349_vm1, %v347_v1, 0  ;;  %678 = vmatprep.mubr.msk.bf16.mxu0 %vm785_vm2, %v784_v2  ;;  %v346_v4 = vld [vmem:[%s310_s12] sm:$0x7]  ;;  %vm414_vm4 = vcmask 1041408   ;;  %vm415_vm5 = vcmask 1042432   ;;  %v786_v17 = vmov 65535  }
  0x1f   : > { %677 = vmatpush3.bf16.xpose.msra.mxu0 %v354_v3  ;;  %682 = vmatprep.subr.bf16.mxu1 %v784_v2  ;;  %v348_v16 = vld [vmem:[%s329_s7] sm:$0x7]  ;;  %v416_v18 = vsel %vm414_vm4, 4294967295, %v786_v17  ;;  %vm467_vm6 = vcmask 1043456   ;;  %vm410_vm7 = vcmask 39936   ;;  %vm512_vm8 = vcmask 258048  }
  0x20   : > { %684 = vmatprep.mubr.msk.bf16.mxu1 %vm785_vm2, %v784_v2  ;;  %v417_v19 = vsel %vm415_vm5, %v416_v18, 0  ;;  %v463_v23 = vld [vmem:[%s878_s25] sm:$0xf]  ;;  %p666_p11 = scmp.ne.s32.totalorder %s765_s18, 3 }
  0x21   : > { %v419_v20 = vand.u32 %v417_v19, %v348_v16  ;;  %v469_v26 = vsel %vm467_vm6, %v463_v23, 0 }
  0x23   : > { %683 = vmatpush3.bf16.msra.mxu1 %v419_v20  ;;  %v461_v32 = vld [vmem:[#allocation2] sm:$0x1f] }
  0x24   : > { %688 = vmatprep.subr.bf16.mxu1 %v784_v2 }
  0x26   : > { %679 = vmatmul.mubr.msk.bf16.vlgmr.msra.gmra.mxu0 %vm349_vm1, %v346_v4 }
  0xe6   : > { %v390_v5 = vpop.f32.mrf.mxu0 }
  0xe7   : > { %v396_v6 = vmul.f32 0.35355338, %v390_v5 }
  0xe8   : > { %v680_v7 = vpop.f32.mrf.mxu0 }
  0xe9   : > { %v398_v8 = vsel %vm397_vm3, %v396_v6, -inf }
  0xea   : > { %399 = vmax.xlane.f32.xlu0 %v398_v8  ;;  %v393_v9 = vpop.f32.mrf.mxu0 }
  0xec   : > { %v681_v10 = vpop.f32.mrf.mxu0 }
 0x173   : > { %v400_v11 = vpop.xlane.xlu0 %399 }
 0x174   : > { %v401_v12 = vsub.f32 %v396_v6, %v400_v11 }
 0x176   : > { %v402_v13 = vmul.f32 1.442695, %v401_v12 }
 0x178   : > { %739 = vpow2.f32 %v402_v13 }
 0x185   : > { %v740_v14 = vpop.eup %739 }
 0x186   : > { %v404_v15 = vsel %vm397_vm3, %v740_v14, 0.0 }
 0x187   : > { %405 = vadd.xlane.f32.xlu0 %v404_v15 }
 0x210   : > { %v406_v21 = vpop.xlane.xlu0 %405 }
 0x211   : > { %741 = vrcp.f32 %v406_v21 }
 0x21e   : > { %v742_v22 = vpop.eup %741 }
 0x21f   : > { %v408_v24 = vmul.f32 %v742_v22, %v740_v14 }
 0x221   : > { %v409_v25 = vpack.c.bf16 %v408_v24, %v408_v24 }
 0x223   : > { %685 = vmatmul.mubr.msk.bf16.vlgmr.msra.gmra.mxu1 %vm410_vm7, %v409_v25 }
 0x224   : > { %689 = vmatpush3.bf16.msra.mxu1 %v469_v26  ;;  %690 = vmatprep.mubr.msk.bf16.mxu1 %vm785_vm2, %v784_v2 }
 0x2e3   : > { %v455_v27 = vpop.f32.mrf.mxu1 }
 0x2e4   : > { %v462_v28 = vpack.c.bf16 %v455_v27, %v455_v27 }
 0x2e5   : > { %v686_v29 = vpop.f32.mrf.mxu1 }
 0x2e6   : > { %691 = vmatmul.mubr.msk.bf16.vlgmr.msra.gmra.mxu1 %vm349_vm1, %v462_v28 }
 0x2e7   : > { %v458_v30 = vpop.f32.mrf.mxu1 }
 0x2e9   : > { %v687_v31 = vpop.f32.mrf.mxu1 }
 0x3a6   : > { %v505_v33 = vpop.f32.mrf.mxu1 }
 0x3a7   : > { %v511_v34 = vadd.f32 %v505_v33, %v461_v32 }
 0x3a8   : > { %v692_v35 = vpop.f32.mrf.mxu1  ;;  %517 = sbr.rel (%p666_p11) target bundleno = 951 (0x3b7), region = 48 }
 0x3a9   : > { %513 = vst.msk [vmem:[#allocation2] sm:$0x1f] %vm512_vm8, %v511_v34 }
 0x3aa   : > { %v508_v36 = vpop.f32.mrf.mxu1 }
 0x3ac   : > { %v693_v37 = vpop.f32.mrf.mxu1 }
 0x3ad   : > { %v667_v39 = vld [vmem:[%s918_s4] ss:$0 sm:$0xff]  ;;  %vm528_vm9 = vcmask 256000   ;;  %vm529_vm10 = vsmask.f32 2304 }
 0x3ae   : > { %vm530_vm11 = vmand %vm528_vm9, %vm529_vm10  ;;  %v531_v41 = vld [vmem:[%s858_s9] sm:$0x7] }
 0x3b0   : > { %v518_v38 = vld [vmem:[#allocation2] sm:$0x1f] }
 0x3b1   : > { %v526_v40 = vadd.f32 %v667_v39, %v518_v38 }
 0x3b3   : > { %v527_v42 = vpack.c.bf16 %v526_v40, %v526_v40 }
 0x3b5   : > { %v532_v43 = vsel %vm530_vm11, %v527_v42, %v531_v41 }
 0x3b6   : > { %533 = vst [vmem:[%s858_s9] sm:$0x7] %v532_v43 }
 0x3b7 PF: > { %s15_s22 = sadd.s32 1, %s781_s22   ;;  %s920_s18 = smov %s773_s20 }
 0x3b8   : > { %p12_p12 = scmp.ge.s32.totalorder %s15_s22, 10   ;;  %s921_s19 = smov %s777_s21 }
 0x3b9   : > { %s922_s20 = smov %s925_s23  ;;  %s923_s21 = smov %s929_s24 }
 0x3ba   :  { %14 = sbr.rel (!%p12_p12) target bundleno = 3 (0x3), region = 87 }

// kernel: _lambda_.65
= control target key start
LH: loop header
LB: loop body
LE: loop exit
PB: predicated region body
PF: predicated region fallthrough
CT: control target
= control target key end

     0   :  { %v220_v0 = vmov 0.0   ;;  %vm221_vm0 = vmmov 0   ;;  %s278_s1 = inlined_call_operand.vmem [shape: bf16[128,128], index: 1, kind: input, shape index: {}]   ;;  %s279_s0 = inlined_call_operand.vmem [shape: f32[16,128], index: 0, kind: input, shape index: {}]   ;;  %s280_s2 = inlined_call_operand.vmem [shape: f32[1,128], index: 2, kind: input, shape index: {}]   ;;  %s281_s3 = inlined_call_operand.vmem [shape: bf16[16,128], index: 3, kind: output, shape index: {}]  }
   0x1   :  { %190 = vmatprep.subr.bf16.mxu0 %v220_v0  ;;  %v212_v1 = vld [vmem:[%s278_s1 + $0x38] sm:$0xff]   ;;  %206 = vmatprep.mubr.msk.bf16.mxu0 %vm221_vm0, %v220_v0  ;;  %v213_v2 = vld [vmem:[%s278_s1 + $0x30] sm:$0xff]   ;;  %v214_v3 = vld [vmem:[%s278_s1 + $0x28] sm:$0xff]  }
   0x2   :  { %191 = vmatpush3.bf16.msra.mxu0 %v212_v1  ;;  %v215_v4 = vld [vmem:[%s278_s1 + $0x20] sm:$0xff]   ;;  %v216_v5 = vld [vmem:[%s278_s1 + $0x18] sm:$0xff]   ;;  %v217_v6 = vld [vmem:[%s278_s1 + $0x10] sm:$0xff]  }
   0x3   :  { %192 = vmatprep.subr.bf16.mxu0 %v220_v0  ;;  %v218_v7 = vld [vmem:[%s278_s1 + $0x8] sm:$0xff]   ;;  %v219_v8 = vld [vmem:[%s278_s1] sm:$0xff]  }
   0x4   :  { %v23_v9 = vld [vmem:[%s279_s0] sm:$0xff]  ;;  %v24_v10 = vld [vmem:[%s279_s0 + $0x8] sm:$0xff] }
   0x5   :  { %v25_v11 = vpack.c.bf16 %v24_v10, %v23_v9  ;;  %v171_v13 = vld [vmem:[%s280_s2] ss:$0 sm:$0xff] }
   0x6   :  { %193 = vmatpush3.bf16.msra.mxu0 %v213_v2 }
   0x7   :  { %194 = vmatprep.subr.bf16.mxu0 %v220_v0 }
   0xa   :  { %195 = vmatpush3.bf16.msra.mxu0 %v214_v3 }
   0xb   :  { %196 = vmatprep.subr.bf16.mxu0 %v220_v0 }
   0xe   :  { %197 = vmatpush3.bf16.msra.mxu0 %v215_v4 }
   0xf   :  { %198 = vmatprep.subr.bf16.mxu0 %v220_v0 }
  0x12   :  { %199 = vmatpush3.bf16.msra.mxu0 %v216_v5 }
  0x13   :  { %200 = vmatprep.subr.bf16.mxu0 %v220_v0 }
  0x16   :  { %201 = vmatpush3.bf16.msra.mxu0 %v217_v6 }
  0x17   :  { %202 = vmatprep.subr.bf16.mxu0 %v220_v0 }
  0x1a   :  { %203 = vmatpush3.bf16.msra.mxu0 %v218_v7 }
  0x1b   :  { %204 = vmatprep.subr.bf16.mxu0 %v220_v0 }
  0x1e   :  { %205 = vmatpush3.bf16.msra.mxu0 %v219_v8 }
  0x21   :  { %207 = vmatmul.mubr.bf16.vlgmr.msra.gmra.mxu0 %v25_v11 }
  0xe1   :  { %v124_v12 = vpop.f32.mrf.mxu0 }
  0xe2   :  { %v147_v16 = vadd.f32 %v171_v13, %v124_v12 }
  0xe3   :  { %v208_v14 = vpop.f32.mrf.mxu0 }
  0xe5   :  { %v127_v15 = vpop.f32.mrf.mxu0 }
  0xe6   :  { %v148_v17 = vadd.f32 %v171_v13, %v127_v15 }
  0xe7   :  { %v209_v18 = vpop.f32.mrf.mxu0 }
  0xe8   :  { %v179_v19 = vpack.c.bf16 %v148_v17, %v147_v16 }
  0xea   :  { %180 = vst [vmem:[%s281_s3] sm:$0xff] %v179_v19  }

// kernel: _lambda_.77
= control target key start
LH: loop header
LB: loop body
LE: loop exit
PB: predicated region body
PF: predicated region fallthrough
CT: control target
= control target key end

     0   :  { %s76_s0 = inlined_call_operand.vmem [shape: bf16[2,32], index: 0, kind: input, shape index: {}]   ;;  %s77_s1 = inlined_call_operand.hbm [shape: f32[2,32], index: 1, kind: output, shape index: {}]  }
   0x1   :  { %v9_v0 = vld [vmem:[%s76_s0] sm:$0x1] }
   0x2   :  { %6 = vsyncpa [#allocation3], 0  ;;  %v10_v1 = vunpack.c.l.bf16 %v9_v0  ;;  %vm12_vm0 = vcmask 254976   ;;  %s59_s8 = smov [#allocation2]  }
   0x3   :  { %s26_s9 = sshll.u32 %s59_s8, 4  ;;  %s27_s9 = int_to_ptr.vmem [resolvable:$true] %s26_s9 }
   0x4   :  { %v11_v2 = vmul.f32 %v10_v1, %v10_v1  ;;  %s37_s10 = scalar_lea.vmem %s27_s9, 32  ;;  %p42_p1 = scmp.lt.s32.totalorder %s27_s9, %s27_s9 }
   0x5   :  { %p38_p0 = scmp.ne.s32.totalorder %s27_s9, %s37_s10  ;;  %p43_p2 = scmp.lt.s32.totalorder %s37_s10, %s37_s10 }
   0x6   :  { %v13_v3 = vsel %vm12_vm0, %v11_v2, 0.0 }
   0x7   :  { %14 = vadd.xlane.f32.xlu0 %v13_v3  ;;  %p44_p3 = por %p43_p2, %p42_p1 }
   0x9   :  { %p45_p4 = pnand %p44_p3, %p38_p0 }
  0x90   :  { %v15_v4 = vpop.xlane.xlu0 %14 }
  0x91   :  { %v16_v5 = vmax.f32 %v15_v4, 1e-24 }
  0x93   :  { %35 = vrsqrt.f32 %v16_v5 }
  0xa0   :  { %v36_v6 = vpop.eup %35 }
  0xa1   :  { %v18_v7 = vmul.f32 %v36_v6, %v10_v1 }
  0xa3   :  { %19 = vst.msk [vmem:[#allocation2] sm:$0x3] %vm12_vm0, %v18_v7 }
  0xa4   :  { %48 = shalt.err (!%p45_p4)
}
  0xa5   :  { %29 = dma.vmem_to_hbm [thread:$0]  %s27_s9, 32, %s77_s1, [#allocation3]  }
  0xa6   :  { %57 = dma.done.wait [#allocation3], 32  }
  0xa7   :  { %58 = vsyncadd [#allocation3], 4294967264 }
  0xa8   :  { %33 = vsyncpa [#allocation3], 1 }

// kernel: _lambda_.76
= control target key start
LH: loop header
LB: loop body
LE: loop exit
PB: predicated region body
PF: predicated region fallthrough
CT: control target
= control target key end

     0   :  { %vm24_vm0 = vcmask 523264   ;;  %v228_v15 = vmov 0.0   ;;  %vm229_vm1 = vmmov 0   ;;  %vm78_vm2 = vcmask 519168   ;;  %s287_s0 = inlined_call_operand.vmem [shape: f32[16,64], index: 0, kind: input, shape index: {}]   ;;  %s288_s3 = inlined_call_operand.vmem [shape: bf16[64,128], index: 3, kind: input, shape index: {}]   ;;  %s289_s1 = inlined_call_operand.vmem [shape: f32[1,64], index: 1, kind: input, shape index: {}]   ;;  %s290_s2 = inlined_call_operand.vmem [shape: f32[1,64], index: 2, kind: input, shape index: {}]   ;;  %s291_s4 = inlined_call_operand.vmem [shape: bf16[16,128], index: 4, kind: output, shape index: {}]  }
   0x1   :  { %v22_v0 = vld [vmem:[%s287_s0] sm:$0xff]  ;;  %v23_v1 = vld [vmem:[%s287_s0 + $0x8] sm:$0xff]  ;;  %v219_v14 = vld [vmem:[%s288_s3 + $0x18] sm:$0xff]   ;;  %205 = vmatprep.subr.bf16.mxu0 %v228_v15  ;;  %213 = vmatprep.mubr.msk.bf16.mxu0 %vm229_vm1, %v228_v15 }
   0x2   :  { %v25_v2 = vsel %vm24_vm0, %v22_v0, 0.0  ;;  %v28_v3 = vsel %vm24_vm0, %v23_v1, 0.0  ;;  %206 = vmatpush3.bf16.msra.mxu0 %v219_v14  ;;  %v220_v16 = vld [vmem:[%s288_s3 + $0x10] sm:$0xff]   ;;  %v221_v17 = vld [vmem:[%s288_s3 + $0x8] sm:$0xff]   ;;  %v222_v18 = vld [vmem:[%s288_s3] sm:$0xff]  }
   0x3   :  { %26 = vadd.xlane.f32.xlu0 %v25_v2  ;;  %207 = vmatprep.subr.bf16.mxu0 %v228_v15  ;;  %v179_v26 = vld [vmem:[%s289_s1] ss:$0 sm:$0xff] }
   0x4   :  { %v180_v28 = vld [vmem:[%s290_s2] ss:$0 sm:$0xff] }
   0x6   :  { %208 = vmatpush3.bf16.msra.mxu0 %v220_v16 }
   0x7   :  { %29 = vadd.xlane.f32.xlu0 %v28_v3  ;;  %209 = vmatprep.subr.bf16.mxu0 %v228_v15 }
   0xa   :  { %210 = vmatpush3.bf16.msra.mxu0 %v221_v17 }
   0xb   :  { %211 = vmatprep.subr.bf16.mxu0 %v228_v15 }
   0xe   :  { %212 = vmatpush3.bf16.msra.mxu0 %v222_v18 }
  0x8c   :  { %v27_v4 = vpop.xlane.xlu0 %26 }
  0x8d   :  { %v32_v5 = vmul.f32 0.015625, %v27_v4 }
  0x8f   :  { %v34_v6 = vsub.f32 %v22_v0, %v32_v5 }
  0x90   :  { %v30_v7 = vpop.xlane.xlu0 %29 }
  0x91   :  { %v33_v8 = vmul.f32 0.015625, %v30_v7  ;;  %v36_v9 = vmul.f32 %v34_v6, %v34_v6 }
  0x93   :  { %v35_v10 = vsub.f32 %v23_v1, %v33_v8  ;;  %v38_v11 = vsel %vm24_vm0, %v36_v9, 0.0 }
  0x94   :  { %39 = vadd.xlane.f32.xlu1 %v38_v11 }
  0x95   :  { %v37_v12 = vmul.f32 %v35_v10, %v35_v10 }
  0x97   :  { %v41_v13 = vsel %vm24_vm0, %v37_v12, 0.0 }
  0x98   :  { %42 = vadd.xlane.f32.xlu1 %v41_v13 }
 0x11d   :  { %v40_v19 = vpop.xlane.xlu1 %39 }
 0x11e   :  { %v44_v20 = vmul.f32 0.015625, %v40_v19 }
 0x120   :  { %v46_v21 = vadd.f32 1e-05, %v44_v20 }
 0x121   :  { %v43_v22 = vpop.xlane.xlu1 %42 }
 0x122   :  { %224 = vrsqrt.f32 %v46_v21  ;;  %v45_v23 = vmul.f32 0.015625, %v43_v22 }
 0x124   :  { %v47_v24 = vadd.f32 1e-05, %v45_v23 }
 0x126   :  { %226 = vrsqrt.f32 %v47_v24 }
 0x12f   :  { %v225_v25 = vpop.eup %224 }
 0x130   :  { %v50_v27 = vmul.f32 %v225_v25, %v34_v6 }
 0x132   :  { %v59_v29 = vmul.f32 %v179_v26, %v50_v27 }
 0x133   :  { %v227_v30 = vpop.eup %226 }
 0x134   :  { %v68_v31 = vadd.f32 %v180_v28, %v59_v29  ;;  %v51_v32 = vmul.f32 %v227_v30, %v35_v10 }
 0x136   :  { %v191_v33 = vpack.c.bf16 %v68_v31, %v68_v31  ;;  %v60_v34 = vmul.f32 %v179_v26, %v51_v32 }
 0x138   :  { %79 = vst.msk [vmem:[#allocation2] sm:$0xf] %vm78_vm2, %v191_v33  ;;  %v69_v35 = vadd.f32 %v180_v28, %v60_v34 }
 0x13a   :  { %v192_v36 = vpack.c.bf16 %v69_v35, %v69_v35 }
 0x13c   :  { %80 = vst.msk [vmem:[#allocation2 + $0x4] sm:$0xf] %vm78_vm2, %v192_v36 }
 0x143   :  { %v223_v37 = vld [vmem:[#allocation2] sm:$0xff]  }
 0x144   :  { %214 = vmatmul.mubr.msk.bf16.vlgmr.msra.gmra.mxu0 %vm24_vm0, %v223_v37 }
 0x204   :  { %v158_v38 = vpop.f32.mrf.mxu0 }
 0x206   :  { %v215_v39 = vpop.f32.mrf.mxu0 }
 0x208   :  { %v161_v40 = vpop.f32.mrf.mxu0 }
 0x209   :  { %v198_v41 = vpack.c.bf16 %v161_v40, %v158_v38 }
 0x20a   :  { %v216_v42 = vpop.f32.mrf.mxu0 }
 0x20b   :  { %199 = vst [vmem:[%s291_s4] sm:$0xff] %v198_v41  }

// kernel: _lambda_.79
= control target key start
LH: loop header
LB: loop body
LE: loop exit
PB: predicated region body
PF: predicated region fallthrough
CT: control target
= control target key end

     0   :  { %s851_s21 = smov 0   ;;  %s853_s22 = smov 0   ;;  %s953_s0 = inlined_call_operand.vmem [shape: bf16[2,12,8,16], index: 0, kind: input, shape index: {}, may-alias: {0,1,2}]   ;;  %s954_s1 = inlined_call_operand.vmem [shape: bf16[2,12,8,16], index: 1, kind: input, shape index: {}, may-alias: {0,1,2}]   ;;  %s955_s2 = inlined_call_operand.vmem [shape: bf16[2,12,8,16], index: 2, kind: input, shape index: {}, may-alias: {0,1,2}]   ;;  %s956_s3 = inlined_call_operand.vmem [shape: bf16[4,16,64], index: 3, kind: input, shape index: {}]   ;;  %s957_s4 = inlined_call_operand.vmem [shape: f32[1,64], index: 4, kind: input, shape index: {}]   ;;  %s958_s5 = inlined_call_operand.vmem [shape: f32[8,8], index: 5, kind: input, shape index: {}]   ;;  %s959_s6 = inlined_call_operand.vmem [shape: bf16[2,8,64], index: 6, kind: output, shape index: {}]  }
   0x1   :  { %960 = sst [smem:[#allocation3_spill]] %s959_s6  ;;  %s855_s23 = smov 0  }
   0x2   :  { %s857_s24 = smov 0   ;;  %s859_s25 = smov 0  }
   0x3 LB: > { %s25_s26 = sadd.s32 1, %s803_s23  ;;  %s28_s27 = sadd.s32 1, %s807_s24  ;;  %s811_s25 = sphi %s859_s25, %s16_s25   ;;  %s807_s24 = sphi %s857_s24, %s965_s24   ;;  %s803_s23 = sphi %s855_s23, %s964_s23   ;;  %s799_s22 = sphi %s853_s22, %s963_s22   ;;  %s795_s21 = sphi %s851_s21, %s962_s21  }
   0x4   : > { %p26_p0 = scmp.ge.s32.totalorder %s25_s26, 4  ;;  %p683_p1 = scmp.ge.s32.totalorder %s811_s25, 1 }
   0x5   : > { %p277_p2 = scmp.lt.s32.totalorder %s811_s25, 9 }
   0x6   : > { %s967_s26 = smov (%p26_p0, %s25_s26), 0  ;;  %s969_s27 = smov (!%p26_p0, %s28_s27), %s807_s24 }
   0x7   : > { %p278_p3 = pnand %p683_p1, %p277_p2  ;;  %p30_p4 = scmp.ge.s32.totalorder %s969_s27, 2 }
   0x8   : > { %p332_p5 = scmp.lt.s32.totalorder (!%p278_p3), %s799_s22, 1  ;;  %p334_p6 = scmp.lt.s32.totalorder (!%p278_p3), %s795_s21, 11 }
   0x9   : > { %s971_s27 = smov (%p30_p4, %s969_s27), 0  ;;  %281 = sbr.rel (%p278_p3) target bundleno = 953 (0x3b9), region = 44 }
   0xa   : > { %s340_s28 = sadd.s32 (!%p278_p3), 4, %s795_s21  ;;  %s350_s29 = sadd.s32 (!%p278_p3), 8, %s795_s21 }
   0xb   : > { %p343_p7 = scmp.lt.s32.totalorder (!%p278_p3), %s340_s28, 11  ;;  %p353_p8 = scmp.lt.s32.totalorder (!%p278_p3), %s350_s29, 11 }
   0xc   : > { %s961_s6 = sld [smem:[#allocation3_spill]] (!%p278_p3)  ;;  %p360_p9 = scmp.lt.s32.totalorder (!%p278_p3), %s795_s21, 3 }
   0xd   : > { %p690_p10 = scmp.ne.s32.totalorder (!%p278_p3), %s795_s21, 0 }
   0xe   : > { %s973_s22 = smov (!%p332_p5, %s799_s22), 1  ;;  %s975_s28 = smov (!%p343_p7, %s340_s28), 11 }
   0xf   : > { %s335_s30 = scalar_select %p334_p6, %s795_s21, 11 }
  0x10   : > { %s724_s7 = smul.u32 12, %s973_s22  ;;  %s689_s9 = sshll.u32 %s973_s22, 2 }
  0x11   : > { %s977_s29 = smov (!%p353_p8, %s350_s29), 11 }
  0x12   : > { %s337_s8 = sadd.s32 %s724_s7, %s335_s30  ;;  %s892_s13 = scalar_lea.vmem %s961_s6, %s689_s9 }
  0x13   : > { %s887_s10 = sshll.u32 %s337_s8, 2  ;;  %s346_s17 = sadd.s32 %s724_s7, %s975_s28 }
  0x14   : > { %s339_s16 = scalar_lea.vmem %s953_s0, %s887_s10  ;;  %s685_s18 = sshll.u32 %s346_s17, 2 }
  0x15   : > { %s356_s19 = sadd.s32 %s724_s7, %s977_s29  ;;  %s348_s30 = scalar_lea.vmem %s954_s1, %s685_s18 }
  0x16   : > { %s902_s8 = sshll.u32 %s356_s19, 2 }
  0x17   : > { %s358_s12 = scalar_lea.vmem %s955_s2, %s902_s8  ;;  %373 = sbr.rel (%p690_p10) target bundleno = 30 (0x1e), region = 48 }
  0x18   : > { %s361_s6 = scalar_select %p360_p9, %s795_s21, 3 }
  0x1a   : > { %s699_s14 = sshll.u32 %s361_s6, 3 }
  0x1b   : > { %s912_s28 = scalar_lea.vmem %s956_s3, %s699_s14 }
  0x1c   : > { %vm374_vm0 = vcmask 523264   ;;  %v813_v0 = vmov 0.0  }
  0x1d   : > { %375 = vst.msk [vmem:[#allocation2] sm:$0xff] %vm374_vm0, %v813_v0 }
  0x1e PF: > { %v377_v1 = vld [vmem:[%s348_s30] sm:$0xf]  ;;  %vm379_vm1 = vcmask 130048   ;;  %v814_v2 = vmov 0.0   ;;  %vm815_vm2 = vmmov 0   ;;  %vm429_vm3 = vcmask 64512  }
  0x1f   : > { %706 = vmatprep.subr.bf16.mxu0 %v814_v2  ;;  %v384_v3 = vsel %vm379_vm1, %v377_v1, 0  ;;  %708 = vmatprep.mubr.msk.bf16.mxu0 %vm815_vm2, %v814_v2  ;;  %v376_v4 = vld [vmem:[%s339_s16] sm:$0xf]  ;;  %vm445_vm4 = vcmask 1043456   ;;  %vm543_vm5 = vcmask 523264   ;;  %p695_p11 = scmp.ne.s32.totalorder %s795_s21, 3 }
  0x20   : > { %707 = vmatpush3.bf16.xpose.msra.mxu0 %v384_v3  ;;  %712 = vmatprep.subr.bf16.mxu1 %v814_v2  ;;  %v427_v6 = vld [vmem:[%s958_s5] sm:$0xff] }
  0x21   : > { %714 = vmatprep.mubr.msk.bf16.mxu1 %vm815_vm2, %v814_v2  ;;  %v378_v18 = vld [vmem:[%s358_s12] sm:$0xf] }
  0x22   : > { %v447_v19 = vsel %vm445_vm4, %v378_v18, 0  ;;  %v768_v23 = vld [vmem:[%s912_s28] sm:$0xff]  }
  0x23   : > { %713 = vmatpush3.bf16.msra.mxu1 %v447_v19 }
  0x24   : > { %718 = vmatprep.subr.bf16.mxu1 %v814_v2  ;;  %v489_v30 = vld [vmem:[#allocation2] sm:$0xff] }
  0x27   : > { %709 = vmatmul.mubr.msk.bf16.vlgmr.msra.gmra.mxu0 %vm379_vm1, %v376_v4 }
  0xe7   : > { %v420_v5 = vpop.f32.mrf.mxu0 }
  0xe8   : > { %v426_v7 = vmul.f32 0.25, %v420_v5 }
  0xe9   : > { %v710_v8 = vpop.f32.mrf.mxu0 }
  0xea   : > { %v428_v9 = vadd.f32 %v427_v6, %v426_v7 }
  0xeb   : > { %v423_v10 = vpop.f32.mrf.mxu0 }
  0xec   : > { %v430_v11 = vsel %vm429_vm3, %v428_v9, -inf }
  0xed   : > { %431 = vmax.xlane.f32.xlu0 %v430_v11  ;;  %v711_v12 = vpop.f32.mrf.mxu0 }
 0x176   : > { %v432_v13 = vpop.xlane.xlu0 %431 }
 0x177   : > { %v433_v14 = vsub.f32 %v428_v9, %v432_v13 }
 0x179   : > { %v434_v15 = vmul.f32 1.442695, %v433_v14 }
 0x17b   : > { %769 = vpow2.f32 %v434_v15 }
 0x188   : > { %v770_v16 = vpop.eup %769 }
 0x189   : > { %v436_v17 = vsel %vm429_vm3, %v770_v16, 0.0 }
 0x18a   : > { %437 = vadd.xlane.f32.xlu0 %v436_v17 }
 0x213   : > { %v438_v20 = vpop.xlane.xlu0 %437 }
 0x214   : > { %771 = vrcp.f32 %v438_v20 }
 0x221   : > { %v772_v21 = vpop.eup %771 }
 0x222   : > { %v440_v22 = vmul.f32 %v772_v21, %v770_v16 }
 0x224   : > { %v441_v24 = vpack.c.bf16 %v440_v22, %v440_v22 }
 0x226   : > { %715 = vmatmul.mubr.msk.bf16.vlgmr.msra.gmra.mxu1 %vm429_vm3, %v441_v24 }
 0x227   : > { %719 = vmatpush3.bf16.msra.mxu1 %v768_v23  ;;  %720 = vmatprep.mubr.msk.bf16.mxu1 %vm815_vm2, %v814_v2 }
 0x2e6   : > { %v483_v25 = vpop.f32.mrf.mxu1 }
 0x2e7   : > { %v490_v26 = vpack.c.bf16 %v483_v25, %v483_v25 }
 0x2e8   : > { %v716_v27 = vpop.f32.mrf.mxu1 }
 0x2e9   : > { %721 = vmatmul.mubr.msk.bf16.vlgmr.msra.gmra.mxu1 %vm379_vm1, %v490_v26 }
 0x2ea   : > { %v486_v28 = vpop.f32.mrf.mxu1 }
 0x2ec   : > { %v717_v29 = vpop.f32.mrf.mxu1 }
 0x3a9   : > { %v536_v31 = vpop.f32.mrf.mxu1 }
 0x3aa   : > { %v542_v32 = vadd.f32 %v536_v31, %v489_v30 }
 0x3ab   : > { %v722_v33 = vpop.f32.mrf.mxu1  ;;  %548 = sbr.rel (%p695_p11) target bundleno = 953 (0x3b9), region = 52 }
 0x3ac   : > { %544 = vst.msk [vmem:[#allocation2] sm:$0xff] %vm543_vm5, %v542_v32 }
 0x3ad   : > { %v539_v34 = vpop.f32.mrf.mxu1 }
 0x3af   : > { %v723_v35 = vpop.f32.mrf.mxu1 }
 0x3b0   : > { %v696_v37 = vld [vmem:[%s957_s4] ss:$0 sm:$0xff]  ;;  %vm559_vm6 = vcmask 519168  }
 0x3b3   : > { %v549_v36 = vld [vmem:[#allocation2] sm:$0xff] }
 0x3b4   : > { %v557_v38 = vadd.f32 %v696_v37, %v549_v36 }
 0x3b6   : > { %v558_v39 = vpack.c.bf16 %v557_v38, %v557_v38 }
 0x3b8   : > { %560 = vst.msk [vmem:[%s892_s13] sm:$0xf] %vm559_vm6, %v558_v39 }
 0x3b9 PF: > { %s16_s25 = sadd.s32 1, %s811_s25   ;;  %s962_s21 = smov %s803_s23 }
 0x3ba   : > { %p13_p12 = scmp.ge.s32.totalorder %s16_s25, 10   ;;  %s963_s22 = smov %s807_s24 }
 0x3bb   : > { %s964_s23 = smov %s967_s26  ;;  %s965_s24 = smov %s971_s27 }
 0x3bc   :  { %15 = sbr.rel (!%p13_p12) target bundleno = 3 (0x3), region = 91 }

// kernel: _lambda_.84
= control target key start
LH: loop header
LB: loop body
LE: loop exit
PB: predicated region body
PF: predicated region fallthrough
CT: control target
= control target key end

     0   :  { %s805_s18 = smov 0   ;;  %s807_s19 = smov 0   ;;  %s904_s0 = inlined_call_operand.vmem [shape: bf16[2,12,8,8], index: 0, kind: input, shape index: {}, may-alias: {0,1,2}]   ;;  %s905_s1 = inlined_call_operand.vmem [shape: bf16[2,12,8,8], index: 1, kind: input, shape index: {}, may-alias: {0,1,2}]   ;;  %s906_s2 = inlined_call_operand.vmem [shape: bf16[2,12,8,8], index: 2, kind: input, shape index: {}, may-alias: {0,1,2}]   ;;  %s907_s3 = inlined_call_operand.vmem [shape: bf16[4,8,32], index: 3, kind: input, shape index: {}]   ;;  %s908_s4 = inlined_call_operand.vmem [shape: f32[1,32], index: 4, kind: input, shape index: {}]   ;;  %s909_s5 = inlined_call_operand.vmem [shape: bf16[2,8,32], index: 5, kind: output, shape index: {}]  }
   0x1   :  { %s809_s20 = smov 0   ;;  %s811_s21 = smov 0  }
   0x2   :  { %s813_s22 = smov 0  }
   0x3 LB: > { %s24_s23 = sadd.s32 1, %s762_s20  ;;  %s27_s24 = sadd.s32 1, %s766_s21  ;;  %s770_s22 = sphi %s813_s22, %s15_s22   ;;  %s766_s21 = sphi %s811_s21, %s913_s21   ;;  %s762_s20 = sphi %s809_s20, %s912_s20   ;;  %s758_s19 = sphi %s807_s19, %s911_s19   ;;  %s754_s18 = sphi %s805_s18, %s910_s18  }
   0x4   : > { %p25_p0 = scmp.ge.s32.totalorder %s24_s23, 4  ;;  %p646_p1 = scmp.ge.s32.totalorder %s770_s22, 1 }
   0x5   : > { %p251_p2 = scmp.lt.s32.totalorder %s770_s22, 9 }
   0x6   : > { %s915_s23 = smov (%p25_p0, %s24_s23), 0  ;;  %s917_s24 = smov (!%p25_p0, %s27_s24), %s766_s21 }
   0x7   : > { %p252_p3 = pnand %p646_p1, %p251_p2  ;;  %p29_p4 = scmp.ge.s32.totalorder %s917_s24, 2 }
   0x8   : > { %p303_p5 = scmp.lt.s32.totalorder (!%p252_p3), %s758_s19, 1  ;;  %p305_p6 = scmp.lt.s32.totalorder (!%p252_p3), %s754_s18, 11 }
   0x9   : > { %s919_s24 = smov (%p29_p4, %s917_s24), 0  ;;  %255 = sbr.rel (%p252_p3) target bundleno = 950 (0x3b6), region = 40 }
   0xa   : > { %s311_s25 = sadd.s32 (!%p252_p3), 4, %s754_s18  ;;  %s321_s26 = sadd.s32 (!%p252_p3), 8, %s754_s18 }
   0xb   : > { %p314_p7 = scmp.lt.s32.totalorder (!%p252_p3), %s311_s25, 11  ;;  %p324_p8 = scmp.lt.s32.totalorder (!%p252_p3), %s321_s26, 11 }
   0xc   : > { %p331_p9 = scmp.lt.s32.totalorder (!%p252_p3), %s754_s18, 3  ;;  %p652_p10 = scmp.ne.s32.totalorder (!%p252_p3), %s754_s18, 0 }
   0xe   : > { %s921_s19 = smov (!%p303_p5, %s758_s19), 1  ;;  %s923_s25 = smov (!%p314_p7, %s311_s25), 11 }
   0xf   : > { %s306_s27 = scalar_select %p305_p6, %s754_s18, 11 }
  0x10   : > { %s684_s28 = smul.u32 12, %s921_s19  ;;  %s651_s30 = sshll.u32 %s921_s19, 2 }
  0x11   : > { %s846_s9 = scalar_lea.vmem %s909_s5, %s651_s30  ;;  %s925_s26 = smov (!%p324_p8, %s321_s26), 11 }
  0x12   : > { %s308_s29 = sadd.s32 %s684_s28, %s306_s27  ;;  %s317_s13 = sadd.s32 %s684_s28, %s923_s25 }
  0x13   : > { %s841_s6 = sshll.u32 %s308_s29, 2  ;;  %s648_s14 = sshll.u32 %s317_s13, 2 }
  0x14   : > { %s310_s12 = scalar_lea.vmem %s904_s0, %s841_s6  ;;  %s327_s15 = sadd.s32 %s684_s28, %s925_s26 }
  0x15   : > { %s319_s19 = scalar_lea.vmem %s905_s1, %s648_s14  ;;  %s856_s27 = sshll.u32 %s327_s15, 2 }
  0x16   : > { %s329_s7 = scalar_lea.vmem %s906_s2, %s856_s27  ;;  %343 = sbr.rel (%p652_p10) target bundleno = 29 (0x1d), region = 44 }
  0x17   : > { %s332_s8 = scalar_select %p331_p9, %s754_s18, 3 }
  0x19   : > { %s650_s10 = sshll.u32 %s332_s8, 2 }
  0x1a   : > { %s866_s25 = scalar_lea.vmem %s907_s3, %s650_s10 }
  0x1b   : > { %vm344_vm0 = vcmask 261120   ;;  %v772_v0 = vmov 0.0  }
  0x1c   : > { %345 = vst.msk [vmem:[#allocation2] sm:$0xff] %vm344_vm0, %v772_v0 }
  0x1d PF: > { %v347_v1 = vld [vmem:[%s319_s19] sm:$0xf]  ;;  %vm349_vm1 = vcmask 64512   ;;  %v773_v2 = vmov 0.0   ;;  %vm774_vm2 = vmmov 0   ;;  %vm412_vm3 = vcmask 1043456  }
  0x1e   : > { %666 = vmatprep.subr.bf16.mxu0 %v773_v2  ;;  %v354_v3 = vsel %vm349_vm1, %v347_v1, 0  ;;  %668 = vmatprep.mubr.msk.bf16.mxu0 %vm774_vm2, %v773_v2  ;;  %v346_v4 = vld [vmem:[%s310_s12] sm:$0xf]  ;;  %vm506_vm4 = vcmask 261120   ;;  %p656_p11 = scmp.ne.s32.totalorder %s754_s18, 3 }
  0x1f   : > { %667 = vmatpush3.bf16.xpose.msra.mxu0 %v354_v3  ;;  %672 = vmatprep.subr.bf16.mxu1 %v773_v2  ;;  %v348_v16 = vld [vmem:[%s329_s7] sm:$0xf] }
  0x20   : > { %674 = vmatprep.mubr.msk.bf16.mxu1 %vm774_vm2, %v773_v2  ;;  %v414_v17 = vsel %vm412_vm3, %v348_v16, 0  ;;  %v458_v20 = vld [vmem:[%s866_s25] sm:$0xf] }
  0x21   : > { %673 = vmatpush3.bf16.msra.mxu1 %v414_v17  ;;  %v463_v22 = vsel %vm412_vm3, %v458_v20, 0 }
  0x22   : > { %678 = vmatprep.subr.bf16.mxu1 %v773_v2 }
  0x23   : > { %v456_v29 = vld [vmem:[#allocation2] sm:$0xff] }
  0x26   : > { %669 = vmatmul.mubr.msk.bf16.vlgmr.msra.gmra.mxu0 %vm349_vm1, %v346_v4 }
  0xe6   : > { %v390_v5 = vpop.f32.mrf.mxu0 }
  0xe7   : > { %v396_v6 = vmul.f32 0.35355338, %v390_v5 }
  0xe8   : > { %v670_v7 = vpop.f32.mrf.mxu0 }
  0xe9   : > { %v397_v8 = vsel %vm349_vm1, %v396_v6, -inf }
  0xea   : > { %398 = vmax.xlane.f32.xlu0 %v397_v8  ;;  %v393_v9 = vpop.f32.mrf.mxu0 }
  0xec   : > { %v671_v10 = vpop.f32.mrf.mxu0 }
 0x173   : > { %v399_v11 = vpop.xlane.xlu0 %398 }
 0x174   : > { %v400_v12 = vsub.f32 %v396_v6, %v399_v11 }
 0x176   : > { %v401_v13 = vmul.f32 1.442695, %v400_v12 }
 0x178   : > { %728 = vpow2.f32 %v401_v13 }
 0x185   : > { %v729_v14 = vpop.eup %728 }
 0x186   : > { %v403_v15 = vsel %vm349_vm1, %v729_v14, 0.0 }
 0x187   : > { %404 = vadd.xlane.f32.xlu0 %v403_v15 }
 0x210   : > { %v405_v18 = vpop.xlane.xlu0 %404 }
 0x211   : > { %730 = vrcp.f32 %v405_v18 }
 0x21e   : > { %v731_v19 = vpop.eup %730 }
 0x21f   : > { %v407_v21 = vmul.f32 %v731_v19, %v729_v14 }
 0x221   : > { %v408_v23 = vpack.c.bf16 %v407_v21, %v407_v21 }
 0x223   : > { %675 = vmatmul.mubr.msk.bf16.vlgmr.msra.gmra.mxu1 %vm349_vm1, %v408_v23 }
 0x224   : > { %679 = vmatpush3.bf16.msra.mxu1 %v463_v22  ;;  %680 = vmatprep.mubr.msk.bf16.mxu1 %vm774_vm2, %v773_v2 }
 0x2e3   : > { %v450_v24 = vpop.f32.mrf.mxu1 }
 0x2e4   : > { %v457_v25 = vpack.c.bf16 %v450_v24, %v450_v24 }
 0x2e5   : > { %v676_v26 = vpop.f32.mrf.mxu1 }
 0x2e6   : > { %681 = vmatmul.mubr.msk.bf16.vlgmr.msra.gmra.mxu1 %vm349_vm1, %v457_v25 }
 0x2e7   : > { %v453_v27 = vpop.f32.mrf.mxu1 }
 0x2e9   : > { %v677_v28 = vpop.f32.mrf.mxu1 }
 0x3a6   : > { %v499_v30 = vpop.f32.mrf.mxu1 }
 0x3a7   : > { %v505_v31 = vadd.f32 %v499_v30, %v456_v29 }
 0x3a8   : > { %v682_v32 = vpop.f32.mrf.mxu1  ;;  %511 = sbr.rel (%p656_p11) target bundleno = 950 (0x3b6), region = 48 }
 0x3a9   : > { %507 = vst.msk [vmem:[#allocation2] sm:$0xff] %vm506_vm4, %v505_v31 }
 0x3aa   : > { %v502_v33 = vpop.f32.mrf.mxu1 }
 0x3ac   : > { %v683_v34 = vpop.f32.mrf.mxu1 }
 0x3ad   : > { %v657_v36 = vld [vmem:[%s908_s4] ss:$0 sm:$0xff]  ;;  %vm522_vm5 = vcmask 257024  }
 0x3b0   : > { %v512_v35 = vld [vmem:[#allocation2] sm:$0xff] }
 0x3b1   : > { %v520_v37 = vadd.f32 %v657_v36, %v512_v35 }
 0x3b3   : > { %v521_v38 = vpack.c.bf16 %v520_v37, %v520_v37 }
 0x3b5   : > { %523 = vst.msk [vmem:[%s846_s9] sm:$0xf] %vm522_vm5, %v521_v38 }
 0x3b6 PF: > { %s15_s22 = sadd.s32 1, %s770_s22   ;;  %s910_s18 = smov %s762_s20 }
 0x3b7   : > { %p12_p12 = scmp.ge.s32.totalorder %s15_s22, 10   ;;  %s911_s19 = smov %s766_s21 }
 0x3b8   : > { %s912_s20 = smov %s915_s23  ;;  %s913_s21 = smov %s919_s24 }
 0x3b9   :  { %14 = sbr.rel (!%p12_p12) target bundleno = 3 (0x3), region = 87 }

// kernel: _lambda_.87
= control target key start
LH: loop header
LB: loop body
LE: loop exit
PB: predicated region body
PF: predicated region fallthrough
CT: control target
= control target key end

     0   :  { %s805_s18 = smov 0   ;;  %s807_s19 = smov 0   ;;  %s904_s0 = inlined_call_operand.vmem [shape: bf16[2,6,8,8], index: 0, kind: input, shape index: {}, may-alias: {0,1,2}]   ;;  %s905_s1 = inlined_call_operand.vmem [shape: bf16[2,6,8,8], index: 1, kind: input, shape index: {}, may-alias: {0,1,2}]   ;;  %s906_s2 = inlined_call_operand.vmem [shape: bf16[2,6,8,8], index: 2, kind: input, shape index: {}, may-alias: {0,1,2}]   ;;  %s907_s3 = inlined_call_operand.vmem [shape: bf16[2,8,16], index: 3, kind: input, shape index: {}]   ;;  %s908_s4 = inlined_call_operand.vmem [shape: f32[1,16], index: 4, kind: input, shape index: {}]   ;;  %s909_s5 = inlined_call_operand.vmem [shape: bf16[2,8,16], index: 5, kind: output, shape index: {}]  }
   0x1   :  { %s809_s20 = smov 0   ;;  %s811_s21 = smov 0  }
   0x2   :  { %s813_s22 = smov 0  }
   0x3 LB: > { %s24_s23 = sadd.s32 1, %s762_s20  ;;  %s27_s24 = sadd.s32 1, %s766_s21  ;;  %s770_s22 = sphi %s813_s22, %s15_s22   ;;  %s766_s21 = sphi %s811_s21, %s913_s21   ;;  %s762_s20 = sphi %s809_s20, %s912_s20   ;;  %s758_s19 = sphi %s807_s19, %s911_s19   ;;  %s754_s18 = sphi %s805_s18, %s910_s18  }
   0x4   : > { %p25_p0 = scmp.ge.s32.totalorder %s24_s23, 2  ;;  %p646_p1 = scmp.ge.s32.totalorder %s770_s22, 1 }
   0x5   : > { %p251_p2 = scmp.lt.s32.totalorder %s770_s22, 5 }
   0x6   : > { %s915_s23 = smov (%p25_p0, %s24_s23), 0  ;;  %s917_s24 = smov (!%p25_p0, %s27_s24), %s766_s21 }
   0x7   : > { %p252_p3 = pnand %p646_p1, %p251_p2  ;;  %p29_p4 = scmp.ge.s32.totalorder %s917_s24, 2 }
   0x8   : > { %p303_p5 = scmp.lt.s32.totalorder (!%p252_p3), %s758_s19, 1  ;;  %p305_p6 = scmp.lt.s32.totalorder (!%p252_p3), %s754_s18, 5 }
   0x9   : > { %s919_s24 = smov (%p29_p4, %s917_s24), 0  ;;  %255 = sbr.rel (%p252_p3) target bundleno = 950 (0x3b6), region = 40 }
   0xa   : > { %s311_s25 = sadd.s32 (!%p252_p3), 2, %s754_s18  ;;  %s321_s26 = sadd.s32 (!%p252_p3), 4, %s754_s18 }
   0xb   : > { %p314_p7 = scmp.lt.s32.totalorder (!%p252_p3), %s311_s25, 5  ;;  %p324_p8 = scmp.lt.s32.totalorder (!%p252_p3), %s321_s26, 5 }
   0xc   : > { %p331_p9 = scmp.lt.s32.totalorder (!%p252_p3), %s754_s18, 1  ;;  %p652_p10 = scmp.ne.s32.totalorder (!%p252_p3), %s754_s18, 0 }
   0xe   : > { %s921_s19 = smov (!%p303_p5, %s758_s19), 1  ;;  %s923_s25 = smov (!%p314_p7, %s311_s25), 5 }
   0xf   : > { %s306_s27 = scalar_select %p305_p6, %s754_s18, 5 }
  0x10   : > { %s684_s28 = smul.u32 6, %s921_s19  ;;  %s651_s30 = sshll.u32 %s921_s19, 2 }
  0x11   : > { %s846_s9 = scalar_lea.vmem %s909_s5, %s651_s30  ;;  %s925_s26 = smov (!%p324_p8, %s321_s26), 5 }
  0x12   : > { %s308_s29 = sadd.s32 %s684_s28, %s306_s27  ;;  %s317_s13 = sadd.s32 %s684_s28, %s923_s25 }
  0x13   : > { %s841_s6 = sshll.u32 %s308_s29, 2  ;;  %s648_s14 = sshll.u32 %s317_s13, 2 }
  0x14   : > { %s310_s12 = scalar_lea.vmem %s904_s0, %s841_s6  ;;  %s327_s15 = sadd.s32 %s684_s28, %s925_s26 }
  0x15   : > { %s319_s19 = scalar_lea.vmem %s905_s1, %s648_s14  ;;  %s856_s27 = sshll.u32 %s327_s15, 2 }
  0x16   : > { %s329_s7 = scalar_lea.vmem %s906_s2, %s856_s27  ;;  %343 = sbr.rel (%p652_p10) target bundleno = 29 (0x1d), region = 44 }
  0x17   : > { %s332_s8 = scalar_select %p331_p9, %s754_s18, 1 }
  0x19   : > { %s650_s10 = sshll.u32 %s332_s8, 2 }
  0x1a   : > { %s866_s25 = scalar_lea.vmem %s907_s3, %s650_s10 }
  0x1b   : > { %vm344_vm0 = vcmask 130048   ;;  %v772_v0 = vmov 0.0  }
  0x1c   : > { %345 = vst.msk [vmem:[#allocation2] sm:$0xff] %vm344_vm0, %v772_v0 }
  0x1d PF: > { %v347_v1 = vld [vmem:[%s319_s19] sm:$0xf]  ;;  %vm349_vm1 = vcmask 64512   ;;  %v773_v2 = vmov 0.0   ;;  %vm774_vm2 = vmmov 0   ;;  %vm412_vm3 = vcmask 1043456  }
  0x1e   : > { %666 = vmatprep.subr.bf16.mxu0 %v773_v2  ;;  %v354_v3 = vsel %vm349_vm1, %v347_v1, 0  ;;  %668 = vmatprep.mubr.msk.bf16.mxu0 %vm774_vm2, %v773_v2  ;;  %v346_v4 = vld [vmem:[%s310_s12] sm:$0xf]  ;;  %vm506_vm4 = vcmask 130048   ;;  %p656_p11 = scmp.ne.s32.totalorder %s754_s18, 1 }
  0x1f   : > { %667 = vmatpush3.bf16.xpose.msra.mxu0 %v354_v3  ;;  %672 = vmatprep.subr.bf16.mxu1 %v773_v2  ;;  %v348_v16 = vld [vmem:[%s329_s7] sm:$0xf] }
  0x20   : > { %674 = vmatprep.mubr.msk.bf16.mxu1 %vm774_vm2, %v773_v2  ;;  %v414_v17 = vsel %vm412_vm3, %v348_v16, 0  ;;  %v458_v20 = vld [vmem:[%s866_s25] sm:$0xf] }
  0x21   : > { %673 = vmatpush3.bf16.msra.mxu1 %v414_v17  ;;  %v463_v22 = vsel %vm412_vm3, %v458_v20, 0 }
  0x22   : > { %678 = vmatprep.subr.bf16.mxu1 %v773_v2 }
  0x23   : > { %v456_v29 = vld [vmem:[#allocation2] sm:$0xff] }
  0x26   : > { %669 = vmatmul.mubr.msk.bf16.vlgmr.msra.gmra.mxu0 %vm349_vm1, %v346_v4 }
  0xe6   : > { %v390_v5 = vpop.f32.mrf.mxu0 }
  0xe7   : > { %v396_v6 = vmul.f32 0.35355338, %v390_v5 }
  0xe8   : > { %v670_v7 = vpop.f32.mrf.mxu0 }
  0xe9   : > { %v397_v8 = vsel %vm349_vm1, %v396_v6, -inf }
  0xea   : > { %398 = vmax.xlane.f32.xlu0 %v397_v8  ;;  %v393_v9 = vpop.f32.mrf.mxu0 }
  0xec   : > { %v671_v10 = vpop.f32.mrf.mxu0 }
 0x173   : > { %v399_v11 = vpop.xlane.xlu0 %398 }
 0x174   : > { %v400_v12 = vsub.f32 %v396_v6, %v399_v11 }
 0x176   : > { %v401_v13 = vmul.f32 1.442695, %v400_v12 }
 0x178   : > { %728 = vpow2.f32 %v401_v13 }
 0x185   : > { %v729_v14 = vpop.eup %728 }
 0x186   : > { %v403_v15 = vsel %vm349_vm1, %v729_v14, 0.0 }
 0x187   : > { %404 = vadd.xlane.f32.xlu0 %v403_v15 }
 0x210   : > { %v405_v18 = vpop.xlane.xlu0 %404 }
 0x211   : > { %730 = vrcp.f32 %v405_v18 }
 0x21e   : > { %v731_v19 = vpop.eup %730 }
 0x21f   : > { %v407_v21 = vmul.f32 %v731_v19, %v729_v14 }
 0x221   : > { %v408_v23 = vpack.c.bf16 %v407_v21, %v407_v21 }
 0x223   : > { %675 = vmatmul.mubr.msk.bf16.vlgmr.msra.gmra.mxu1 %vm349_vm1, %v408_v23 }
 0x224   : > { %679 = vmatpush3.bf16.msra.mxu1 %v463_v22  ;;  %680 = vmatprep.mubr.msk.bf16.mxu1 %vm774_vm2, %v773_v2 }
 0x2e3   : > { %v450_v24 = vpop.f32.mrf.mxu1 }
 0x2e4   : > { %v457_v25 = vpack.c.bf16 %v450_v24, %v450_v24 }
 0x2e5   : > { %v676_v26 = vpop.f32.mrf.mxu1 }
 0x2e6   : > { %681 = vmatmul.mubr.msk.bf16.vlgmr.msra.gmra.mxu1 %vm349_vm1, %v457_v25 }
 0x2e7   : > { %v453_v27 = vpop.f32.mrf.mxu1 }
 0x2e9   : > { %v677_v28 = vpop.f32.mrf.mxu1 }
 0x3a6   : > { %v499_v30 = vpop.f32.mrf.mxu1 }
 0x3a7   : > { %v505_v31 = vadd.f32 %v499_v30, %v456_v29 }
 0x3a8   : > { %v682_v32 = vpop.f32.mrf.mxu1  ;;  %511 = sbr.rel (%p656_p11) target bundleno = 950 (0x3b6), region = 48 }
 0x3a9   : > { %507 = vst.msk [vmem:[#allocation2] sm:$0xff] %vm506_vm4, %v505_v31 }
 0x3aa   : > { %v502_v33 = vpop.f32.mrf.mxu1 }
 0x3ac   : > { %v683_v34 = vpop.f32.mrf.mxu1 }
 0x3ad   : > { %v657_v36 = vld [vmem:[%s908_s4] ss:$0 sm:$0xff]  ;;  %vm522_vm5 = vcmask 125952  }
 0x3b0   : > { %v512_v35 = vld [vmem:[#allocation2] sm:$0xff] }
 0x3b1   : > { %v520_v37 = vadd.f32 %v657_v36, %v512_v35 }
 0x3b3   : > { %v521_v38 = vpack.c.bf16 %v520_v37, %v520_v37 }
 0x3b5   : > { %523 = vst.msk [vmem:[%s846_s9] sm:$0xf] %vm522_vm5, %v521_v38 }
 0x3b6 PF: > { %s15_s22 = sadd.s32 1, %s770_s22   ;;  %s910_s18 = smov %s762_s20 }
 0x3b7   : > { %p12_p12 = scmp.ge.s32.totalorder %s15_s22, 6   ;;  %s911_s19 = smov %s766_s21 }
 0x3b8   : > { %s912_s20 = smov %s915_s23  ;;  %s913_s21 = smov %s919_s24 }
 0x3b9   :  { %14 = sbr.rel (!%p12_p12) target bundleno = 3 (0x3), region = 87 }

</bundles_post_ra>
